<compile_context>
chip_gen: v6e
topology: v6e:2x2x1
jax: 0.10.0
libtpu: 0.0.40
codegen_flags: <defaults>
</compile_context>

<pallas_src>
import math
from functools import partial

import jax
import jax.numpy as jnp
from jax.experimental import pallas as pl
from jax.experimental.pallas import tpu as pltpu


def _attn_kernel(xkv_ref, mask_ref, bias_ref,
                 wq_ref, bq_ref, wk_ref, bk_ref, wv_ref, bv_ref,
                 wo_ref, bo_ref, gamma_ref, beta_ref,
                 out_ref,
                 kT_ref, v_ref, ctx_ref,
                 *, num_heads, head_dim, eps, q_tile, cache_kv):
    d = head_dim
    TQ = q_tile

    # ---- K / V projections --------------------------------------------------
    # Built once per batch element (q == 0) when the q axis is sequential; the
    # head-major scratch persists across the q grid steps. K is stored already
    # transposed (nh, d, S) so the score matmul is a plain (TQ,d)@(d,S).
    def _compute_kv():
        xkv = xkv_ref[...]                                               # (S, H) bf16
        k = jnp.dot(xkv, wk_ref[...], preferred_element_type=jnp.float32) + bk_ref[...]
        v = jnp.dot(xkv, wv_ref[...], preferred_element_type=jnp.float32) + bv_ref[...]
        for h in range(num_heads):
            sl = slice(h * d, (h + 1) * d)
            kT_ref[h] = k[:, sl].T.astype(jnp.bfloat16)                  # (d, S)
            v_ref[h] = v[:, sl].astype(jnp.bfloat16)                     # (S, d)

    if cache_kv:
        @pl.when(pl.program_id(1) == 0)
        def _():
            _compute_kv()
    else:
        _compute_kv()

    # ---- Q projection on this query tile (rows sliced from the KV block). ---
    row0 = pl.multiple_of(pl.program_id(1) * TQ, TQ)
    xq = xkv_ref[pl.ds(row0, TQ), :]                                     # (TQ, H) bf16
    scale = 1.0 / math.sqrt(d)
    q = (jnp.dot(xq, wq_ref[...], preferred_element_type=jnp.float32)
         + bq_ref[...]) * scale                                          # (TQ, H) f32

    # bias already scaled by bias_coef host-side; mask broadcasts over q rows.
    bm = bias_ref[...] + mask_ref[...]                                   # (TQ, S) f32

    # ---- Per-head attention; ctx packed into a (TQ, H) scratch at static ----
    # lane offsets so the output projection below is a single K=H matmul.
    for h in range(num_heads):
        sl = slice(h * d, (h + 1) * d)
        qh = q[:, sl].astype(jnp.bfloat16)                               # (TQ, d)
        s = jnp.dot(qh, kT_ref[h], preferred_element_type=jnp.float32)   # (TQ, S)
        s = s + bm
        m = jnp.max(s, axis=-1, keepdims=True)
        p = jnp.exp(s - m)
        r = pl.reciprocal(jnp.sum(p, axis=-1, keepdims=True), approx=True)
        p = (p * r).astype(jnp.bfloat16)
        # attention-probs dropout: identity (eval mode)
        ctx = jnp.dot(p, v_ref[h], preferred_element_type=jnp.float32)   # (TQ, d)
        ctx_ref[:, sl] = ctx.astype(jnp.bfloat16)

    # ---- Single batched output projection, residual, LayerNorm (f32). -------
    attn = (jnp.dot(ctx_ref[...], wo_ref[...], preferred_element_type=jnp.float32)
            + bo_ref[...])                                               # (TQ, H)
    # output dropout: identity (eval mode)
    y = attn + xq.astype(jnp.float32)
    mean = jnp.mean(y, axis=-1, keepdims=True)
    yc = y - mean
    var = jnp.mean(yc * yc, axis=-1, keepdims=True)
    out = yc * jax.lax.rsqrt(var + eps) * gamma_ref[...] + beta_ref[...]
    out_ref[...] = out.astype(out_ref.dtype)


def _pick_q_tile(seq_len, target):
    """Largest query tile <= target that divides S (multiple of 8), else full S."""
    if seq_len <= target:
        return seq_len
    for t in range(target, 7, -8):
        if seq_len % t == 0:
            return t
    return seq_len


def prepare_attention_params(params):
    """One-time weight preparation (bf16 casts). Call once, reuse per step so
    the casts are not re-materialized on every forward call."""
    return {
        "wq": params["wq_t"].astype(jnp.bfloat16),
        "wk": params["wk_t"].astype(jnp.bfloat16),
        "wv": params["wv_t"].astype(jnp.bfloat16),
        "wo": params["wo_t"].astype(jnp.bfloat16),
        "bq": params["bq"].astype(jnp.float32),
        "bk": params["bk"].astype(jnp.float32),
        "bv": params["bv"].astype(jnp.float32),
        "bo": params["bo"].astype(jnp.float32),
        "gamma": params["gamma"].astype(jnp.float32),
        "beta": params["beta"].astype(jnp.float32),
    }


def custom_bert_attention(hidden_states, attention_mask, bias_matrix, prepared,
                          *, num_heads, bias_coef, eps=1e-12, q_tile=512):
    B, S, H = hidden_states.shape
    assert H % num_heads == 0
    d = H // num_heads
    TQ = _pick_q_tile(S, q_tile)
    n_q = S // TQ

    # K/V caching across query tiles needs the q axis to be sequential
    # ("arbitrary"); keep it only when the batch axis still provides >= 2
    # parallel grid points for megacore. Otherwise recompute K/V per tile and
    # keep both axes parallel.
    cache_kv = (n_q > 1) and (B >= 2)
    semantics = ("parallel", "arbitrary") if cache_kv else ("parallel", "parallel")

    # Activations as bf16 (halves the largest per-step DMA; MXU inputs are bf16
    # anyway); bias pre-scaled by bias_coef outside the kernel.
    x_bf16 = hidden_states.astype(jnp.bfloat16)
    bias_scaled = (bias_matrix * jnp.float32(bias_coef)).astype(jnp.float32)
    mask = attention_mask.astype(jnp.float32)

    kernel = partial(_attn_kernel, num_heads=num_heads, head_dim=d,
                     eps=float(eps), q_tile=TQ, cache_kv=cache_kv)

    # ---- VMEM budget: real per-step footprint + 25% headroom, capped below ---
    # the physical per-core VMEM (64 MiB on v7x, 128 MiB on v5e/v6e).
    bf16, f32 = 2, 4
    out_bytes = hidden_states.dtype.itemsize
    est = (S * H * bf16                      # full-seq activation block (1 buf)
           + S * f32                         # mask block
           + 2 * TQ * S * f32                # bias rows block (double-buffered)
           + 2 * 4 * H * H * bf16            # Wq/Wk/Wv/Wo (worst case 2 bufs)
           + 2 * 6 * H * f32                 # bq/bk/bv/bo/gamma/beta
           + 2 * TQ * H * out_bytes          # output block (double-buffered)
           + 2 * num_heads * S * d * bf16    # kT + v head-major scratch
           + TQ * H * bf16                   # ctx scratch
           + 2 * TQ * S * f32                # score / exp intermediates
           + 2 * S * H * f32                 # K/V f32 intermediates at q == 0
           + 2 * TQ * H * f32)               # q / attn f32 intermediates
    try:
        vmem_cap = int(pltpu.get_tpu_info().vmem_capacity_bytes)
    except Exception:
        vmem_cap = 64 * 1024 * 1024          # conservative: v7x per-TC VMEM
    vmem_limit = int(min(vmem_cap * 7 // 8,
                         max(int(est * 1.25), 16 * 1024 * 1024)))

    def _run(single_buffer):
        def spec(shape, idx):
            if single_buffer:
                return pl.BlockSpec(shape, idx, pipeline_mode=pl.Buffered(1))
            return pl.BlockSpec(shape, idx)

        def const(shape):
            return spec(shape, lambda b, q: (0,) * len(shape))

        in_specs = [
            spec((None, S, H), lambda b, q: (b, 0, 0)),      # hidden, bf16, full seq
            spec((None, 1, S), lambda b, q: (b, 0, 0)),      # additive mask (B,1,S)
            pl.BlockSpec((TQ, S), lambda b, q: (q, 0)),      # pre-scaled bias rows
            const((H, H)), const((1, H)),                    # Wq^T (bf16), bq
            const((H, H)), const((1, H)),                    # Wk^T, bk
            const((H, H)), const((1, H)),                    # Wv^T, bv
            const((H, H)), const((1, H)),                    # Wo^T, bo
            const((1, H)), const((1, H)),                    # LayerNorm gamma, beta
        ]
        out_spec = pl.BlockSpec((None, TQ, H), lambda b, q: (b, q, 0))
        scratch_shapes = [
            pltpu.VMEM((num_heads, d, S), jnp.bfloat16),     # K, head-major, pre-T
            pltpu.VMEM((num_heads, S, d), jnp.bfloat16),     # V, head-major
            pltpu.VMEM((TQ, H), jnp.bfloat16),               # packed per-tile context
        ]
        return pl.pallas_call(
            kernel,
            out_shape=jax.ShapeDtypeStruct((B, S, H), hidden_states.dtype),
            grid_spec=pltpu.PrefetchScalarGridSpec(
                num_scalar_prefetch=0,
                grid=(B, n_q),
                in_specs=in_specs,
                out_specs=out_spec,
                scratch_shapes=scratch_shapes,
            ),
            compiler_params=pltpu.CompilerParams(
                dimension_semantics=semantics,
                vmem_limit_bytes=vmem_limit,
            ),
        )(x_bf16, mask, bias_scaled,
          prepared["wq"], prepared["bq"], prepared["wk"], prepared["bk"],
          prepared["wv"], prepared["bv"], prepared["wo"], prepared["bo"],
          prepared["gamma"], prepared["beta"])

    try:
        return _run(True)
    except Exception:
        # pl.Buffered(1) (single-buffered grid-invariant operands) unsupported on
        # this jax version -> fall back to default double-buffering.
        return _run(False)


def _reference(hidden, mask, bias_matrix, params, num_heads, bias_coef, eps=1e-12):
    """Pure-JAX f32 reference mirroring the PyTorch forward (eval mode)."""
    B, S, H = hidden.shape
    d = H // num_heads
    q = hidden @ params["wq_t"] + params["bq"]
    k = hidden @ params["wk_t"] + params["bk"]
    v = hidden @ params["wv_t"] + params["bv"]

    def split_heads(t):
        return t.reshape(B, S, num_heads, d).transpose(0, 2, 1, 3)       # (B, nh, S, d)

    qh, kh, vh = split_heads(q), split_heads(k), split_heads(v)
    scores = jnp.einsum("bhqd,bhkd->bhqk", qh, kh) / math.sqrt(d)
    scores = scores + (bias_matrix[None, None] * bias_coef)
    scores = scores + mask[:, None, :, :]
    probs = jax.nn.softmax(scores, axis=-1)
    ctx = jnp.einsum("bhqk,bhkd->bhqd", probs, vh)
    ctx = ctx.transpose(0, 2, 1, 3).reshape(B, S, H)
    attn_out = ctx @ params["wo_t"] + params["bo"]
    y = attn_out + hidden
    mean = y.mean(-1, keepdims=True)
    var = ((y - mean) ** 2).mean(-1, keepdims=True)
    return (y - mean) * jax.lax.rsqrt(var + eps) * params["gamma"] + params["beta"]


if __name__ == "__main__":
    B, S, H, NH = 2, 8, 32, 4
    key = jax.random.PRNGKey(0)
    ks = jax.random.split(key, 10)
    scale = 0.02
    params = {
        "wq_t": jax.random.normal(ks[0], (H, H), jnp.float32) * scale,
        "bq":   jax.random.normal(ks[1], (1, H), jnp.float32) * scale,
        "wk_t": jax.random.normal(ks[2], (H, H), jnp.float32) * scale,
        "bk":   jax.random.normal(ks[3], (1, H), jnp.float32) * scale,
        "wv_t": jax.random.normal(ks[4], (H, H), jnp.float32) * scale,
        "bv":   jax.random.normal(ks[5], (1, H), jnp.float32) * scale,
        "wo_t": jax.random.normal(ks[6], (H, H), jnp.float32) * scale,
        "bo":   jax.random.normal(ks[7], (1, H), jnp.float32) * scale,
        "gamma": jnp.ones((1, H), jnp.float32),
        "beta":  jnp.zeros((1, H), jnp.float32),
    }
    hidden = jax.random.normal(ks[8], (B, S, H), jnp.float32)
    # additive attention mask (B, 1, S): mask out last 2 keys of batch element 1
    mask = jnp.zeros((B, 1, S), jnp.float32).at[1, :, -2:].set(-1e4)
    bias_matrix = jax.random.normal(ks[9], (S, S), jnp.float32) * 0.1
    bias_coef = 0.5

    prepared = prepare_attention_params(params)   # one-time bf16 weight casts
    out = custom_bert_attention(hidden, mask, bias_matrix, prepared,
                                num_heads=NH, bias_coef=bias_coef)
    out = jax.block_until_ready(out)

    ref = _reference(hidden, mask, bias_matrix, params, NH, bias_coef)
    assert out.shape == (B, S, H)
    # bf16 activations/MXU inputs + approx reciprocal => looser tolerance vs f32 ref.
    err = jnp.max(jnp.abs(out - ref))
    assert jnp.allclose(out, ref, atol=2e-2, rtol=2e-2), \
        f"mismatch vs reference, max abs err = {err}"
    print("KERNEL_OK")
</pallas_src>

<mosaic_0001>
module attributes {stable_mosaic.version = 11 : i64} {
  func.func @_attn_kernel(%arg0: i32, %arg1: i32, %arg2: memref<1x8x32xbf16, #tpu.memory_space<vmem>>, %arg3: memref<1x1x8xf32, #tpu.memory_space<vmem>>, %arg4: memref<8x8xf32, #tpu.memory_space<vmem>>, %arg5: memref<32x32xbf16, #tpu.memory_space<vmem>>, %arg6: memref<1x32xf32, #tpu.memory_space<vmem>>, %arg7: memref<32x32xbf16, #tpu.memory_space<vmem>>, %arg8: memref<1x32xf32, #tpu.memory_space<vmem>>, %arg9: memref<32x32xbf16, #tpu.memory_space<vmem>>, %arg10: memref<1x32xf32, #tpu.memory_space<vmem>>, %arg11: memref<32x32xbf16, #tpu.memory_space<vmem>>, %arg12: memref<1x32xf32, #tpu.memory_space<vmem>>, %arg13: memref<1x32xf32, #tpu.memory_space<vmem>>, %arg14: memref<1x32xf32, #tpu.memory_space<vmem>>, %arg15: memref<1x8x32xf32, #tpu.memory_space<vmem>>, %arg16: memref<4x8x8xbf16, #tpu.memory_space<vmem>>, %arg17: memref<4x8x8xbf16, #tpu.memory_space<vmem>>, %arg18: memref<8x32xbf16, #tpu.memory_space<vmem>>) attributes {dimension_semantics = [#tpu.dimension_semantics<parallel>, #tpu.dimension_semantics<parallel>], iteration_bounds = array<i64: 2, 1>, scalar_prefetch = 0 : i64, scratch_operands = 3 : i64, tpu.core_type = #tpu.core_type<tc>, window_params = [{pipeline_mode = #tpu.pipeline_mode<synchronous>, transform_indices = @transform_0, window_bounds = array<i64: 1, 8, 32>}, {pipeline_mode = #tpu.pipeline_mode<synchronous>, transform_indices = @transform_1, window_bounds = array<i64: 1, 1, 8>}, {transform_indices = @transform_2, window_bounds = array<i64: 8, 8>}, {pipeline_mode = #tpu.pipeline_mode<synchronous>, transform_indices = @transform_3, window_bounds = array<i64: 32, 32>}, {pipeline_mode = #tpu.pipeline_mode<synchronous>, transform_indices = @transform_4, window_bounds = array<i64: 1, 32>}, {pipeline_mode = #tpu.pipeline_mode<synchronous>, transform_indices = @transform_5, window_bounds = array<i64: 32, 32>}, {pipeline_mode = #tpu.pipeline_mode<synchronous>, transform_indices = @transform_6, window_bounds = array<i64: 1, 32>}, {pipeline_mode = #tpu.pipeline_mode<synchronous>, transform_indices = @transform_7, window_bounds = array<i64: 32, 32>}, {pipeline_mode = #tpu.pipeline_mode<synchronous>, transform_indices = @transform_8, window_bounds = array<i64: 1, 32>}, {pipeline_mode = #tpu.pipeline_mode<synchronous>, transform_indices = @transform_9, window_bounds = array<i64: 32, 32>}, {pipeline_mode = #tpu.pipeline_mode<synchronous>, transform_indices = @transform_10, window_bounds = array<i64: 1, 32>}, {pipeline_mode = #tpu.pipeline_mode<synchronous>, transform_indices = @transform_11, window_bounds = array<i64: 1, 32>}, {pipeline_mode = #tpu.pipeline_mode<synchronous>, transform_indices = @transform_12, window_bounds = array<i64: 1, 32>}, {transform_indices = @transform_13, window_bounds = array<i64: 1, 8, 32>}]} {
    %c0 = arith.constant 0 : index
    %c0_0 = arith.constant 0 : index
    %c0_1 = arith.constant 0 : index
    %0 = vector.load %arg2[%c0, %c0_0, %c0_1] : memref<1x8x32xbf16, #tpu.memory_space<vmem>>, vector<1x8x32xbf16>
    %1 = vector.shape_cast %0 : vector<1x8x32xbf16> to vector<8x32xbf16>
    %c0_2 = arith.constant 0 : index
    %c0_3 = arith.constant 0 : index
    %2 = vector.load %arg7[%c0_2, %c0_3] : memref<32x32xbf16, #tpu.memory_space<vmem>>, vector<32x32xbf16>
    %cst = arith.constant dense<0.000000e+00> : vector<8x32xf32>
    %3 = tpu.matmul %1, %2, %cst {dimension_numbers = #tpu.dot_dimension_numbers<[1], [0], [0], [1], [0, 0, 1, 1], [], []>} : vector<8x32xbf16>, vector<32x32xbf16>, vector<8x32xf32> -> vector<8x32xf32>
    %c0_4 = arith.constant 0 : index
    %c0_5 = arith.constant 0 : index
    %4 = vector.load %arg8[%c0_4, %c0_5] : memref<1x32xf32, #tpu.memory_space<vmem>>, vector<1x32xf32>
    %5 = vector.broadcast %4 : vector<1x32xf32> to vector<8x32xf32>
    %6 = arith.addf %3, %5 : vector<8x32xf32>
    %c0_6 = arith.constant 0 : index
    %c0_7 = arith.constant 0 : index
    %7 = vector.load %arg9[%c0_6, %c0_7] : memref<32x32xbf16, #tpu.memory_space<vmem>>, vector<32x32xbf16>
    %cst_8 = arith.constant dense<0.000000e+00> : vector<8x32xf32>
    %8 = tpu.matmul %1, %7, %cst_8 {dimension_numbers = #tpu.dot_dimension_numbers<[1], [0], [0], [1], [0, 0, 1, 1], [], []>} : vector<8x32xbf16>, vector<32x32xbf16>, vector<8x32xf32> -> vector<8x32xf32>
    %c0_9 = arith.constant 0 : index
    %c0_10 = arith.constant 0 : index
    %9 = vector.load %arg10[%c0_9, %c0_10] : memref<1x32xf32, #tpu.memory_space<vmem>>, vector<1x32xf32>
    %10 = vector.broadcast %9 : vector<1x32xf32> to vector<8x32xf32>
    %11 = arith.addf %8, %10 : vector<8x32xf32>
    %12 = vector.extract_strided_slice %6 {offsets = [0, 0], sizes = [8, 8], strides = [1, 1]} : vector<8x32xf32> to vector<8x8xf32>
    %13 = tpu.transpose %12, [1, 0] : vector<8x8xf32> -> vector<8x8xf32>
    %14 = arith.truncf %13 : vector<8x8xf32> to vector<8x8xbf16>
    %c0_11 = arith.constant 0 : index
    %c0_12 = arith.constant 0 : index
    %c0_13 = arith.constant 0 : index
    %15 = vector.load %arg16[%c0_11, %c0_12, %c0_13] : memref<4x8x8xbf16, #tpu.memory_space<vmem>>, vector<1x8x8xbf16>
    %16 = vector.shape_cast %15 : vector<1x8x8xbf16> to vector<8x8xbf16>
    %17 = vector.shape_cast %14 : vector<8x8xbf16> to vector<1x8x8xbf16>
    tpu.vector_store %arg16[%c0_11, %c0_12, %c0_13], %17 {strides = array<i32>} : memref<4x8x8xbf16, #tpu.memory_space<vmem>>, vector<1x8x8xbf16>,
    %18 = vector.extract_strided_slice %11 {offsets = [0, 0], sizes = [8, 8], strides = [1, 1]} : vector<8x32xf32> to vector<8x8xf32>
    %19 = arith.truncf %18 : vector<8x8xf32> to vector<8x8xbf16>
    %c0_14 = arith.constant 0 : index
    %c0_15 = arith.constant 0 : index
    %c0_16 = arith.constant 0 : index
    %20 = vector.load %arg17[%c0_14, %c0_15, %c0_16] : memref<4x8x8xbf16, #tpu.memory_space<vmem>>, vector<1x8x8xbf16>
    %21 = vector.shape_cast %20 : vector<1x8x8xbf16> to vector<8x8xbf16>
    %22 = vector.shape_cast %19 : vector<8x8xbf16> to vector<1x8x8xbf16>
    tpu.vector_store %arg17[%c0_14, %c0_15, %c0_16], %22 {strides = array<i32>} : memref<4x8x8xbf16, #tpu.memory_space<vmem>>, vector<1x8x8xbf16>,
    %23 = vector.extract_strided_slice %6 {offsets = [0, 8], sizes = [8, 8], strides = [1, 1]} : vector<8x32xf32> to vector<8x8xf32>
    %24 = tpu.transpose %23, [1, 0] : vector<8x8xf32> -> vector<8x8xf32>
    %25 = arith.truncf %24 : vector<8x8xf32> to vector<8x8xbf16>
    %c1 = arith.constant 1 : index
    %c0_17 = arith.constant 0 : index
    %c0_18 = arith.constant 0 : index
    %26 = vector.load %arg16[%c1, %c0_17, %c0_18] : memref<4x8x8xbf16, #tpu.memory_space<vmem>>, vector<1x8x8xbf16>
    %27 = vector.shape_cast %26 : vector<1x8x8xbf16> to vector<8x8xbf16>
    %28 = vector.shape_cast %25 : vector<8x8xbf16> to vector<1x8x8xbf16>
    tpu.vector_store %arg16[%c1, %c0_17, %c0_18], %28 {strides = array<i32>} : memref<4x8x8xbf16, #tpu.memory_space<vmem>>, vector<1x8x8xbf16>,
    %29 = vector.extract_strided_slice %11 {offsets = [0, 8], sizes = [8, 8], strides = [1, 1]} : vector<8x32xf32> to vector<8x8xf32>
    %30 = arith.truncf %29 : vector<8x8xf32> to vector<8x8xbf16>
    %c1_19 = arith.constant 1 : index
    %c0_20 = arith.constant 0 : index
    %c0_21 = arith.constant 0 : index
    %31 = vector.load %arg17[%c1_19, %c0_20, %c0_21] : memref<4x8x8xbf16, #tpu.memory_space<vmem>>, vector<1x8x8xbf16>
    %32 = vector.shape_cast %31 : vector<1x8x8xbf16> to vector<8x8xbf16>
    %33 = vector.shape_cast %30 : vector<8x8xbf16> to vector<1x8x8xbf16>
    tpu.vector_store %arg17[%c1_19, %c0_20, %c0_21], %33 {strides = array<i32>} : memref<4x8x8xbf16, #tpu.memory_space<vmem>>, vector<1x8x8xbf16>,
    %34 = vector.extract_strided_slice %6 {offsets = [0, 16], sizes = [8, 8], strides = [1, 1]} : vector<8x32xf32> to vector<8x8xf32>
    %35 = tpu.transpose %34, [1, 0] : vector<8x8xf32> -> vector<8x8xf32>
    %36 = arith.truncf %35 : vector<8x8xf32> to vector<8x8xbf16>
    %c2 = arith.constant 2 : index
    %c0_22 = arith.constant 0 : index
    %c0_23 = arith.constant 0 : index
    %37 = vector.load %arg16[%c2, %c0_22, %c0_23] : memref<4x8x8xbf16, #tpu.memory_space<vmem>>, vector<1x8x8xbf16>
    %38 = vector.shape_cast %37 : vector<1x8x8xbf16> to vector<8x8xbf16>
    %39 = vector.shape_cast %36 : vector<8x8xbf16> to vector<1x8x8xbf16>
    tpu.vector_store %arg16[%c2, %c0_22, %c0_23], %39 {strides = array<i32>} : memref<4x8x8xbf16, #tpu.memory_space<vmem>>, vector<1x8x8xbf16>,
    %40 = vector.extract_strided_slice %11 {offsets = [0, 16], sizes = [8, 8], strides = [1, 1]} : vector<8x32xf32> to vector<8x8xf32>
    %41 = arith.truncf %40 : vector<8x8xf32> to vector<8x8xbf16>
    %c2_24 = arith.constant 2 : index
    %c0_25 = arith.constant 0 : index
    %c0_26 = arith.constant 0 : index
    %42 = vector.load %arg17[%c2_24, %c0_25, %c0_26] : memref<4x8x8xbf16, #tpu.memory_space<vmem>>, vector<1x8x8xbf16>
    %43 = vector.shape_cast %42 : vector<1x8x8xbf16> to vector<8x8xbf16>
    %44 = vector.shape_cast %41 : vector<8x8xbf16> to vector<1x8x8xbf16>
    tpu.vector_store %arg17[%c2_24, %c0_25, %c0_26], %44 {strides = array<i32>} : memref<4x8x8xbf16, #tpu.memory_space<vmem>>, vector<1x8x8xbf16>,
    %45 = vector.extract_strided_slice %6 {offsets = [0, 24], sizes = [8, 8], strides = [1, 1]} : vector<8x32xf32> to vector<8x8xf32>
    %46 = tpu.transpose %45, [1, 0] : vector<8x8xf32> -> vector<8x8xf32>
    %47 = arith.truncf %46 : vector<8x8xf32> to vector<8x8xbf16>
    %c3 = arith.constant 3 : index
    %c0_27 = arith.constant 0 : index
    %c0_28 = arith.constant 0 : index
    %48 = vector.load %arg16[%c3, %c0_27, %c0_28] : memref<4x8x8xbf16, #tpu.memory_space<vmem>>, vector<1x8x8xbf16>
    %49 = vector.shape_cast %48 : vector<1x8x8xbf16> to vector<8x8xbf16>
    %50 = vector.shape_cast %47 : vector<8x8xbf16> to vector<1x8x8xbf16>
    tpu.vector_store %arg16[%c3, %c0_27, %c0_28], %50 {strides = array<i32>} : memref<4x8x8xbf16, #tpu.memory_space<vmem>>, vector<1x8x8xbf16>,
    %51 = vector.extract_strided_slice %11 {offsets = [0, 24], sizes = [8, 8], strides = [1, 1]} : vector<8x32xf32> to vector<8x8xf32>
    %52 = arith.truncf %51 : vector<8x8xf32> to vector<8x8xbf16>
    %c3_29 = arith.constant 3 : index
    %c0_30 = arith.constant 0 : index
    %c0_31 = arith.constant 0 : index
    %53 = vector.load %arg17[%c3_29, %c0_30, %c0_31] : memref<4x8x8xbf16, #tpu.memory_space<vmem>>, vector<1x8x8xbf16>
    %54 = vector.shape_cast %53 : vector<1x8x8xbf16> to vector<8x8xbf16>
    %55 = vector.shape_cast %52 : vector<8x8xbf16> to vector<1x8x8xbf16>
    tpu.vector_store %arg17[%c3_29, %c0_30, %c0_31], %55 {strides = array<i32>} : memref<4x8x8xbf16, #tpu.memory_space<vmem>>, vector<1x8x8xbf16>,
    %c8_i32 = arith.constant 8 : i32
    %56 = arith.muli %arg1, %c8_i32 : i32
    %57 = tpu.assume_multiple %56, 8 : i32
    %c0_32 = arith.constant 0 : index
    %58 = arith.index_cast %57 : i32 to index
    %c0_33 = arith.constant 0 : index
    %59 = vector.load %arg2[%c0_32, %58, %c0_33] : memref<1x8x32xbf16, #tpu.memory_space<vmem>>, vector<1x8x32xbf16>
    %60 = vector.shape_cast %59 : vector<1x8x32xbf16> to vector<8x32xbf16>
    %c0_34 = arith.constant 0 : index
    %c0_35 = arith.constant 0 : index
    %61 = vector.load %arg5[%c0_34, %c0_35] : memref<32x32xbf16, #tpu.memory_space<vmem>>, vector<32x32xbf16>
    %cst_36 = arith.constant dense<0.000000e+00> : vector<8x32xf32>
    %62 = tpu.matmul %60, %61, %cst_36 {dimension_numbers = #tpu.dot_dimension_numbers<[1], [0], [0], [1], [0, 0, 1, 1], [], []>} : vector<8x32xbf16>, vector<32x32xbf16>, vector<8x32xf32> -> vector<8x32xf32>
    %c0_37 = arith.constant 0 : index
    %c0_38 = arith.constant 0 : index
    %63 = vector.load %arg6[%c0_37, %c0_38] : memref<1x32xf32, #tpu.memory_space<vmem>>, vector<1x32xf32>
    %64 = vector.broadcast %63 : vector<1x32xf32> to vector<8x32xf32>
    %65 = arith.addf %62, %64 : vector<8x32xf32>
    %cst_39 = arith.constant 0.353553385 : f32
    %66 = vector.broadcast %cst_39 : f32 to vector<8x32xf32>
    %67 = arith.mulf %65, %66 : vector<8x32xf32>
    %c0_40 = arith.constant 0 : index
    %c0_41 = arith.constant 0 : index
    %68 = vector.load %arg4[%c0_40, %c0_41] : memref<8x8xf32, #tpu.memory_space<vmem>>, vector<8x8xf32>
    %c0_42 = arith.constant 0 : index
    %c0_43 = arith.constant 0 : index
    %c0_44 = arith.constant 0 : index
    %69 = vector.load %arg3[%c0_42, %c0_43, %c0_44] : memref<1x1x8xf32, #tpu.memory_space<vmem>>, vector<1x1x8xf32>
    %70 = vector.shape_cast %69 : vector<1x1x8xf32> to vector<1x8xf32>
    %71 = vector.broadcast %70 : vector<1x8xf32> to vector<8x8xf32>
    %72 = arith.addf %68, %71 : vector<8x8xf32>
    %73 = vector.extract_strided_slice %67 {offsets = [0, 0], sizes = [8, 8], strides = [1, 1]} : vector<8x32xf32> to vector<8x8xf32>
    %74 = arith.truncf %73 : vector<8x8xf32> to vector<8x8xbf16>
    %c0_45 = arith.constant 0 : index
    %c0_46 = arith.constant 0 : index
    %c0_47 = arith.constant 0 : index
    %75 = vector.load %arg16[%c0_45, %c0_46, %c0_47] : memref<4x8x8xbf16, #tpu.memory_space<vmem>>, vector<1x8x8xbf16>
    %76 = vector.shape_cast %75 : vector<1x8x8xbf16> to vector<8x8xbf16>
    %cst_48 = arith.constant dense<0.000000e+00> : vector<8x8xf32>
    %77 = tpu.matmul %74, %76, %cst_48 {dimension_numbers = #tpu.dot_dimension_numbers<[1], [0], [0], [1], [0, 0, 1, 1], [], []>} : vector<8x8xbf16>, vector<8x8xbf16>, vector<8x8xf32> -> vector<8x8xf32>
    %78 = arith.addf %77, %72 : vector<8x8xf32>
    %cst_49 = arith.constant dense<0xFF800000> : vector<8xf32>
    %79 = vector.multi_reduction <maximumf>, %78, %cst_49 [1] : vector<8x8xf32> to vector<8xf32>
    %80 = vector.shape_cast %79 : vector<8xf32> to vector<8x1xf32>
    %81 = vector.broadcast %80 : vector<8x1xf32> to vector<8x8xf32>
    %82 = arith.subf %78, %81 : vector<8x8xf32>
    %83 = math.exp %82 : vector<8x8xf32>
    %cst_50 = arith.constant dense<0.000000e+00> : vector<8xf32>
    %84 = vector.multi_reduction <add>, %83, %cst_50 [1] : vector<8x8xf32> to vector<8xf32>
    %85 = vector.shape_cast %84 : vector<8xf32> to vector<8x1xf32>
    %86 = tpu.reciprocal %85 {approx = true} : vector<8x1xf32> -> vector<8x1xf32>
    %87 = vector.broadcast %86 : vector<8x1xf32> to vector<8x8xf32>
    %88 = arith.mulf %83, %87 : vector<8x8xf32>
    %89 = arith.truncf %88 : vector<8x8xf32> to vector<8x8xbf16>
    %c0_51 = arith.constant 0 : index
    %c0_52 = arith.constant 0 : index
    %c0_53 = arith.constant 0 : index
    %90 = vector.load %arg17[%c0_51, %c0_52, %c0_53] : memref<4x8x8xbf16, #tpu.memory_space<vmem>>, vector<1x8x8xbf16>
    %91 = vector.shape_cast %90 : vector<1x8x8xbf16> to vector<8x8xbf16>
    %cst_54 = arith.constant dense<0.000000e+00> : vector<8x8xf32>
    %92 = tpu.matmul %89, %91, %cst_54 {dimension_numbers = #tpu.dot_dimension_numbers<[1], [0], [0], [1], [0, 0, 1, 1], [], []>} : vector<8x8xbf16>, vector<8x8xbf16>, vector<8x8xf32> -> vector<8x8xf32>
    %93 = arith.truncf %92 : vector<8x8xf32> to vector<8x8xbf16>
    %c0_55 = arith.constant 0 : index
    %c0_56 = arith.constant 0 : index
    %94 = vector.load %arg18[%c0_55, %c0_56] : memref<8x32xbf16, #tpu.memory_space<vmem>>, vector<8x8xbf16>
    tpu.vector_store %arg18[%c0_55, %c0_56], %93 {strides = array<i32>} : memref<8x32xbf16, #tpu.memory_space<vmem>>, vector<8x8xbf16>,
    %95 = vector.extract_strided_slice %67 {offsets = [0, 8], sizes = [8, 8], strides = [1, 1]} : vector<8x32xf32> to vector<8x8xf32>
    %96 = arith.truncf %95 : vector<8x8xf32> to vector<8x8xbf16>
    %c1_57 = arith.constant 1 : index
    %c0_58 = arith.constant 0 : index
    %c0_59 = arith.constant 0 : index
    %97 = vector.load %arg16[%c1_57, %c0_58, %c0_59] : memref<4x8x8xbf16, #tpu.memory_space<vmem>>, vector<1x8x8xbf16>
    %98 = vector.shape_cast %97 : vector<1x8x8xbf16> to vector<8x8xbf16>
    %cst_60 = arith.constant dense<0.000000e+00> : vector<8x8xf32>
    %99 = tpu.matmul %96, %98, %cst_60 {dimension_numbers = #tpu.dot_dimension_numbers<[1], [0], [0], [1], [0, 0, 1, 1], [], []>} : vector<8x8xbf16>, vector<8x8xbf16>, vector<8x8xf32> -> vector<8x8xf32>
    %100 = arith.addf %99, %72 : vector<8x8xf32>
    %cst_61 = arith.constant dense<0xFF800000> : vector<8xf32>
    %101 = vector.multi_reduction <maximumf>, %100, %cst_61 [1] : vector<8x8xf32> to vector<8xf32>
    %102 = vector.shape_cast %101 : vector<8xf32> to vector<8x1xf32>
    %103 = vector.broadcast %102 : vector<8x1xf32> to vector<8x8xf32>
    %104 = arith.subf %100, %103 : vector<8x8xf32>
    %105 = math.exp %104 : vector<8x8xf32>
    %cst_62 = arith.constant dense<0.000000e+00> : vector<8xf32>
    %106 = vector.multi_reduction <add>, %105, %cst_62 [1] : vector<8x8xf32> to vector<8xf32>
    %107 = vector.shape_cast %106 : vector<8xf32> to vector<8x1xf32>
    %108 = tpu.reciprocal %107 {approx = true} : vector<8x1xf32> -> vector<8x1xf32>
    %109 = vector.broadcast %108 : vector<8x1xf32> to vector<8x8xf32>
    %110 = arith.mulf %105, %109 : vector<8x8xf32>
    %111 = arith.truncf %110 : vector<8x8xf32> to vector<8x8xbf16>
    %c1_63 = arith.constant 1 : index
    %c0_64 = arith.constant 0 : index
    %c0_65 = arith.constant 0 : index
    %112 = vector.load %arg17[%c1_63, %c0_64, %c0_65] : memref<4x8x8xbf16, #tpu.memory_space<vmem>>, vector<1x8x8xbf16>
    %113 = vector.shape_cast %112 : vector<1x8x8xbf16> to vector<8x8xbf16>
    %cst_66 = arith.constant dense<0.000000e+00> : vector<8x8xf32>
    %114 = tpu.matmul %111, %113, %cst_66 {dimension_numbers = #tpu.dot_dimension_numbers<[1], [0], [0], [1], [0, 0, 1, 1], [], []>} : vector<8x8xbf16>, vector<8x8xbf16>, vector<8x8xf32> -> vector<8x8xf32>
    %115 = arith.truncf %114 : vector<8x8xf32> to vector<8x8xbf16>
    %c0_67 = arith.constant 0 : index
    %c8 = arith.constant 8 : index
    %116 = vector.load %arg18[%c0_67, %c8] : memref<8x32xbf16, #tpu.memory_space<vmem>>, vector<8x8xbf16>
    tpu.vector_store %arg18[%c0_67, %c8], %115 {strides = array<i32>} : memref<8x32xbf16, #tpu.memory_space<vmem>>, vector<8x8xbf16>,
    %117 = vector.extract_strided_slice %67 {offsets = [0, 16], sizes = [8, 8], strides = [1, 1]} : vector<8x32xf32> to vector<8x8xf32>
    %118 = arith.truncf %117 : vector<8x8xf32> to vector<8x8xbf16>
    %c2_68 = arith.constant 2 : index
    %c0_69 = arith.constant 0 : index
    %c0_70 = arith.constant 0 : index
    %119 = vector.load %arg16[%c2_68, %c0_69, %c0_70] : memref<4x8x8xbf16, #tpu.memory_space<vmem>>, vector<1x8x8xbf16>
    %120 = vector.shape_cast %119 : vector<1x8x8xbf16> to vector<8x8xbf16>
    %cst_71 = arith.constant dense<0.000000e+00> : vector<8x8xf32>
    %121 = tpu.matmul %118, %120, %cst_71 {dimension_numbers = #tpu.dot_dimension_numbers<[1], [0], [0], [1], [0, 0, 1, 1], [], []>} : vector<8x8xbf16>, vector<8x8xbf16>, vector<8x8xf32> -> vector<8x8xf32>
    %122 = arith.addf %121, %72 : vector<8x8xf32>
    %cst_72 = arith.constant dense<0xFF800000> : vector<8xf32>
    %123 = vector.multi_reduction <maximumf>, %122, %cst_72 [1] : vector<8x8xf32> to vector<8xf32>
    %124 = vector.shape_cast %123 : vector<8xf32> to vector<8x1xf32>
    %125 = vector.broadcast %124 : vector<8x1xf32> to vector<8x8xf32>
    %126 = arith.subf %122, %125 : vector<8x8xf32>
    %127 = math.exp %126 : vector<8x8xf32>
    %cst_73 = arith.constant dense<0.000000e+00> : vector<8xf32>
    %128 = vector.multi_reduction <add>, %127, %cst_73 [1] : vector<8x8xf32> to vector<8xf32>
    %129 = vector.shape_cast %128 : vector<8xf32> to vector<8x1xf32>
    %130 = tpu.reciprocal %129 {approx = true} : vector<8x1xf32> -> vector<8x1xf32>
    %131 = vector.broadcast %130 : vector<8x1xf32> to vector<8x8xf32>
    %132 = arith.mulf %127, %131 : vector<8x8xf32>
    %133 = arith.truncf %132 : vector<8x8xf32> to vector<8x8xbf16>
    %c2_74 = arith.constant 2 : index
    %c0_75 = arith.constant 0 : index
    %c0_76 = arith.constant 0 : index
    %134 = vector.load %arg17[%c2_74, %c0_75, %c0_76] : memref<4x8x8xbf16, #tpu.memory_space<vmem>>, vector<1x8x8xbf16>
    %135 = vector.shape_cast %134 : vector<1x8x8xbf16> to vector<8x8xbf16>
    %cst_77 = arith.constant dense<0.000000e+00> : vector<8x8xf32>
    %136 = tpu.matmul %133, %135, %cst_77 {dimension_numbers = #tpu.dot_dimension_numbers<[1], [0], [0], [1], [0, 0, 1, 1], [], []>} : vector<8x8xbf16>, vector<8x8xbf16>, vector<8x8xf32> -> vector<8x8xf32>
    %137 = arith.truncf %136 : vector<8x8xf32> to vector<8x8xbf16>
    %c0_78 = arith.constant 0 : index
    %c16 = arith.constant 16 : index
    %138 = vector.load %arg18[%c0_78, %c16] : memref<8x32xbf16, #tpu.memory_space<vmem>>, vector<8x8xbf16>
    tpu.vector_store %arg18[%c0_78, %c16], %137 {strides = array<i32>} : memref<8x32xbf16, #tpu.memory_space<vmem>>, vector<8x8xbf16>,
    %139 = vector.extract_strided_slice %67 {offsets = [0, 24], sizes = [8, 8], strides = [1, 1]} : vector<8x32xf32> to vector<8x8xf32>
    %140 = arith.truncf %139 : vector<8x8xf32> to vector<8x8xbf16>
    %c3_79 = arith.constant 3 : index
    %c0_80 = arith.constant 0 : index
    %c0_81 = arith.constant 0 : index
    %141 = vector.load %arg16[%c3_79, %c0_80, %c0_81] : memref<4x8x8xbf16, #tpu.memory_space<vmem>>, vector<1x8x8xbf16>
    %142 = vector.shape_cast %141 : vector<1x8x8xbf16> to vector<8x8xbf16>
    %cst_82 = arith.constant dense<0.000000e+00> : vector<8x8xf32>
    %143 = tpu.matmul %140, %142, %cst_82 {dimension_numbers = #tpu.dot_dimension_numbers<[1], [0], [0], [1], [0, 0, 1, 1], [], []>} : vector<8x8xbf16>, vector<8x8xbf16>, vector<8x8xf32> -> vector<8x8xf32>
    %144 = arith.addf %143, %72 : vector<8x8xf32>
    %cst_83 = arith.constant dense<0xFF800000> : vector<8xf32>
    %145 = vector.multi_reduction <maximumf>, %144, %cst_83 [1] : vector<8x8xf32> to vector<8xf32>
    %146 = vector.shape_cast %145 : vector<8xf32> to vector<8x1xf32>
    %147 = vector.broadcast %146 : vector<8x1xf32> to vector<8x8xf32>
    %148 = arith.subf %144, %147 : vector<8x8xf32>
    %149 = math.exp %148 : vector<8x8xf32>
    %cst_84 = arith.constant dense<0.000000e+00> : vector<8xf32>
    %150 = vector.multi_reduction <add>, %149, %cst_84 [1] : vector<8x8xf32> to vector<8xf32>
    %151 = vector.shape_cast %150 : vector<8xf32> to vector<8x1xf32>
    %152 = tpu.reciprocal %151 {approx = true} : vector<8x1xf32> -> vector<8x1xf32>
    %153 = vector.broadcast %152 : vector<8x1xf32> to vector<8x8xf32>
    %154 = arith.mulf %149, %153 : vector<8x8xf32>
    %155 = arith.truncf %154 : vector<8x8xf32> to vector<8x8xbf16>
    %c3_85 = arith.constant 3 : index
    %c0_86 = arith.constant 0 : index
    %c0_87 = arith.constant 0 : index
    %156 = vector.load %arg17[%c3_85, %c0_86, %c0_87] : memref<4x8x8xbf16, #tpu.memory_space<vmem>>, vector<1x8x8xbf16>
    %157 = vector.shape_cast %156 : vector<1x8x8xbf16> to vector<8x8xbf16>
    %cst_88 = arith.constant dense<0.000000e+00> : vector<8x8xf32>
    %158 = tpu.matmul %155, %157, %cst_88 {dimension_numbers = #tpu.dot_dimension_numbers<[1], [0], [0], [1], [0, 0, 1, 1], [], []>} : vector<8x8xbf16>, vector<8x8xbf16>, vector<8x8xf32> -> vector<8x8xf32>
    %159 = arith.truncf %158 : vector<8x8xf32> to vector<8x8xbf16>
    %c0_89 = arith.constant 0 : index
    %c24 = arith.constant 24 : index
    %160 = vector.load %arg18[%c0_89, %c24] : memref<8x32xbf16, #tpu.memory_space<vmem>>, vector<8x8xbf16>
    tpu.vector_store %arg18[%c0_89, %c24], %159 {strides = array<i32>} : memref<8x32xbf16, #tpu.memory_space<vmem>>, vector<8x8xbf16>,
    %c0_90 = arith.constant 0 : index
    %c0_91 = arith.constant 0 : index
    %161 = vector.load %arg18[%c0_90, %c0_91] : memref<8x32xbf16, #tpu.memory_space<vmem>>, vector<8x32xbf16>
    %c0_92 = arith.constant 0 : index
    %c0_93 = arith.constant 0 : index
    %162 = vector.load %arg11[%c0_92, %c0_93] : memref<32x32xbf16, #tpu.memory_space<vmem>>, vector<32x32xbf16>
    %cst_94 = arith.constant dense<0.000000e+00> : vector<8x32xf32>
    %163 = tpu.matmul %161, %162, %cst_94 {dimension_numbers = #tpu.dot_dimension_numbers<[1], [0], [0], [1], [0, 0, 1, 1], [], []>} : vector<8x32xbf16>, vector<32x32xbf16>, vector<8x32xf32> -> vector<8x32xf32>
    %c0_95 = arith.constant 0 : index
    %c0_96 = arith.constant 0 : index
    %164 = vector.load %arg12[%c0_95, %c0_96] : memref<1x32xf32, #tpu.memory_space<vmem>>, vector<1x32xf32>
    %165 = vector.broadcast %164 : vector<1x32xf32> to vector<8x32xf32>
    %166 = arith.addf %163, %165 : vector<8x32xf32>
    %167 = arith.extf %60 : vector<8x32xbf16> to vector<8x32xf32>
    %168 = arith.addf %166, %167 : vector<8x32xf32>
    %cst_97 = arith.constant dense<0.000000e+00> : vector<8xf32>
    %169 = vector.multi_reduction <add>, %168, %cst_97 [1] : vector<8x32xf32> to vector<8xf32>
    %170 = vector.shape_cast %169 : vector<8xf32> to vector<8x1xf32>
    %cst_98 = arith.constant 3.200000e+01 : f32
    %171 = vector.broadcast %cst_98 : f32 to vector<8x1xf32>
    %172 = arith.divf %170, %171 : vector<8x1xf32>
    %173 = vector.broadcast %172 : vector<8x1xf32> to vector<8x32xf32>
    %174 = arith.subf %168, %173 : vector<8x32xf32>
    %175 = arith.mulf %174, %174 : vector<8x32xf32>
    %cst_99 = arith.constant dense<0.000000e+00> : vector<8xf32>
    %176 = vector.multi_reduction <add>, %175, %cst_99 [1] : vector<8x32xf32> to vector<8xf32>
    %177 = vector.shape_cast %176 : vector<8xf32> to vector<8x1xf32>
    %cst_100 = arith.constant 3.200000e+01 : f32
    %178 = vector.broadcast %cst_100 : f32 to vector<8x1xf32>
    %179 = arith.divf %177, %178 : vector<8x1xf32>
    %cst_101 = arith.constant 9.99999996E-13 : f32
    %180 = vector.broadcast %cst_101 : f32 to vector<8x1xf32>
    %181 = arith.addf %179, %180 : vector<8x1xf32>
    %182 = math.rsqrt %181 : vector<8x1xf32>
    %183 = vector.broadcast %182 : vector<8x1xf32> to vector<8x32xf32>
    %184 = arith.mulf %174, %183 : vector<8x32xf32>
    %c0_102 = arith.constant 0 : index
    %c0_103 = arith.constant 0 : index
    %185 = vector.load %arg13[%c0_102, %c0_103] : memref<1x32xf32, #tpu.memory_space<vmem>>, vector<1x32xf32>
    %186 = vector.broadcast %185 : vector<1x32xf32> to vector<8x32xf32>
    %187 = arith.mulf %184, %186 : vector<8x32xf32>
    %c0_104 = arith.constant 0 : index
    %c0_105 = arith.constant 0 : index
    %188 = vector.load %arg14[%c0_104, %c0_105] : memref<1x32xf32, #tpu.memory_space<vmem>>, vector<1x32xf32>
    %189 = vector.broadcast %188 : vector<1x32xf32> to vector<8x32xf32>
    %190 = arith.addf %187, %189 : vector<8x32xf32>
    %c0_106 = arith.constant 0 : index
    %c0_107 = arith.constant 0 : index
    %c0_108 = arith.constant 0 : index
    %191 = vector.load %arg15[%c0_106, %c0_107, %c0_108] : memref<1x8x32xf32, #tpu.memory_space<vmem>>, vector<1x8x32xf32>
    %192 = vector.shape_cast %191 : vector<1x8x32xf32> to vector<8x32xf32>
    %193 = vector.shape_cast %190 : vector<8x32xf32> to vector<1x8x32xf32>
    tpu.vector_store %arg15[%c0_106, %c0_107, %c0_108], %193 {strides = array<i32>} : memref<1x8x32xf32, #tpu.memory_space<vmem>>, vector<1x8x32xf32>,
    return
  }
  func.func @transform_0(%arg0: i32, %arg1: i32) -> (i32, i32, i32) {
    %c0_i32 = arith.constant 0 : i32
    %c0_i32_0 = arith.constant 0 : i32
    %c0_i32_1 = arith.constant 0 : i32
    return %arg0, %c0_i32, %c0_i32_0 : i32, i32, i32
  }
  func.func @transform_1(%arg0: i32, %arg1: i32) -> (i32, i32, i32) {
    %c0_i32 = arith.constant 0 : i32
    %c0_i32_0 = arith.constant 0 : i32
    %c0_i32_1 = arith.constant 0 : i32
    return %arg0, %c0_i32, %c0_i32_0 : i32, i32, i32
  }
  func.func @transform_2(%arg0: i32, %arg1: i32) -> (i32, i32) {
    %c0_i32 = arith.constant 0 : i32
    %c0_i32_0 = arith.constant 0 : i32
    return %arg1, %c0_i32 : i32, i32
  }
  func.func @transform_3(%arg0: i32, %arg1: i32) -> (i32, i32) {
    %c0_i32 = arith.constant 0 : i32
    %c0_i32_0 = arith.constant 0 : i32
    %c0_i32_1 = arith.constant 0 : i32
    return %c0_i32, %c0_i32_0 : i32, i32
  }
  func.func @transform_4(%arg0: i32, %arg1: i32) -> (i32, i32) {
    %c0_i32 = arith.constant 0 : i32
    %c0_i32_0 = arith.constant 0 : i32
    %c0_i32_1 = arith.constant 0 : i32
    return %c0_i32, %c0_i32_0 : i32, i32
  }
  func.func @transform_5(%arg0: i32, %arg1: i32) -> (i32, i32) {
    %c0_i32 = arith.constant 0 : i32
    %c0_i32_0 = arith.constant 0 : i32
    %c0_i32_1 = arith.constant 0 : i32
    return %c0_i32, %c0_i32_0 : i32, i32
  }
  func.func @transform_6(%arg0: i32, %arg1: i32) -> (i32, i32) {
    %c0_i32 = arith.constant 0 : i32
    %c0_i32_0 = arith.constant 0 : i32
    %c0_i32_1 = arith.constant 0 : i32
    return %c0_i32, %c0_i32_0 : i32, i32
  }
  func.func @transform_7(%arg0: i32, %arg1: i32) -> (i32, i32) {
    %c0_i32 = arith.constant 0 : i32
    %c0_i32_0 = arith.constant 0 : i32
    %c0_i32_1 = arith.constant 0 : i32
    return %c0_i32, %c0_i32_0 : i32, i32
  }
  func.func @transform_8(%arg0: i32, %arg1: i32) -> (i32, i32) {
    %c0_i32 = arith.constant 0 : i32
    %c0_i32_0 = arith.constant 0 : i32
    %c0_i32_1 = arith.constant 0 : i32
    return %c0_i32, %c0_i32_0 : i32, i32
  }
  func.func @transform_9(%arg0: i32, %arg1: i32) -> (i32, i32) {
    %c0_i32 = arith.constant 0 : i32
    %c0_i32_0 = arith.constant 0 : i32
    %c0_i32_1 = arith.constant 0 : i32
    return %c0_i32, %c0_i32_0 : i32, i32
  }
  func.func @transform_10(%arg0: i32, %arg1: i32) -> (i32, i32) {
    %c0_i32 = arith.constant 0 : i32
    %c0_i32_0 = arith.constant 0 : i32
    %c0_i32_1 = arith.constant 0 : i32
    return %c0_i32, %c0_i32_0 : i32, i32
  }
  func.func @transform_11(%arg0: i32, %arg1: i32) -> (i32, i32) {
    %c0_i32 = arith.constant 0 : i32
    %c0_i32_0 = arith.constant 0 : i32
    %c0_i32_1 = arith.constant 0 : i32
    return %c0_i32, %c0_i32_0 : i32, i32
  }
  func.func @transform_12(%arg0: i32, %arg1: i32) -> (i32, i32) {
    %c0_i32 = arith.constant 0 : i32
    %c0_i32_0 = arith.constant 0 : i32
    %c0_i32_1 = arith.constant 0 : i32
    return %c0_i32, %c0_i32_0 : i32, i32
  }
  func.func @transform_13(%arg0: i32, %arg1: i32) -> (i32, i32, i32) {
    %c0_i32 = arith.constant 0 : i32
    %c0_i32_0 = arith.constant 0 : i32
    return %arg0, %arg1, %c0_i32 : i32, i32, i32
  }
}

module attributes {stable_mosaic.version = 11 : i64} {
  func.func @_attn_kernel(%arg0: i32, %arg1: i32, %arg2: memref<1x8x32xbf16, #tpu.memory_space<vmem>>, %arg3: memref<1x1x8xf32, #tpu.memory_space<vmem>>, %arg4: memref<8x8xf32, #tpu.memory_space<vmem>>, %arg5: memref<32x32xbf16, #tpu.memory_space<vmem>>, %arg6: memref<1x32xf32, #tpu.memory_space<vmem>>, %arg7: memref<32x32xbf16, #tpu.memory_space<vmem>>, %arg8: memref<1x32xf32, #tpu.memory_space<vmem>>, %arg9: memref<32x32xbf16, #tpu.memory_space<vmem>>, %arg10: memref<1x32xf32, #tpu.memory_space<vmem>>, %arg11: memref<32x32xbf16, #tpu.memory_space<vmem>>, %arg12: memref<1x32xf32, #tpu.memory_space<vmem>>, %arg13: memref<1x32xf32, #tpu.memory_space<vmem>>, %arg14: memref<1x32xf32, #tpu.memory_space<vmem>>, %arg15: memref<1x8x32xf32, #tpu.memory_space<vmem>>, %arg16: memref<4x8x8xbf16, #tpu.memory_space<vmem>>, %arg17: memref<4x8x8xbf16, #tpu.memory_space<vmem>>, %arg18: memref<8x32xbf16, #tpu.memory_space<vmem>>) attributes {dimension_semantics = [#tpu.dimension_semantics<parallel>, #tpu.dimension_semantics<parallel>], iteration_bounds = array<i64: 2, 1>, scalar_prefetch = 0 : i64, scratch_operands = 3 : i64, tpu.core_type = #tpu.core_type<tc>, window_params = [{transform_indices = @transform_0, window_bounds = array<i64: 1, 8, 32>}, {transform_indices = @transform_1, window_bounds = array<i64: 1, 1, 8>}, {transform_indices = @transform_2, window_bounds = array<i64: 8, 8>}, {pipeline_mode = #tpu.pipeline_mode<synchronous>, transform_indices = @transform_3, window_bounds = array<i64: 32, 32>}, {pipeline_mode = #tpu.pipeline_mode<synchronous>, transform_indices = @transform_4, window_bounds = array<i64: 1, 32>}, {pipeline_mode = #tpu.pipeline_mode<synchronous>, transform_indices = @transform_5, window_bounds = array<i64: 32, 32>}, {pipeline_mode = #tpu.pipeline_mode<synchronous>, transform_indices = @transform_6, window_bounds = array<i64: 1, 32>}, {pipeline_mode = #tpu.pipeline_mode<synchronous>, transform_indices = @transform_7, window_bounds = array<i64: 32, 32>}, {pipeline_mode = #tpu.pipeline_mode<synchronous>, transform_indices = @transform_8, window_bounds = array<i64: 1, 32>}, {pipeline_mode = #tpu.pipeline_mode<synchronous>, transform_indices = @transform_9, window_bounds = array<i64: 32, 32>}, {pipeline_mode = #tpu.pipeline_mode<synchronous>, transform_indices = @transform_10, window_bounds = array<i64: 1, 32>}, {pipeline_mode = #tpu.pipeline_mode<synchronous>, transform_indices = @transform_11, window_bounds = array<i64: 1, 32>}, {pipeline_mode = #tpu.pipeline_mode<synchronous>, transform_indices = @transform_12, window_bounds = array<i64: 1, 32>}, {transform_indices = @transform_13, window_bounds = array<i64: 1, 8, 32>}]} {
    %c0 = arith.constant 0 : index
    %c0_0 = arith.constant 0 : index
    %c0_1 = arith.constant 0 : index
    %0 = vector.load %arg2[%c0, %c0_0, %c0_1] : memref<1x8x32xbf16, #tpu.memory_space<vmem>>, vector<1x8x32xbf16>
    %1 = vector.shape_cast %0 : vector<1x8x32xbf16> to vector<8x32xbf16>
    %c0_2 = arith.constant 0 : index
    %c0_3 = arith.constant 0 : index
    %2 = vector.load %arg7[%c0_2, %c0_3] : memref<32x32xbf16, #tpu.memory_space<vmem>>, vector<32x32xbf16>
    %cst = arith.constant dense<0.000000e+00> : vector<8x32xf32>
    %3 = tpu.matmul %1, %2, %cst {dimension_numbers = #tpu.dot_dimension_numbers<[1], [0], [0], [1], [0, 0, 1, 1], [], []>} : vector<8x32xbf16>, vector<32x32xbf16>, vector<8x32xf32> -> vector<8x32xf32>
    %c0_4 = arith.constant 0 : index
    %c0_5 = arith.constant 0 : index
    %4 = vector.load %arg8[%c0_4, %c0_5] : memref<1x32xf32, #tpu.memory_space<vmem>>, vector<1x32xf32>
    %5 = vector.broadcast %4 : vector<1x32xf32> to vector<8x32xf32>
    %6 = arith.addf %3, %5 : vector<8x32xf32>
    %c0_6 = arith.constant 0 : index
    %c0_7 = arith.constant 0 : index
    %7 = vector.load %arg9[%c0_6, %c0_7] : memref<32x32xbf16, #tpu.memory_space<vmem>>, vector<32x32xbf16>
    %cst_8 = arith.constant dense<0.000000e+00> : vector<8x32xf32>
    %8 = tpu.matmul %1, %7, %cst_8 {dimension_numbers = #tpu.dot_dimension_numbers<[1], [0], [0], [1], [0, 0, 1, 1], [], []>} : vector<8x32xbf16>, vector<32x32xbf16>, vector<8x32xf32> -> vector<8x32xf32>
    %c0_9 = arith.constant 0 : index
    %c0_10 = arith.constant 0 : index
    %9 = vector.load %arg10[%c0_9, %c0_10] : memref<1x32xf32, #tpu.memory_space<vmem>>, vector<1x32xf32>
    %10 = vector.broadcast %9 : vector<1x32xf32> to vector<8x32xf32>
    %11 = arith.addf %8, %10 : vector<8x32xf32>
    %12 = vector.extract_strided_slice %6 {offsets = [0, 0], sizes = [8, 8], strides = [1, 1]} : vector<8x32xf32> to vector<8x8xf32>
    %13 = tpu.transpose %12, [1, 0] : vector<8x8xf32> -> vector<8x8xf32>
    %14 = arith.truncf %13 : vector<8x8xf32> to vector<8x8xbf16>
    %c0_11 = arith.constant 0 : index
    %c0_12 = arith.constant 0 : index
    %c0_13 = arith.constant 0 : index
    %15 = vector.load %arg16[%c0_11, %c0_12, %c0_13] : memref<4x8x8xbf16, #tpu.memory_space<vmem>>, vector<1x8x8xbf16>
    %16 = vector.shape_cast %15 : vector<1x8x8xbf16> to vector<8x8xbf16>
    %17 = vector.shape_cast %14 : vector<8x8xbf16> to vector<1x8x8xbf16>
    tpu.vector_store %arg16[%c0_11, %c0_12, %c0_13], %17 {strides = array<i32>} : memref<4x8x8xbf16, #tpu.memory_space<vmem>>, vector<1x8x8xbf16>,
    %18 = vector.extract_strided_slice %11 {offsets = [0, 0], sizes = [8, 8], strides = [1, 1]} : vector<8x32xf32> to vector<8x8xf32>
    %19 = arith.truncf %18 : vector<8x8xf32> to vector<8x8xbf16>
    %c0_14 = arith.constant 0 : index
    %c0_15 = arith.constant 0 : index
    %c0_16 = arith.constant 0 : index
    %20 = vector.load %arg17[%c0_14, %c0_15, %c0_16] : memref<4x8x8xbf16, #tpu.memory_space<vmem>>, vector<1x8x8xbf16>
    %21 = vector.shape_cast %20 : vector<1x8x8xbf16> to vector<8x8xbf16>
    %22 = vector.shape_cast %19 : vector<8x8xbf16> to vector<1x8x8xbf16>
    tpu.vector_store %arg17[%c0_14, %c0_15, %c0_16], %22 {strides = array<i32>} : memref<4x8x8xbf16, #tpu.memory_space<vmem>>, vector<1x8x8xbf16>,
    %23 = vector.extract_strided_slice %6 {offsets = [0, 8], sizes = [8, 8], strides = [1, 1]} : vector<8x32xf32> to vector<8x8xf32>
    %24 = tpu.transpose %23, [1, 0] : vector<8x8xf32> -> vector<8x8xf32>
    %25 = arith.truncf %24 : vector<8x8xf32> to vector<8x8xbf16>
    %c1 = arith.constant 1 : index
    %c0_17 = arith.constant 0 : index
    %c0_18 = arith.constant 0 : index
    %26 = vector.load %arg16[%c1, %c0_17, %c0_18] : memref<4x8x8xbf16, #tpu.memory_space<vmem>>, vector<1x8x8xbf16>
    %27 = vector.shape_cast %26 : vector<1x8x8xbf16> to vector<8x8xbf16>
    %28 = vector.shape_cast %25 : vector<8x8xbf16> to vector<1x8x8xbf16>
    tpu.vector_store %arg16[%c1, %c0_17, %c0_18], %28 {strides = array<i32>} : memref<4x8x8xbf16, #tpu.memory_space<vmem>>, vector<1x8x8xbf16>,
    %29 = vector.extract_strided_slice %11 {offsets = [0, 8], sizes = [8, 8], strides = [1, 1]} : vector<8x32xf32> to vector<8x8xf32>
    %30 = arith.truncf %29 : vector<8x8xf32> to vector<8x8xbf16>
    %c1_19 = arith.constant 1 : index
    %c0_20 = arith.constant 0 : index
    %c0_21 = arith.constant 0 : index
    %31 = vector.load %arg17[%c1_19, %c0_20, %c0_21] : memref<4x8x8xbf16, #tpu.memory_space<vmem>>, vector<1x8x8xbf16>
    %32 = vector.shape_cast %31 : vector<1x8x8xbf16> to vector<8x8xbf16>
    %33 = vector.shape_cast %30 : vector<8x8xbf16> to vector<1x8x8xbf16>
    tpu.vector_store %arg17[%c1_19, %c0_20, %c0_21], %33 {strides = array<i32>} : memref<4x8x8xbf16, #tpu.memory_space<vmem>>, vector<1x8x8xbf16>,
    %34 = vector.extract_strided_slice %6 {offsets = [0, 16], sizes = [8, 8], strides = [1, 1]} : vector<8x32xf32> to vector<8x8xf32>
    %35 = tpu.transpose %34, [1, 0] : vector<8x8xf32> -> vector<8x8xf32>
    %36 = arith.truncf %35 : vector<8x8xf32> to vector<8x8xbf16>
    %c2 = arith.constant 2 : index
    %c0_22 = arith.constant 0 : index
    %c0_23 = arith.constant 0 : index
    %37 = vector.load %arg16[%c2, %c0_22, %c0_23] : memref<4x8x8xbf16, #tpu.memory_space<vmem>>, vector<1x8x8xbf16>
    %38 = vector.shape_cast %37 : vector<1x8x8xbf16> to vector<8x8xbf16>
    %39 = vector.shape_cast %36 : vector<8x8xbf16> to vector<1x8x8xbf16>
    tpu.vector_store %arg16[%c2, %c0_22, %c0_23], %39 {strides = array<i32>} : memref<4x8x8xbf16, #tpu.memory_space<vmem>>, vector<1x8x8xbf16>,
    %40 = vector.extract_strided_slice %11 {offsets = [0, 16], sizes = [8, 8], strides = [1, 1]} : vector<8x32xf32> to vector<8x8xf32>
    %41 = arith.truncf %40 : vector<8x8xf32> to vector<8x8xbf16>
    %c2_24 = arith.constant 2 : index
    %c0_25 = arith.constant 0 : index
    %c0_26 = arith.constant 0 : index
    %42 = vector.load %arg17[%c2_24, %c0_25, %c0_26] : memref<4x8x8xbf16, #tpu.memory_space<vmem>>, vector<1x8x8xbf16>
    %43 = vector.shape_cast %42 : vector<1x8x8xbf16> to vector<8x8xbf16>
    %44 = vector.shape_cast %41 : vector<8x8xbf16> to vector<1x8x8xbf16>
    tpu.vector_store %arg17[%c2_24, %c0_25, %c0_26], %44 {strides = array<i32>} : memref<4x8x8xbf16, #tpu.memory_space<vmem>>, vector<1x8x8xbf16>,
    %45 = vector.extract_strided_slice %6 {offsets = [0, 24], sizes = [8, 8], strides = [1, 1]} : vector<8x32xf32> to vector<8x8xf32>
    %46 = tpu.transpose %45, [1, 0] : vector<8x8xf32> -> vector<8x8xf32>
    %47 = arith.truncf %46 : vector<8x8xf32> to vector<8x8xbf16>
    %c3 = arith.constant 3 : index
    %c0_27 = arith.constant 0 : index
    %c0_28 = arith.constant 0 : index
    %48 = vector.load %arg16[%c3, %c0_27, %c0_28] : memref<4x8x8xbf16, #tpu.memory_space<vmem>>, vector<1x8x8xbf16>
    %49 = vector.shape_cast %48 : vector<1x8x8xbf16> to vector<8x8xbf16>
    %50 = vector.shape_cast %47 : vector<8x8xbf16> to vector<1x8x8xbf16>
    tpu.vector_store %arg16[%c3, %c0_27, %c0_28], %50 {strides = array<i32>} : memref<4x8x8xbf16, #tpu.memory_space<vmem>>, vector<1x8x8xbf16>,
    %51 = vector.extract_strided_slice %11 {offsets = [0, 24], sizes = [8, 8], strides = [1, 1]} : vector<8x32xf32> to vector<8x8xf32>
    %52 = arith.truncf %51 : vector<8x8xf32> to vector<8x8xbf16>
    %c3_29 = arith.constant 3 : index
    %c0_30 = arith.constant 0 : index
    %c0_31 = arith.constant 0 : index
    %53 = vector.load %arg17[%c3_29, %c0_30, %c0_31] : memref<4x8x8xbf16, #tpu.memory_space<vmem>>, vector<1x8x8xbf16>
    %54 = vector.shape_cast %53 : vector<1x8x8xbf16> to vector<8x8xbf16>
    %55 = vector.shape_cast %52 : vector<8x8xbf16> to vector<1x8x8xbf16>
    tpu.vector_store %arg17[%c3_29, %c0_30, %c0_31], %55 {strides = array<i32>} : memref<4x8x8xbf16, #tpu.memory_space<vmem>>, vector<1x8x8xbf16>,
    %c8_i32 = arith.constant 8 : i32
    %56 = arith.muli %arg1, %c8_i32 : i32
    %57 = tpu.assume_multiple %56, 8 : i32
    %c0_32 = arith.constant 0 : index
    %58 = arith.index_cast %57 : i32 to index
    %c0_33 = arith.constant 0 : index
    %59 = vector.load %arg2[%c0_32, %58, %c0_33] : memref<1x8x32xbf16, #tpu.memory_space<vmem>>, vector<1x8x32xbf16>
    %60 = vector.shape_cast %59 : vector<1x8x32xbf16> to vector<8x32xbf16>
    %c0_34 = arith.constant 0 : index
    %c0_35 = arith.constant 0 : index
    %61 = vector.load %arg5[%c0_34, %c0_35] : memref<32x32xbf16, #tpu.memory_space<vmem>>, vector<32x32xbf16>
    %cst_36 = arith.constant dense<0.000000e+00> : vector<8x32xf32>
    %62 = tpu.matmul %60, %61, %cst_36 {dimension_numbers = #tpu.dot_dimension_numbers<[1], [0], [0], [1], [0, 0, 1, 1], [], []>} : vector<8x32xbf16>, vector<32x32xbf16>, vector<8x32xf32> -> vector<8x32xf32>
    %c0_37 = arith.constant 0 : index
    %c0_38 = arith.constant 0 : index
    %63 = vector.load %arg6[%c0_37, %c0_38] : memref<1x32xf32, #tpu.memory_space<vmem>>, vector<1x32xf32>
    %64 = vector.broadcast %63 : vector<1x32xf32> to vector<8x32xf32>
    %65 = arith.addf %62, %64 : vector<8x32xf32>
    %cst_39 = arith.constant 0.353553385 : f32
    %66 = vector.broadcast %cst_39 : f32 to vector<8x32xf32>
    %67 = arith.mulf %65, %66 : vector<8x32xf32>
    %c0_40 = arith.constant 0 : index
    %c0_41 = arith.constant 0 : index
    %68 = vector.load %arg4[%c0_40, %c0_41] : memref<8x8xf32, #tpu.memory_space<vmem>>, vector<8x8xf32>
    %c0_42 = arith.constant 0 : index
    %c0_43 = arith.constant 0 : index
    %c0_44 = arith.constant 0 : index
    %69 = vector.load %arg3[%c0_42, %c0_43, %c0_44] : memref<1x1x8xf32, #tpu.memory_space<vmem>>, vector<1x1x8xf32>
    %70 = vector.shape_cast %69 : vector<1x1x8xf32> to vector<1x8xf32>
    %71 = vector.broadcast %70 : vector<1x8xf32> to vector<8x8xf32>
    %72 = arith.addf %68, %71 : vector<8x8xf32>
    %73 = vector.extract_strided_slice %67 {offsets = [0, 0], sizes = [8, 8], strides = [1, 1]} : vector<8x32xf32> to vector<8x8xf32>
    %74 = arith.truncf %73 : vector<8x8xf32> to vector<8x8xbf16>
    %c0_45 = arith.constant 0 : index
    %c0_46 = arith.constant 0 : index
    %c0_47 = arith.constant 0 : index
    %75 = vector.load %arg16[%c0_45, %c0_46, %c0_47] : memref<4x8x8xbf16, #tpu.memory_space<vmem>>, vector<1x8x8xbf16>
    %76 = vector.shape_cast %75 : vector<1x8x8xbf16> to vector<8x8xbf16>
    %cst_48 = arith.constant dense<0.000000e+00> : vector<8x8xf32>
    %77 = tpu.matmul %74, %76, %cst_48 {dimension_numbers = #tpu.dot_dimension_numbers<[1], [0], [0], [1], [0, 0, 1, 1], [], []>} : vector<8x8xbf16>, vector<8x8xbf16>, vector<8x8xf32> -> vector<8x8xf32>
    %78 = arith.addf %77, %72 : vector<8x8xf32>
    %cst_49 = arith.constant dense<0xFF800000> : vector<8xf32>
    %79 = vector.multi_reduction <maximumf>, %78, %cst_49 [1] : vector<8x8xf32> to vector<8xf32>
    %80 = vector.shape_cast %79 : vector<8xf32> to vector<8x1xf32>
    %81 = vector.broadcast %80 : vector<8x1xf32> to vector<8x8xf32>
    %82 = arith.subf %78, %81 : vector<8x8xf32>
    %83 = math.exp %82 : vector<8x8xf32>
    %cst_50 = arith.constant dense<0.000000e+00> : vector<8xf32>
    %84 = vector.multi_reduction <add>, %83, %cst_50 [1] : vector<8x8xf32> to vector<8xf32>
    %85 = vector.shape_cast %84 : vector<8xf32> to vector<8x1xf32>
    %86 = tpu.reciprocal %85 {approx = true} : vector<8x1xf32> -> vector<8x1xf32>
    %87 = vector.broadcast %86 : vector<8x1xf32> to vector<8x8xf32>
    %88 = arith.mulf %83, %87 : vector<8x8xf32>
    %89 = arith.truncf %88 : vector<8x8xf32> to vector<8x8xbf16>
    %c0_51 = arith.constant 0 : index
    %c0_52 = arith.constant 0 : index
    %c0_53 = arith.constant 0 : index
    %90 = vector.load %arg17[%c0_51, %c0_52, %c0_53] : memref<4x8x8xbf16, #tpu.memory_space<vmem>>, vector<1x8x8xbf16>
    %91 = vector.shape_cast %90 : vector<1x8x8xbf16> to vector<8x8xbf16>
    %cst_54 = arith.constant dense<0.000000e+00> : vector<8x8xf32>
    %92 = tpu.matmul %89, %91, %cst_54 {dimension_numbers = #tpu.dot_dimension_numbers<[1], [0], [0], [1], [0, 0, 1, 1], [], []>} : vector<8x8xbf16>, vector<8x8xbf16>, vector<8x8xf32> -> vector<8x8xf32>
    %93 = arith.truncf %92 : vector<8x8xf32> to vector<8x8xbf16>
    %c0_55 = arith.constant 0 : index
    %c0_56 = arith.constant 0 : index
    %94 = vector.load %arg18[%c0_55, %c0_56] : memref<8x32xbf16, #tpu.memory_space<vmem>>, vector<8x8xbf16>
    tpu.vector_store %arg18[%c0_55, %c0_56], %93 {strides = array<i32>} : memref<8x32xbf16, #tpu.memory_space<vmem>>, vector<8x8xbf16>,
    %95 = vector.extract_strided_slice %67 {offsets = [0, 8], sizes = [8, 8], strides = [1, 1]} : vector<8x32xf32> to vector<8x8xf32>
    %96 = arith.truncf %95 : vector<8x8xf32> to vector<8x8xbf16>
    %c1_57 = arith.constant 1 : index
    %c0_58 = arith.constant 0 : index
    %c0_59 = arith.constant 0 : index
    %97 = vector.load %arg16[%c1_57, %c0_58, %c0_59] : memref<4x8x8xbf16, #tpu.memory_space<vmem>>, vector<1x8x8xbf16>
    %98 = vector.shape_cast %97 : vector<1x8x8xbf16> to vector<8x8xbf16>
    %cst_60 = arith.constant dense<0.000000e+00> : vector<8x8xf32>
    %99 = tpu.matmul %96, %98, %cst_60 {dimension_numbers = #tpu.dot_dimension_numbers<[1], [0], [0], [1], [0, 0, 1, 1], [], []>} : vector<8x8xbf16>, vector<8x8xbf16>, vector<8x8xf32> -> vector<8x8xf32>
    %100 = arith.addf %99, %72 : vector<8x8xf32>
    %cst_61 = arith.constant dense<0xFF800000> : vector<8xf32>
    %101 = vector.multi_reduction <maximumf>, %100, %cst_61 [1] : vector<8x8xf32> to vector<8xf32>
    %102 = vector.shape_cast %101 : vector<8xf32> to vector<8x1xf32>
    %103 = vector.broadcast %102 : vector<8x1xf32> to vector<8x8xf32>
    %104 = arith.subf %100, %103 : vector<8x8xf32>
    %105 = math.exp %104 : vector<8x8xf32>
    %cst_62 = arith.constant dense<0.000000e+00> : vector<8xf32>
    %106 = vector.multi_reduction <add>, %105, %cst_62 [1] : vector<8x8xf32> to vector<8xf32>
    %107 = vector.shape_cast %106 : vector<8xf32> to vector<8x1xf32>
    %108 = tpu.reciprocal %107 {approx = true} : vector<8x1xf32> -> vector<8x1xf32>
    %109 = vector.broadcast %108 : vector<8x1xf32> to vector<8x8xf32>
    %110 = arith.mulf %105, %109 : vector<8x8xf32>
    %111 = arith.truncf %110 : vector<8x8xf32> to vector<8x8xbf16>
    %c1_63 = arith.constant 1 : index
    %c0_64 = arith.constant 0 : index
    %c0_65 = arith.constant 0 : index
    %112 = vector.load %arg17[%c1_63, %c0_64, %c0_65] : memref<4x8x8xbf16, #tpu.memory_space<vmem>>, vector<1x8x8xbf16>
    %113 = vector.shape_cast %112 : vector<1x8x8xbf16> to vector<8x8xbf16>
    %cst_66 = arith.constant dense<0.000000e+00> : vector<8x8xf32>
    %114 = tpu.matmul %111, %113, %cst_66 {dimension_numbers = #tpu.dot_dimension_numbers<[1], [0], [0], [1], [0, 0, 1, 1], [], []>} : vector<8x8xbf16>, vector<8x8xbf16>, vector<8x8xf32> -> vector<8x8xf32>
    %115 = arith.truncf %114 : vector<8x8xf32> to vector<8x8xbf16>
    %c0_67 = arith.constant 0 : index
    %c8 = arith.constant 8 : index
    %116 = vector.load %arg18[%c0_67, %c8] : memref<8x32xbf16, #tpu.memory_space<vmem>>, vector<8x8xbf16>
    tpu.vector_store %arg18[%c0_67, %c8], %115 {strides = array<i32>} : memref<8x32xbf16, #tpu.memory_space<vmem>>, vector<8x8xbf16>,
    %117 = vector.extract_strided_slice %67 {offsets = [0, 16], sizes = [8, 8], strides = [1, 1]} : vector<8x32xf32> to vector<8x8xf32>
    %118 = arith.truncf %117 : vector<8x8xf32> to vector<8x8xbf16>
    %c2_68 = arith.constant 2 : index
    %c0_69 = arith.constant 0 : index
    %c0_70 = arith.constant 0 : index
    %119 = vector.load %arg16[%c2_68, %c0_69, %c0_70] : memref<4x8x8xbf16, #tpu.memory_space<vmem>>, vector<1x8x8xbf16>
    %120 = vector.shape_cast %119 : vector<1x8x8xbf16> to vector<8x8xbf16>
    %cst_71 = arith.constant dense<0.000000e+00> : vector<8x8xf32>
    %121 = tpu.matmul %118, %120, %cst_71 {dimension_numbers = #tpu.dot_dimension_numbers<[1], [0], [0], [1], [0, 0, 1, 1], [], []>} : vector<8x8xbf16>, vector<8x8xbf16>, vector<8x8xf32> -> vector<8x8xf32>
    %122 = arith.addf %121, %72 : vector<8x8xf32>
    %cst_72 = arith.constant dense<0xFF800000> : vector<8xf32>
    %123 = vector.multi_reduction <maximumf>, %122, %cst_72 [1] : vector<8x8xf32> to vector<8xf32>
    %124 = vector.shape_cast %123 : vector<8xf32> to vector<8x1xf32>
    %125 = vector.broadcast %124 : vector<8x1xf32> to vector<8x8xf32>
    %126 = arith.subf %122, %125 : vector<8x8xf32>
    %127 = math.exp %126 : vector<8x8xf32>
    %cst_73 = arith.constant dense<0.000000e+00> : vector<8xf32>
    %128 = vector.multi_reduction <add>, %127, %cst_73 [1] : vector<8x8xf32> to vector<8xf32>
    %129 = vector.shape_cast %128 : vector<8xf32> to vector<8x1xf32>
    %130 = tpu.reciprocal %129 {approx = true} : vector<8x1xf32> -> vector<8x1xf32>
    %131 = vector.broadcast %130 : vector<8x1xf32> to vector<8x8xf32>
    %132 = arith.mulf %127, %131 : vector<8x8xf32>
    %133 = arith.truncf %132 : vector<8x8xf32> to vector<8x8xbf16>
    %c2_74 = arith.constant 2 : index
    %c0_75 = arith.constant 0 : index
    %c0_76 = arith.constant 0 : index
    %134 = vector.load %arg17[%c2_74, %c0_75, %c0_76] : memref<4x8x8xbf16, #tpu.memory_space<vmem>>, vector<1x8x8xbf16>
    %135 = vector.shape_cast %134 : vector<1x8x8xbf16> to vector<8x8xbf16>
    %cst_77 = arith.constant dense<0.000000e+00> : vector<8x8xf32>
    %136 = tpu.matmul %133, %135, %cst_77 {dimension_numbers = #tpu.dot_dimension_numbers<[1], [0], [0], [1], [0, 0, 1, 1], [], []>} : vector<8x8xbf16>, vector<8x8xbf16>, vector<8x8xf32> -> vector<8x8xf32>
    %137 = arith.truncf %136 : vector<8x8xf32> to vector<8x8xbf16>
    %c0_78 = arith.constant 0 : index
    %c16 = arith.constant 16 : index
    %138 = vector.load %arg18[%c0_78, %c16] : memref<8x32xbf16, #tpu.memory_space<vmem>>, vector<8x8xbf16>
    tpu.vector_store %arg18[%c0_78, %c16], %137 {strides = array<i32>} : memref<8x32xbf16, #tpu.memory_space<vmem>>, vector<8x8xbf16>,
    %139 = vector.extract_strided_slice %67 {offsets = [0, 24], sizes = [8, 8], strides = [1, 1]} : vector<8x32xf32> to vector<8x8xf32>
    %140 = arith.truncf %139 : vector<8x8xf32> to vector<8x8xbf16>
    %c3_79 = arith.constant 3 : index
    %c0_80 = arith.constant 0 : index
    %c0_81 = arith.constant 0 : index
    %141 = vector.load %arg16[%c3_79, %c0_80, %c0_81] : memref<4x8x8xbf16, #tpu.memory_space<vmem>>, vector<1x8x8xbf16>
    %142 = vector.shape_cast %141 : vector<1x8x8xbf16> to vector<8x8xbf16>
    %cst_82 = arith.constant dense<0.000000e+00> : vector<8x8xf32>
    %143 = tpu.matmul %140, %142, %cst_82 {dimension_numbers = #tpu.dot_dimension_numbers<[1], [0], [0], [1], [0, 0, 1, 1], [], []>} : vector<8x8xbf16>, vector<8x8xbf16>, vector<8x8xf32> -> vector<8x8xf32>
    %144 = arith.addf %143, %72 : vector<8x8xf32>
    %cst_83 = arith.constant dense<0xFF800000> : vector<8xf32>
    %145 = vector.multi_reduction <maximumf>, %144, %cst_83 [1] : vector<8x8xf32> to vector<8xf32>
    %146 = vector.shape_cast %145 : vector<8xf32> to vector<8x1xf32>
    %147 = vector.broadcast %146 : vector<8x1xf32> to vector<8x8xf32>
    %148 = arith.subf %144, %147 : vector<8x8xf32>
    %149 = math.exp %148 : vector<8x8xf32>
    %cst_84 = arith.constant dense<0.000000e+00> : vector<8xf32>
    %150 = vector.multi_reduction <add>, %149, %cst_84 [1] : vector<8x8xf32> to vector<8xf32>
    %151 = vector.shape_cast %150 : vector<8xf32> to vector<8x1xf32>
    %152 = tpu.reciprocal %151 {approx = true} : vector<8x1xf32> -> vector<8x1xf32>
    %153 = vector.broadcast %152 : vector<8x1xf32> to vector<8x8xf32>
    %154 = arith.mulf %149, %153 : vector<8x8xf32>
    %155 = arith.truncf %154 : vector<8x8xf32> to vector<8x8xbf16>
    %c3_85 = arith.constant 3 : index
    %c0_86 = arith.constant 0 : index
    %c0_87 = arith.constant 0 : index
    %156 = vector.load %arg17[%c3_85, %c0_86, %c0_87] : memref<4x8x8xbf16, #tpu.memory_space<vmem>>, vector<1x8x8xbf16>
    %157 = vector.shape_cast %156 : vector<1x8x8xbf16> to vector<8x8xbf16>
    %cst_88 = arith.constant dense<0.000000e+00> : vector<8x8xf32>
    %158 = tpu.matmul %155, %157, %cst_88 {dimension_numbers = #tpu.dot_dimension_numbers<[1], [0], [0], [1], [0, 0, 1, 1], [], []>} : vector<8x8xbf16>, vector<8x8xbf16>, vector<8x8xf32> -> vector<8x8xf32>
    %159 = arith.truncf %158 : vector<8x8xf32> to vector<8x8xbf16>
    %c0_89 = arith.constant 0 : index
    %c24 = arith.constant 24 : index
    %160 = vector.load %arg18[%c0_89, %c24] : memref<8x32xbf16, #tpu.memory_space<vmem>>, vector<8x8xbf16>
    tpu.vector_store %arg18[%c0_89, %c24], %159 {strides = array<i32>} : memref<8x32xbf16, #tpu.memory_space<vmem>>, vector<8x8xbf16>,
    %c0_90 = arith.constant 0 : index
    %c0_91 = arith.constant 0 : index
    %161 = vector.load %arg18[%c0_90, %c0_91] : memref<8x32xbf16, #tpu.memory_space<vmem>>, vector<8x32xbf16>
    %c0_92 = arith.constant 0 : index
    %c0_93 = arith.constant 0 : index
    %162 = vector.load %arg11[%c0_92, %c0_93] : memref<32x32xbf16, #tpu.memory_space<vmem>>, vector<32x32xbf16>
    %cst_94 = arith.constant dense<0.000000e+00> : vector<8x32xf32>
    %163 = tpu.matmul %161, %162, %cst_94 {dimension_numbers = #tpu.dot_dimension_numbers<[1], [0], [0], [1], [0, 0, 1, 1], [], []>} : vector<8x32xbf16>, vector<32x32xbf16>, vector<8x32xf32> -> vector<8x32xf32>
    %c0_95 = arith.constant 0 : index
    %c0_96 = arith.constant 0 : index
    %164 = vector.load %arg12[%c0_95, %c0_96] : memref<1x32xf32, #tpu.memory_space<vmem>>, vector<1x32xf32>
    %165 = vector.broadcast %164 : vector<1x32xf32> to vector<8x32xf32>
    %166 = arith.addf %163, %165 : vector<8x32xf32>
    %167 = arith.extf %60 : vector<8x32xbf16> to vector<8x32xf32>
    %168 = arith.addf %166, %167 : vector<8x32xf32>
    %cst_97 = arith.constant dense<0.000000e+00> : vector<8xf32>
    %169 = vector.multi_reduction <add>, %168, %cst_97 [1] : vector<8x32xf32> to vector<8xf32>
    %170 = vector.shape_cast %169 : vector<8xf32> to vector<8x1xf32>
    %cst_98 = arith.constant 3.200000e+01 : f32
    %171 = vector.broadcast %cst_98 : f32 to vector<8x1xf32>
    %172 = arith.divf %170, %171 : vector<8x1xf32>
    %173 = vector.broadcast %172 : vector<8x1xf32> to vector<8x32xf32>
    %174 = arith.subf %168, %173 : vector<8x32xf32>
    %175 = arith.mulf %174, %174 : vector<8x32xf32>
    %cst_99 = arith.constant dense<0.000000e+00> : vector<8xf32>
    %176 = vector.multi_reduction <add>, %175, %cst_99 [1] : vector<8x32xf32> to vector<8xf32>
    %177 = vector.shape_cast %176 : vector<8xf32> to vector<8x1xf32>
    %cst_100 = arith.constant 3.200000e+01 : f32
    %178 = vector.broadcast %cst_100 : f32 to vector<8x1xf32>
    %179 = arith.divf %177, %178 : vector<8x1xf32>
    %cst_101 = arith.constant 9.99999996E-13 : f32
    %180 = vector.broadcast %cst_101 : f32 to vector<8x1xf32>
    %181 = arith.addf %179, %180 : vector<8x1xf32>
    %182 = math.rsqrt %181 : vector<8x1xf32>
    %183 = vector.broadcast %182 : vector<8x1xf32> to vector<8x32xf32>
    %184 = arith.mulf %174, %183 : vector<8x32xf32>
    %c0_102 = arith.constant 0 : index
    %c0_103 = arith.constant 0 : index
    %185 = vector.load %arg13[%c0_102, %c0_103] : memref<1x32xf32, #tpu.memory_space<vmem>>, vector<1x32xf32>
    %186 = vector.broadcast %185 : vector<1x32xf32> to vector<8x32xf32>
    %187 = arith.mulf %184, %186 : vector<8x32xf32>
    %c0_104 = arith.constant 0 : index
    %c0_105 = arith.constant 0 : index
    %188 = vector.load %arg14[%c0_104, %c0_105] : memref<1x32xf32, #tpu.memory_space<vmem>>, vector<1x32xf32>
    %189 = vector.broadcast %188 : vector<1x32xf32> to vector<8x32xf32>
    %190 = arith.addf %187, %189 : vector<8x32xf32>
    %c0_106 = arith.constant 0 : index
    %c0_107 = arith.constant 0 : index
    %c0_108 = arith.constant 0 : index
    %191 = vector.load %arg15[%c0_106, %c0_107, %c0_108] : memref<1x8x32xf32, #tpu.memory_space<vmem>>, vector<1x8x32xf32>
    %192 = vector.shape_cast %191 : vector<1x8x32xf32> to vector<8x32xf32>
    %193 = vector.shape_cast %190 : vector<8x32xf32> to vector<1x8x32xf32>
    tpu.vector_store %arg15[%c0_106, %c0_107, %c0_108], %193 {strides = array<i32>} : memref<1x8x32xf32, #tpu.memory_space<vmem>>, vector<1x8x32xf32>,
    return
  }
  func.func @transform_0(%arg0: i32, %arg1: i32) -> (i32, i32, i32) {
    %c0_i32 = arith.constant 0 : i32
    %c0_i32_0 = arith.constant 0 : i32
    %c0_i32_1 = arith.constant 0 : i32
    return %arg0, %c0_i32, %c0_i32_0 : i32, i32, i32
  }
  func.func @transform_1(%arg0: i32, %arg1: i32) -> (i32, i32, i32) {
    %c0_i32 = arith.constant 0 : i32
    %c0_i32_0 = arith.constant 0 : i32
    %c0_i32_1 = arith.constant 0 : i32
    return %arg0, %c0_i32, %c0_i32_0 : i32, i32, i32
  }
  func.func @transform_2(%arg0: i32, %arg1: i32) -> (i32, i32) {
    %c0_i32 = arith.constant 0 : i32
    %c0_i32_0 = arith.constant 0 : i32
    return %arg1, %c0_i32 : i32, i32
  }
  func.func @transform_3(%arg0: i32, %arg1: i32) -> (i32, i32) {
    %c0_i32 = arith.constant 0 : i32
    %c0_i32_0 = arith.constant 0 : i32
    %c0_i32_1 = arith.constant 0 : i32
    return %c0_i32, %c0_i32_0 : i32, i32
  }
  func.func @transform_4(%arg0: i32, %arg1: i32) -> (i32, i32) {
    %c0_i32 = arith.constant 0 : i32
    %c0_i32_0 = arith.constant 0 : i32
    %c0_i32_1 = arith.constant 0 : i32
    return %c0_i32, %c0_i32_0 : i32, i32
  }
  func.func @transform_5(%arg0: i32, %arg1: i32) -> (i32, i32) {
    %c0_i32 = arith.constant 0 : i32
    %c0_i32_0 = arith.constant 0 : i32
    %c0_i32_1 = arith.constant 0 : i32
    return %c0_i32, %c0_i32_0 : i32, i32
  }
  func.func @transform_6(%arg0: i32, %arg1: i32) -> (i32, i32) {
    %c0_i32 = arith.constant 0 : i32
    %c0_i32_0 = arith.constant 0 : i32
    %c0_i32_1 = arith.constant 0 : i32
    return %c0_i32, %c0_i32_0 : i32, i32
  }
  func.func @transform_7(%arg0: i32, %arg1: i32) -> (i32, i32) {
    %c0_i32 = arith.constant 0 : i32
    %c0_i32_0 = arith.constant 0 : i32
    %c0_i32_1 = arith.constant 0 : i32
    return %c0_i32, %c0_i32_0 : i32, i32
  }
  func.func @transform_8(%arg0: i32, %arg1: i32) -> (i32, i32) {
    %c0_i32 = arith.constant 0 : i32
    %c0_i32_0 = arith.constant 0 : i32
    %c0_i32_1 = arith.constant 0 : i32
    return %c0_i32, %c0_i32_0 : i32, i32
  }
  func.func @transform_9(%arg0: i32, %arg1: i32) -> (i32, i32) {
    %c0_i32 = arith.constant 0 : i32
    %c0_i32_0 = arith.constant 0 : i32
    %c0_i32_1 = arith.constant 0 : i32
    return %c0_i32, %c0_i32_0 : i32, i32
  }
  func.func @transform_10(%arg0: i32, %arg1: i32) -> (i32, i32) {
    %c0_i32 = arith.constant 0 : i32
    %c0_i32_0 = arith.constant 0 : i32
    %c0_i32_1 = arith.constant 0 : i32
    return %c0_i32, %c0_i32_0 : i32, i32
  }
  func.func @transform_11(%arg0: i32, %arg1: i32) -> (i32, i32) {
    %c0_i32 = arith.constant 0 : i32
    %c0_i32_0 = arith.constant 0 : i32
    %c0_i32_1 = arith.constant 0 : i32
    return %c0_i32, %c0_i32_0 : i32, i32
  }
  func.func @transform_12(%arg0: i32, %arg1: i32) -> (i32, i32) {
    %c0_i32 = arith.constant 0 : i32
    %c0_i32_0 = arith.constant 0 : i32
    %c0_i32_1 = arith.constant 0 : i32
    return %c0_i32, %c0_i32_0 : i32, i32
  }
  func.func @transform_13(%arg0: i32, %arg1: i32) -> (i32, i32, i32) {
    %c0_i32 = arith.constant 0 : i32
    %c0_i32_0 = arith.constant 0 : i32
    return %arg0, %arg1, %c0_i32 : i32, i32, i32
  }
}

</mosaic_0001>

<bundles_post_ra>
// kernel: tpu_custom_call.1
= control target key start
LH: loop header
LB: loop body
LE: loop exit
PB: predicated region body
PF: predicated region fallthrough
CT: control target
= control target key end

     0   :  { %s2843_s0 = inlined_call_operand.hbm [shape: bf16[2,8,32], index: 0, kind: input, shape index: {}]   ;;  %s2844_s1 = inlined_call_operand.hbm [shape: f32[2,1,8], index: 1, kind: input, shape index: {}]   ;;  %s2845_s2 = inlined_call_operand.hbm [shape: f32[8,8], index: 2, kind: input, shape index: {}]   ;;  %s2846_s3 = inlined_call_operand.hbm [shape: bf16[32,32], index: 3, kind: input, shape index: {}]   ;;  %s2847_s4 = inlined_call_operand.hbm [shape: f32[1,32], index: 4, kind: input, shape index: {}]   ;;  %s2848_s5 = inlined_call_operand.hbm [shape: bf16[32,32], index: 5, kind: input, shape index: {}]   ;;  %s2849_s6 = inlined_call_operand.hbm [shape: f32[1,32], index: 6, kind: input, shape index: {}]   ;;  %s2850_s7 = inlined_call_operand.hbm [shape: bf16[32,32], index: 7, kind: input, shape index: {}]   ;;  %s2851_s8 = inlined_call_operand.hbm [shape: f32[1,32], index: 8, kind: input, shape index: {}]   ;;  %s2852_s9 = inlined_call_operand.vmem [shape: bf16[32,32], index: 9, kind: input, shape index: {}]   ;;  %s2853_s10 = inlined_call_operand.vmem [shape: f32[1,32], index: 10, kind: input, shape index: {}]   ;;  %s2854_s11 = inlined_call_operand.vmem [shape: f32[1,32], index: 11, kind: input, shape index: {}]   ;;  %s2855_s12 = inlined_call_operand.vmem [shape: f32[1,32], index: 12, kind: input, shape index: {}]   ;;  %s2856_s13 = inlined_call_operand.hbm [shape: f32[2,8,32], index: 13, kind: output, shape index: {}]  }
   0x1   :  { %2875 = sst [smem:[#allocation35_spill]] %s2844_s1 }
   0x2   :  { %2876 = sst [smem:[#allocation36_spill]] %s2846_s3 }
   0x3   :  { %2877 = sst [smem:[#allocation37_spill]] %s2848_s5 }
   0x4   :  { %2878 = sst [smem:[#allocation38_spill]] %s2854_s11 }
   0x5   :  { %2879 = sst [smem:[#allocation39_spill]] %s2855_s12 }
   0x6   :  { %2880 = sst [smem:[#allocation40_spill]] %s2856_s13 }
   0x7   :  { %18 = vsyncpa [#allocation6], 0 }
   0x8   :  { %19 = vsyncpa [#allocation9], 0 }
   0x9   :  { %20 = vsyncpa [#allocation12], 0 }
   0xa   :  { %21 = vsyncpa [#allocation15], 0 }
   0xb   :  { %22 = vsyncpa [#allocation18], 0 }
   0xc   :  { %23 = vsyncpa [#allocation7], 0 }
   0xd   :  { %25 = vsyncpa [#allocation7 + $0x1], 0  ;;  %s2466_s25 = smov 0   ;;  %s2468_s26 = smov 0  }
   0xe   :  { %s2470_s27 = smov 0   ;;  %s2472_s28 = smov 0  }
   0xf   :  { %s2474_s29 = smov 0   ;;  %s2476_s30 = smov 0  }
  0x10 LB: > { %2881 = sst [smem:[#allocation28_spill]] %s2354_s25  ;;  %s1687_s14 = sadd.s32 4294967295, %s2374_s30   ;;  %s2374_s30 = sphi %s2476_s30, %s31_s30   ;;  %s2370_s29 = sphi %s2474_s29, %s2916_s29   ;;  %s2366_s28 = sphi %s2472_s28, %s2915_s28   ;;  %s2362_s27 = sphi %s2470_s27, %s2914_s27   ;;  %s2358_s26 = sphi %s2468_s26, %s2918_s26   ;;  %s2354_s25 = sphi %s2466_s25, %s2917_s25  }
  0x11   : > { %2882 = sst [smem:[#allocation29_spill]] %s2362_s27  ;;  %s1688_s15 = sadd.s32 4294967294, %s2374_s30  }
  0x12   : > { %2883 = sst [smem:[#allocation30_spill]] %s2370_s29  ;;  %s43_s16 = sadd.s32 1, %s2370_s29 }
  0x13   : > { %2884 = sst [smem:[#allocation31_spill]] %s2374_s30  ;;  %s50_s17 = sadd.s32 1, %s2362_s27 }
  0x14   : > { %p45_p0 = scmp.ge.s32.totalorder %s43_s16, 2  ;;  %p63_p1 = scmp.ne.s32.totalorder %s2358_s26, %s2354_s25 }
  0x15   : > { %p2502_p2 = scmp.eq.s32.totalorder %s1687_s14, 0  ;;  %p350_p3 = scmp.ne.s32.totalorder %s2362_s27, %s2358_s26 }
  0x16   : > { %s2920_s16 = smov (%p45_p0, %s43_s16), 0  ;;  %p351_p5 = scmp.eq.s32.totalorder %s1687_s14, 1 }
  0x17   : > { %s2885_s18 = scalar_select %p2502_p2, 1, 0 }
  0x18   : > { %2886 = sst [smem:[#allocation32_spill]] %s2920_s16  ;;  %p2512_p4 = por %p2502_p2, %p63_p1 }
  0x19   : > { %s47_s20 = ssub.s32 %s2370_s29, %s2920_s16  ;;  %p357_p6 = scmp.eq.s32.totalorder %s1688_s15, 1 }
  0x1a   : > { %s2887_s19 = scalar_select %p2512_p4, 1, 0 }
  0x1b   : > { %p48_p7 = scmp.eq.s32.totalorder %s47_s20, 0  ;;  %p2518_p8 = por %p351_p5, %p350_p3 }
  0x1c   : > { %p2522_p9 = por %p357_p6, %p63_p1  ;;  %p1689_p10 = scmp.ge.s32.totalorder %s2374_s30, 1 }
  0x1d   : > { %s2888_s21 = scalar_select %p2518_p8, 1, 0 }
  0x1e   : > { %s2889_s22 = scalar_select %p2522_p9, 1, 0 }
  0x1f   : > { %s2528_s23 = scalar_select %p48_p7, %s2362_s27, %s50_s17  }
  0x20   : > { %2890 = sst [smem:[#allocation33_spill]] %s2889_s22  ;;  %p364_p11 = scmp.lt.s32.totalorder %s2374_s30, 3 }
  0x21   : > { %2891 = sst [smem:[#allocation34_spill]] %s2528_s23  ;;  %s1691_s24 = sshll.u32 %s2366_s28, 4 }
  0x22   : > { %s2892_s1 = sld [smem:[#allocation35_spill]]  ;;  %p2537_p12 = pnand %p1689_p10, %p364_p11 }
  0x23   : > { %s2376_s16 = smov [#allocation8]   ;;  %s2377_s17 = smov [#allocation11]  }
  0x24   : > { %s2893_s20 = scalar_select %p2537_p12, 1, 0 }
  0x25   : > { %s392_s29 = sshll.u32 %s2376_s16, 4  ;;  %p1889_p13 = pneg %p2537_p12  ;;  %s393_s29 = int_to_ptr.vmem [resolvable:$true] %s392_s29 }
  0x26   : > { %s415_s23 = sshll.u32 %s2377_s17, 4  ;;  %s2555_s23 = int_to_ptr.vmem [resolvable:$true] %s415_s23 }
  0x27   : > { %p2545_p0 = pnand %p1889_p13, %p2512_p4  ;;  %p2551_p1 = pnand %p1889_p13, %p2502_p2 }
  0x28   : > { %s2535_s15 = scalar_lea.hbm %s2892_s1, %s1691_s24  ;;  %s2041_s27 = scalar_lea.hbm %s2892_s1, 32 }
  0x29   : > { %s2895_s24 = scalar_select %p2551_p1, 1, 0 }
  0x2a   : > { %s2036_s16 = scalar_lea.hbm %s2535_s15, 16  ;;  %p2038_p5 = pneg %p2545_p0 }
  0x2b   : > { %p2037_p3 = scmp.ne.s32.totalorder %s2535_s15, %s2036_s16  ;;  %p2042_p10 = scmp.lt.s32.totalorder %s2535_s15, %s2892_s1 }
  0x2c   : > { %p2043_p11 = scmp.lt.s32.totalorder %s2041_s27, %s2036_s16 }
  0x2d   : > { %p2039_p6 = pnand %p2038_p5, %p2037_p3 }
  0x2e   : > { %p2044_p13 = por %p2043_p11, %p2042_p10 }
  0x2f   : > { %p2040_p7 = pneg %p2039_p6 }
  0x31   : > { %p2045_p9 = pnand %p2044_p13, %p2040_p7 }
  0x33   : > { %2048 = shalt.err (!%p2045_p9)
}
  0x34   : > { %s2049_s13 = scalar_lea.vmem %s393_s29, 16  ;;  %s2056_s12 = scalar_lea.vmem %s393_s29, 32 }
  0x35   : > { %p2050_p8 = scmp.ne.s32.totalorder %s393_s29, %s2049_s13  ;;  %p2057_p6 = scmp.lt.s32.totalorder %s393_s29, %s393_s29 }
  0x36   : > { %p2058_p4 = scmp.lt.s32.totalorder %s2056_s12, %s2049_s13 }
  0x37   : > { %p2052_p2 = pnand %p2050_p8, %p2038_p5 }
  0x38   : > { %p2059_p12 = por %p2058_p4, %p2057_p6 }
  0x39   : > { %p2053_p3 = pneg %p2052_p2 }
  0x3b   : > { %p2060_p1 = pnand %p2059_p12, %p2053_p3 }
  0x3d   : > { %2063 = shalt.err (!%p2060_p1)
}
  0x3e   : > { %1895 = dma.hbm_to_vmem [thread:$0]  (!%p2545_p0), %s2535_s15, 16, %s393_s29, [#allocation9]  }
  0x3f   : > { %p2896_p9 = scmp.ne.s32.totalorder %s2895_s24, 0  ;;  %s2075_s30 = scalar_lea.vmem %s2555_s23, 256 }
  0x40   : > { %p2076_p2 = scmp.ne.s32.totalorder %s2555_s23, %s2075_s30  ;;  %p2083_p12 = scmp.lt.s32.totalorder %s2555_s23, %s2555_s23 }
  0x41   : > { %p2579_p7 = pneg %p2896_p9  ;;  %p2084_p1 = scmp.lt.s32.totalorder %s2075_s30, %s2075_s30 }
  0x43   : > { %s2897_s27 = scalar_select %p2579_p7, 1, 0 }
  0x44   : > { %p2078_p4 = pnand %p2076_p2, %p2579_p7  ;;  %p2085_p10 = por %p2084_p1, %p2083_p12 }
  0x46   : > { %p2079_p8 = pneg %p2078_p4 }
  0x48   : > { %p2086_p11 = pnand %p2085_p10, %p2079_p8 }
  0x4a   : > { %2089 = shalt.err (!%p2086_p11)
}
  0x4b   : > { %s2378_s12 = smov 64   ;;  %s2379_s13 = smov 4  }
  0x4c   : > { %s2898_s3 = sld [smem:[#allocation36_spill]]  ;;  %s2380_s15 = smov [#allocation14]  }
  0x4d   : > { %s439_s16 = sshll.u32 %s2380_s15, 4  ;;  %s2381_s14 = smov [#allocation17]   ;;  %s440_s16 = int_to_ptr.vmem [resolvable:$true] %s439_s16 }
  0x4e   : > { %s463_s17 = sshll.u32 %s2381_s14, 4  ;;  %s2101_s30 = scalar_lea.vmem %s440_s16, 256  ;;  %s464_s17 = int_to_ptr.vmem [resolvable:$true] %s463_s17 }
  0x4f   : > { %p2102_p13 = scmp.ne.s32.totalorder %s440_s16, %s2101_s30  ;;  %p2109_p2 = scmp.lt.s32.totalorder %s440_s16, %s440_s16 }
  0x50   : > { %p2110_p4 = scmp.lt.s32.totalorder %s2101_s30, %s2101_s30 }
  0x51   : > { %p2104_p3 = pnand %p2102_p13, %p2579_p7 }
  0x52   : > { %1901 = dma.hbm_to_vmem [thread:$0]  (!%p2896_p9), %s2898_s3, 256, %s2555_s23, [#allocation12], %s2378_s12, %s2378_s12, %s2379_s13  }
  0x53   : > { %p2105_p6 = pneg %p2104_p3  ;;  %p2111_p8 = por %p2110_p4, %p2109_p2 }
  0x55   : > { %p2112_p12 = pnand %p2111_p8, %p2105_p6 }
  0x57   : > { %2115 = shalt.err (!%p2112_p12)
}
  0x58   : > { %s2899_s5 = sld [smem:[#allocation37_spill]]  ;;  %s2127_s22 = scalar_lea.vmem %s464_s17, 256 }
  0x59   : > { %p2128_p1 = scmp.ne.s32.totalorder %s464_s17, %s2127_s22  ;;  %p2135_p13 = scmp.lt.s32.totalorder %s464_s17, %s464_s17 }
  0x5a   : > { %p2136_p3 = scmp.lt.s32.totalorder %s2127_s22, %s2127_s22 }
  0x5b   : > { %p2130_p10 = pnand %p2128_p1, %p2579_p7 }
  0x5c   : > { %p2137_p2 = por %p2136_p3, %p2135_p13 }
  0x5d   : > { %p2131_p11 = pneg %p2130_p10 }
  0x5e   : > { %1907 = dma.hbm_to_vmem [thread:$0]  (!%p2896_p9), %s2899_s5, 256, %s440_s16, [#allocation15], %s2378_s12, %s2378_s12, %s2379_s13  }
  0x5f   : > { %p2138_p6 = pnand %p2137_p2, %p2131_p11 }
  0x61   : > { %2141 = shalt.err (!%p2138_p6)
}
  0x62   : > { %1913 = dma.hbm_to_vmem [thread:$0]  (!%p2896_p9), %s2850_s7, 256, %s464_s17, [#allocation18], %s2378_s12, %s2378_s12, %s2379_s13  }
  0x63   : > { %s1690_s16 = sshll.u32 %s2366_s28, 6  ;;  %s2382_s22 = smov [#allocation5]  }
  0x64   : > { %s377_s29 = scalar_lea.hbm %s2843_s0, %s1690_s16  ;;  %s379_s1 = sshll.u32 %s2382_s22, 4  ;;  %s380_s1 = int_to_ptr.vmem [resolvable:$true] %s379_s1 }
  0x65   : > { %s2142_s3 = scalar_lea.hbm %s377_s29, 64  ;;  %s2147_s15 = scalar_lea.hbm %s2843_s0, 128 }
  0x66   : > { %p2143_p4 = scmp.ne.s32.totalorder %s377_s29, %s2142_s3  ;;  %p2148_p1 = scmp.lt.s32.totalorder %s377_s29, %s2843_s0 }
  0x67   : > { %p2149_p10 = scmp.lt.s32.totalorder %s2147_s15, %s2142_s3 }
  0x68   : > { %p2145_p8 = pnand %p2143_p4, %p2038_p5 }
  0x69   : > { %p2150_p11 = por %p2149_p10, %p2148_p1 }
  0x6a   : > { %p2146_p12 = pneg %p2145_p8 }
  0x6c   : > { %p2151_p13 = pnand %p2150_p11, %p2146_p12 }
  0x6e   : > { %2154 = shalt.err (!%p2151_p13)
}
  0x6f   : > { %s2155_s13 = scalar_lea.vmem %s380_s1, 64  ;;  %p2163_p4 = scmp.lt.s32.totalorder %s380_s1, %s380_s1 }
  0x70   : > { %p2156_p3 = scmp.ne.s32.totalorder %s380_s1, %s2155_s13  ;;  %p2164_p8 = scmp.lt.s32.totalorder %s2155_s13, %s2155_s13 }
  0x72   : > { %p2158_p2 = pnand %p2156_p3, %p2038_p5  ;;  %p2165_p9 = por %p2164_p8, %p2163_p4 }
  0x74   : > { %p2159_p6 = pneg %p2158_p2 }
  0x76   : > { %p2166_p7 = pnand %p2165_p9, %p2159_p6 }
  0x78   : > { %2169 = shalt.err (!%p2166_p7)
}
  0x79   : > { %1892 = dma.hbm_to_vmem [thread:$0]  (!%p2545_p0), %s377_s29, 64, %s380_s1, [#allocation6]  }
  0x7a   : > { %s2383_s3 = smov [#allocation10]   ;;  %s2384_s11 = smov [#allocation13]  }
  0x7b   : > { %s405_s5 = sshll.u32 %s2383_s3, 4  ;;  %s429_s17 = sshll.u32 %s2384_s11, 4  ;;  %s406_s5 = int_to_ptr.vmem [resolvable:$true] %s405_s5  ;;  %s430_s17 = int_to_ptr.vmem [resolvable:$true] %s429_s17 }
  0x7c   : > { %s2181_s16 = scalar_lea.vmem %s406_s5, 128  ;;  %p2900_p1 = scmp.ne.s32.totalorder %s2897_s27, 0 }
  0x7d   : > { %p2182_p12 = scmp.ne.s32.totalorder %s406_s5, %s2181_s16  ;;  %p2189_p11 = scmp.lt.s32.totalorder %s406_s5, %s406_s5 }
  0x7e   : > { %p2190_p13 = scmp.lt.s32.totalorder %s2181_s16, %s2181_s16 }
  0x7f   : > { %p2184_p10 = pnand %p2182_p12, %p2900_p1 }
  0x80   : > { %p2191_p3 = por %p2190_p13, %p2189_p11 }
  0x81   : > { %p2185_p5 = pneg %p2184_p10 }
  0x83   : > { %p2192_p2 = pnand %p2191_p3, %p2185_p5 }
  0x85   : > { %2195 = shalt.err (!%p2192_p2)
}
  0x86   : > { %p2901_p9 = scmp.ne.s32.totalorder %s2895_s24, 0  ;;  %s2207_s1 = scalar_lea.vmem %s430_s17, 16 }
  0x87   : > { %p2208_p0 = scmp.ne.s32.totalorder %s430_s17, %s2207_s1  ;;  %s2214_s23 = scalar_lea.vmem %s430_s17, 32 }
  0x88   : > { %1898 = dma.hbm_to_vmem [thread:$0]  (!%p2901_p9), %s2845_s2, 128, %s406_s5, [#allocation9]  }
  0x89   : > { %p2210_p7 = pnand %p2208_p0, %p2900_p1  ;;  %p2215_p4 = scmp.lt.s32.totalorder %s430_s17, %s430_s17 }
  0x8a   : > { %p2216_p8 = scmp.lt.s32.totalorder %s2214_s23, %s2207_s1 }
  0x8b   : > { %p2211_p6 = pneg %p2210_p7 }
  0x8c   : > { %p2217_p12 = por %p2216_p8, %p2215_p4 }
  0x8e   : > { %p2218_p10 = pnand %p2217_p12, %p2211_p6 }
  0x90   : > { %2221 = shalt.err (!%p2218_p10)
}
  0x91   : > { %1904 = dma.hbm_to_vmem [thread:$0]  (!%p2901_p9), %s2847_s4, 16, %s430_s17, [#allocation12]  }
  0x92   : > { %s2385_s15 = smov [#allocation16]   ;;  %s2386_s12 = smov [#allocation19]  }
  0x93   : > { %s453_s14 = sshll.u32 %s2385_s15, 4  ;;  %s477_s13 = sshll.u32 %s2386_s12, 4  ;;  %s454_s14 = int_to_ptr.vmem [resolvable:$true] %s453_s14  ;;  %s478_s13 = int_to_ptr.vmem [resolvable:$true] %s477_s13 }
  0x94   : > { %s2233_s3 = scalar_lea.vmem %s454_s14, 16  ;;  %s2240_s5 = scalar_lea.vmem %s454_s14, 32 }
  0x95   : > { %p2234_p5 = scmp.ne.s32.totalorder %s454_s14, %s2233_s3  ;;  %p2241_p3 = scmp.lt.s32.totalorder %s454_s14, %s454_s14 }
  0x96   : > { %p2242_p2 = scmp.lt.s32.totalorder %s2240_s5, %s2233_s3 }
  0x97   : > { %p2236_p11 = pnand %p2234_p5, %p2900_p1 }
  0x98   : > { %p2243_p0 = por %p2242_p2, %p2241_p3 }
  0x99   : > { %p2237_p13 = pneg %p2236_p11 }
  0x9b   : > { %p2244_p7 = pnand %p2243_p0, %p2237_p13 }
  0x9d   : > { %2247 = shalt.err (!%p2244_p7)
}
  0x9e   : > { %1910 = dma.hbm_to_vmem [thread:$0]  (!%p2901_p9), %s2849_s6, 16, %s454_s14, [#allocation15]  }
  0x9f   : > { %s2259_s16 = scalar_lea.vmem %s478_s13, 16  ;;  %s2266_s25 = scalar_lea.vmem %s478_s13, 32 }
  0xa0   : > { %p2260_p6 = scmp.ne.s32.totalorder %s478_s13, %s2259_s16  ;;  %p2267_p12 = scmp.lt.s32.totalorder %s478_s13, %s478_s13 }
  0xa1   : > { %p2268_p10 = scmp.lt.s32.totalorder %s2266_s25, %s2259_s16 }
  0xa2   : > { %p2262_p4 = pnand %p2260_p6, %p2900_p1 }
  0xa3   : > { %p2269_p5 = por %p2268_p10, %p2267_p12 }
  0xa4   : > { %p2263_p8 = pneg %p2262_p4 }
  0xa6   : > { %p2270_p11 = pnand %p2269_p5, %p2263_p8 }
  0xa8   : > { %2273 = shalt.err (!%p2270_p11)
}
  0xa9   : > { %1916 = dma.hbm_to_vmem [thread:$0]  (!%p2901_p9), %s2851_s8, 16, %s478_s13, [#allocation18]  }
  0xaa   : > { %p2902_p13 = scmp.ne.s32.totalorder %s2893_s20, 0 }
  0xab   : > { %p2903_p3 = scmp.ne.s32.totalorder (!%p2902_p13), %s2887_s19, 0 }
  0xac   : > { %502 = sbr.rel (%p2902_p13) target bundleno = 2058 (0x80a), region = 72 }
  0xb1   : > { %2325 = dma.done.wait (%p2903_p3), [#allocation6], 64  }
  0xb2   : > { %2327 = vsyncadd (%p2903_p3), [#allocation6], 4294967232 }
  0xb3   : > { %2329 = dma.done.wait (%p2903_p3), [#allocation9], 16  }
  0xb4   : > { %2331 = vsyncadd (%p2903_p3), [#allocation9], 4294967280  ;;  %p2904_p1 = scmp.ne.s32.totalorder %s2885_s18, 0 }
  0xb6   : > { %2333 = dma.done.wait (%p2904_p1), [#allocation9], 128  }
  0xb7   : > { %2335 = vsyncadd (%p2904_p1), [#allocation9], 4294967168 }
  0xb8   : > { %2337 = dma.done.wait (%p2904_p1), [#allocation12], 272  }
  0xb9   : > { %2339 = vsyncadd (%p2904_p1), [#allocation12], 4294967024 }
  0xba   : > { %2341 = dma.done.wait (%p2904_p1), [#allocation15], 272  }
  0xbb   : > { %2343 = vsyncadd (%p2904_p1), [#allocation15], 4294967024 }
  0xbc   : > { %2345 = dma.done.wait (%p2904_p1), [#allocation18], 272  }
  0xbd   : > { %2347 = vsyncadd (%p2904_p1), [#allocation18], 4294967024  ;;  %v2387_v0 = vmov 0.0   ;;  %vm2388_vm0 = vmmov 0   ;;  %v2010_v1 = vld [vmem:[#allocation14 + $0x8] sm:$0xff]   ;;  %v2011_v2 = vld [vmem:[#allocation14] sm:$0xff]  }
  0xbe   : > { %1775 = vmatprep.subr.bf16.mxu0 %v2387_v0  ;;  %1779 = vmatprep.mubr.msk.bf16.mxu0 %vm2388_vm0, %v2387_v0  ;;  %v574_v3 = vld [vmem:[#allocation5] sm:$0xf]  ;;  %vm598_vm1 = vcmask 261120   ;;  %v2012_v4 = vld [vmem:[#allocation11 + $0x8] sm:$0xff]   ;;  %v2013_v5 = vld [vmem:[#allocation11] sm:$0xff]   ;;  %s2389_s18 = smov 104  }
  0xbf   : > { %1783 = vmatprep.subr.bf16.mxu1 %v2387_v0  ;;  %1787 = vmatprep.mubr.msk.bf16.mxu1 %vm2388_vm0, %v2387_v0  ;;  %v2702_v6 = vld [vmem:[#allocation5] sm:$0xf]  ;;  %v1708_v7 = vld [vmem:[#allocation16] ss:$0 sm:$0xff]  ;;  %s2390_s19 = smov 120   ;;  %s2391_s20 = smov 112  }
  0xc0   : > { %1776 = vmatpush3.bf16.msra.mxu0 %v2010_v1  ;;  %v1717_v13 = vld [vmem:[#allocation13] ss:$0 sm:$0xff]  ;;  %v2015_v22 = vld [vmem:[#allocation17] sm:$0xff]   ;;  %vm738_vm2 = vcmask 60416   ;;  %vm963_vm3 = vcmask 1043456   ;;  %vm959_vm4 = vcmask 64512  }
  0xc1   : > { %1777 = vmatprep.subr.bf16.mxu0 %v2387_v0  ;;  %v2014_v16 = vld [vmem:[#allocation17 + $0x8] sm:$0xff]   ;;  %v1712_v47 = vld [vmem:[#allocation19] ss:$0 sm:$0xff]  ;;  %v948_v56 = vld [vmem:[#allocation10] sm:$0xff]  ;;  %s2392_s24 = smov 8   ;;  %s2393_s27 = smov 16  }
  0xc2   : > { %1784 = vmatpush3.bf16.msra.mxu1 %v2014_v16  ;;  %v1721_v57 = vld [vmem:[#allocation8] ss:$0 sm:$0xff]  ;;  %s2394_s14 = smov 24   ;;  %vm1184_vm5 = vcmask 126016   ;;  %vm1301_vm6 = vcmask 191616   ;;  %vm1418_vm7 = vcmask 257216  }
  0xc3   : > { %1785 = vmatprep.subr.bf16.mxu1 %v2387_v0  ;;  %v956_v58 = vadd.f32 %v1721_v57, %v948_v56  ;;  %s570_s3 = sand.u32 1, %s2358_s26   ;;  %s2905_s16 = sld [smem:[#allocation38_spill]] }
  0xc4   : > { %1778 = vmatpush3.bf16.msra.mxu0 %v2011_v2  ;;  %s1707_s5 = sshll.u32 %s570_s3, 3  ;;  %s2906_s1 = sld [smem:[#allocation39_spill]] }
  0xc5   : > { %1791 = vmatprep.subr.bf16.mxu0 %v2387_v0  ;;  %s2907_s23 = sld [smem:[#allocation40_spill]]  ;;  %s1521_s22 = scalar_lea.sflag [#allocation7], %s570_s3 }
  0xc6   : > { %1786 = vmatpush3.bf16.msra.mxu1 %v2015_v22  ;;  %p2908_p2 = scmp.ne.s32.totalorder %s2888_s21, 0 }
  0xc7   : > { %1780 = vmatmul.mubr.msk.bf16.vlgmr.msra.gmra.mxu0 %vm598_vm1, %v574_v3  ;;  %1799 = vmatprep.subr.bf16.mxu1 %v2387_v0 }
  0xc8   : > { %1792 = vmatpush3.bf16.msra.mxu0 %v2012_v4  ;;  %1795 = vmatprep.mubr.msk.bf16.mxu0 %vm2388_vm0, %v2387_v0 }
  0xc9   : > { %1793 = vmatprep.subr.bf16.mxu0 %v2387_v0  ;;  %1788 = vmatmul.mubr.msk.bf16.vlgmr.msra.gmra.mxu1 %vm598_vm1, %v574_v3 }
  0xca   : > { %1801 = vmatprep.mubr.msk.bf16.mxu1 %vm2388_vm0, %v2387_v0 }
  0xcc   : > { %1794 = vmatpush3.bf16.msra.mxu0 %v2013_v5 }
  0xcd   : > { %1805 = vmatprep.subr.bf16.mxu0 %v2387_v0 }
  0xcf   : > { %1796 = vmatmul.mubr.msk.bf16.vlgmr.msra.gmra.mxu0 %vm598_vm1, %v2702_v6 }
  0xd0   : > { %1807 = vmatprep.mubr.msk.bf16.mxu0 %vm2388_vm0, %v2387_v0 }
 0x187   : > { %v636_v8 = vpop.f32.mrf.mxu0 }
 0x188   : > { %v637_v9 = vadd.f32 %v1708_v7, %v636_v8 }
 0x189   : > { %v1781_v10 = vpop.f32.mrf.mxu0  ;;  %v699_v48 = vpop.f32.mrf.mxu1 }
 0x18a   : > { %832 = vrot.lane.b32.xlu1 %v637_v9, %s2389_s18  ;;  %743 = vrot.lane.b32.xlu0 %v637_v9, %s2390_s19  ;;  %v700_v49 = vadd.f32 %v1712_v47, %v699_v48 }
 0x18b   : > { %v639_v11 = vpop.f32.mrf.mxu0  ;;  %v1789_v50 = vpop.f32.mrf.mxu1 }
 0x18c   : > { %v2744_v51 = vpack.c.bf16 %v700_v49, %v700_v49 }
 0x18d   : > { %v1782_v12 = vpop.f32.mrf.mxu0  ;;  %v702_v52 = vpop.f32.mrf.mxu1 }
 0x18e   : > { %789 = vrot.lane.b32.xlu0 %v637_v9, %s2391_s20  ;;  %741 = vst.msk [vmem:[#allocation3] sm:$0xf] %vm738_vm2, %v2744_v51 }
 0x18f   : > { %v941_v14 = vpop.f32.mrf.mxu0  ;;  %v1790_v53 = vpop.f32.mrf.mxu1 }
 0x190   : > { %v942_v15 = vadd.f32 %v1717_v13, %v941_v14 }
 0x191   : > { %v1797_v17 = vpop.f32.mrf.mxu0 }
 0x192   : > { %v947_v18 = vmul.f32 0.35355338, %v942_v15 }
 0x193   : > { %v944_v19 = vpop.f32.mrf.mxu0 }
 0x194   : > { %v957_v20 = vpack.c.bf16 %v947_v18, %v947_v18 }
 0x195   : > { %v1798_v21 = vpop.f32.mrf.mxu0  ;;  %v1019_v54 = vld [vmem:[#allocation3] sm:$0xf] }
 0x196   : > { %1070 = vrot.lane.b32.xlu1 %v957_v20, %s2390_s19  ;;  %v1024_v55 = vsel %vm963_vm3, %v1019_v54, 0 }
 0x197   : > { %1806 = vmatpush3.bf16.msra.mxu0 %v1024_v55 }
 0x198   : > { %1817 = vmatprep.subr.bf16.mxu0 %v2387_v0 }
 0x19a   : > { %1187 = vrot.lane.b32.xlu1 %v957_v20, %s2391_s20 }
 0x19e   : > { %1304 = vrot.lane.b32.xlu1 %v957_v20, %s2389_s18 }
 0x1fc   : > { %v744_v23 = vpop.permute.xlu0 %743  ;;  %v833_v26 = vpop.permute.xlu1 %832 }
 0x1fd   : > { %v2003_v24 = vpack.i.bf16 %v744_v23, %v637_v9 }
 0x1ff   : > { %2004 = vxpose.xlu0.b32.start.end [1/1] (short) (narrow) %v2003_v24, 8 }
 0x200   : > { %v790_v25 = vpop.permute.xlu0 %789 }
 0x201   : > { %792 = vxpose.xlu1.b32.start.end [1/1] (short) (narrow) %v790_v25, 8 }
 0x203   : > { %835 = vxpose.xlu0.b32.start.end [1/1] (short) (narrow) %v833_v26, 8 }
 0x208   : > { %v1071_v27 = vpop.permute.xlu1 %1070 }
 0x20c   : > { %v1188_v28 = vpop.permute.xlu1 %1187 }
 0x210   : > { %v1305_v29 = vpop.permute.xlu1 %1304 }
 0x27b   : > { %v2005_v30 = vpop.trf.xlu0 }
 0x27c   : > { %v2009_v31 = vunpack.i.h.bf16 %v2005_v30  ;;  %v2006_v32 = vunpack.i.l.bf16 %v2005_v30 }
 0x27d   : > { %v808_v33 = vpop.trf.xlu1 }
 0x27e   : > { %v778_v34 = vpack.c.bf16 %v2009_v31, %v2009_v31  ;;  %v737_v35 = vpack.c.bf16 %v2006_v32, %v2006_v32  ;;  %v824_v36 = vpack.c.bf16 %v808_v33, %v808_v33 }
 0x27f   : > { %v851_v37 = vpop.trf.xlu0 }
 0x280   : > { %780 = vst.msk [vmem:[#allocation2 + $0x4] sm:$0xf] %vm738_vm2, %v778_v34  ;;  %739 = vst.msk [vmem:[#allocation2] sm:$0xf] %vm738_vm2, %v737_v35  ;;  %v867_v38 = vpack.c.bf16 %v851_v37, %v851_v37 }
 0x281   : > { %826 = vst.msk [vmem:[#allocation2 + $0x8] sm:$0xf] %vm738_vm2, %v824_v36 }
 0x282   : > { %869 = vst.msk [vmem:[#allocation2 + $0xc] sm:$0xf] %vm738_vm2, %v867_v38 }
 0x287   : > { %v958_v39 = vld [vmem:[#allocation2] sm:$0xf]  ;;  %v1068_v41 = vld [vmem:[#allocation2 + $0x4] sm:$0xf] }
 0x288   : > { %v965_v40 = vsel %vm963_vm3, %v958_v39, 0  ;;  %v1076_v42 = vsel %vm963_vm3, %v1068_v41, 0  ;;  %v1186_v43 = vld [vmem:[#allocation2 + $0x8] sm:$0xf] }
 0x289   : > { %1800 = vmatpush3.bf16.msra.mxu1 %v965_v40  ;;  %v1193_v44 = vsel %vm963_vm3, %v1186_v43, 0  ;;  %v1303_v45 = vld [vmem:[#allocation2 + $0xc] sm:$0xf] }
 0x28a   : > { %1811 = vmatprep.subr.bf16.mxu1 %v2387_v0  ;;  %v1310_v46 = vsel %vm963_vm3, %v1303_v45, 0 }
 0x28c   : > { %1802 = vmatmul.mubr.msk.bf16.vlgmr.msra.gmra.mxu1 %vm959_vm4, %v957_v20 }
 0x28d   : > { %1812 = vmatpush3.bf16.msra.mxu1 %v1076_v42  ;;  %1813 = vmatprep.mubr.msk.bf16.mxu1 %vm2388_vm0, %v2387_v0 }
 0x28e   : > { %1823 = vmatprep.subr.bf16.mxu1 %v2387_v0 }
 0x294   : > { %1814 = vmatmul.mubr.msk.bf16.vlgmr.msra.gmra.mxu1 %vm959_vm4, %v1071_v27 }
 0x295   : > { %1824 = vmatpush3.bf16.msra.mxu1 %v1193_v44  ;;  %1825 = vmatprep.mubr.msk.bf16.mxu1 %vm2388_vm0, %v2387_v0 }
 0x296   : > { %1835 = vmatprep.subr.bf16.mxu1 %v2387_v0 }
 0x29c   : > { %1826 = vmatmul.mubr.msk.bf16.vlgmr.msra.gmra.mxu1 %vm959_vm4, %v1188_v28 }
 0x29d   : > { %1836 = vmatpush3.bf16.msra.mxu1 %v1310_v46  ;;  %1837 = vmatprep.mubr.msk.bf16.mxu1 %vm2388_vm0, %v2387_v0 }
 0x29e   : > { %1847 = vmatprep.subr.bf16.mxu1 %v2387_v0 }
 0x2a4   : > { %1838 = vmatmul.mubr.msk.bf16.vlgmr.msra.gmra.mxu1 %vm959_vm4, %v1305_v29 }
 0x2a5   : > { %1851 = vmatprep.mubr.msk.bf16.mxu1 %vm2388_vm0, %v2387_v0 }
 0x34c   : > { %v1001_v59 = vpop.f32.mrf.mxu1 }
 0x34d   : > { %v1002_v60 = vadd.f32 %v1001_v59, %v956_v58 }
 0x34e   : > { %v1803_v61 = vpop.f32.mrf.mxu1 }
 0x34f   : > { %v1007_v62 = vsel %vm959_vm4, %v1002_v60, -inf }
 0x350   : > { %1008 = vmax.xlane.f32.xlu0 %v1007_v62  ;;  %v1004_v63 = vpop.f32.mrf.mxu1 }
 0x352   : > { %v1804_v1 = vpop.f32.mrf.mxu1 }
 0x354   : > { %v1112_v2 = vpop.f32.mrf.mxu1 }
 0x355   : > { %v1113_v3 = vadd.f32 %v1112_v2, %v956_v58 }
 0x356   : > { %v1815_v4 = vpop.f32.mrf.mxu1 }
 0x357   : > { %v1118_v5 = vsel %vm959_vm4, %v1113_v3, -inf }
 0x358   : > { %1119 = vmax.xlane.f32.xlu1 %v1118_v5  ;;  %v1115_v7 = vpop.f32.mrf.mxu1 }
 0x35a   : > { %v1816_v8 = vpop.f32.mrf.mxu1 }
 0x35c   : > { %v1229_v9 = vpop.f32.mrf.mxu1 }
 0x35d   : > { %v1230_v10 = vadd.f32 %v1229_v9, %v956_v58 }
 0x35e   : > { %v1827_v11 = vpop.f32.mrf.mxu1 }
 0x35f   : > { %v1235_v12 = vsel %vm959_vm4, %v1230_v10, -inf }
 0x360   : > { %1236 = vmax.xlane.f32.xlu0 %v1235_v12  ;;  %v1232_v13 = vpop.f32.mrf.mxu1 }
 0x362   : > { %v1828_v14 = vpop.f32.mrf.mxu1 }
 0x364   : > { %v1346_v15 = vpop.f32.mrf.mxu1 }
 0x365   : > { %v1347_v16 = vadd.f32 %v1346_v15, %v956_v58 }
 0x366   : > { %v1839_v17 = vpop.f32.mrf.mxu1 }
 0x367   : > { %v1352_v18 = vsel %vm959_vm4, %v1347_v16, -inf }
 0x368   : > { %1353 = vmax.xlane.f32.xlu0 %v1352_v18  ;;  %v1349_v19 = vpop.f32.mrf.mxu1 }
 0x369   : > { %v2016_v19 = vld [vmem:[%s2852_s9 + $0x8] sm:$0xff]  }
 0x36a   : > { %v1840_v20 = vpop.f32.mrf.mxu1  ;;  %1848 = vmatpush3.bf16.msra.mxu1 %v2016_v19 }
 0x36b   : > { %v2017_v20 = vld [vmem:[%s2852_s9] sm:$0xff]   ;;  %1849 = vmatprep.subr.bf16.mxu1 %v2387_v0 }
 0x36e   : > { %1850 = vmatpush3.bf16.msra.mxu1 %v2017_v20 }
 0x3d9   : > { %v1009_v21 = vpop.xlane.xlu0 %1008 }
 0x3da   : > { %v1010_v22 = vsub.f32 %v1002_v60, %v1009_v21 }
 0x3dc   : > { %v1011_v23 = vmul.f32 1.442695, %v1010_v22 }
 0x3de   : > { %2018 = vpow2.f32 %v1011_v23 }
 0x3e1   : > { %v1120_v24 = vpop.xlane.xlu1 %1119 }
 0x3e2   : > { %v1121_v25 = vsub.f32 %v1113_v3, %v1120_v24 }
 0x3e4   : > { %v1122_v26 = vmul.f32 1.442695, %v1121_v25 }
 0x3e6   : > { %2020 = vpow2.f32 %v1122_v26 }
 0x3e9   : > { %v1237_v27 = vpop.xlane.xlu0 %1236 }
 0x3ea   : > { %v1238_v28 = vsub.f32 %v1230_v10, %v1237_v27 }
 0x3eb   : > { %v2019_v29 = vpop.eup %2018 }
 0x3ec   : > { %v1239_v30 = vmul.f32 1.442695, %v1238_v28  ;;  %v1013_v31 = vsel %vm959_vm4, %v2019_v29, 0.0 }
 0x3ed   : > { %1014 = vadd.xlane.f32.xlu0 %v1013_v31 }
 0x3ee   : > { %2022 = vpow2.f32 %v1239_v30  ;;  %v1487_v30 = vunpack.c.l.bf16 %v2702_v6 }
 0x3f1   : > { %v1354_v36 = vpop.xlane.xlu0 %1353 }
 0x3f2   : > { %v1355_v37 = vsub.f32 %v1347_v16, %v1354_v36 }
 0x3f3   : > { %v2021_v32 = vpop.eup %2020 }
 0x3f4   : > { %v1124_v33 = vsel %vm959_vm4, %v2021_v32, 0.0  ;;  %v1356_v38 = vmul.f32 1.442695, %v1355_v37 }
 0x3f5   : > { %1125 = vadd.xlane.f32.xlu1 %v1124_v33 }
 0x3f6   : > { %2024 = vpow2.f32 %v1356_v38 }
 0x3fb   : > { %v2023_v34 = vpop.eup %2022 }
 0x3fc   : > { %v1241_v35 = vsel %vm959_vm4, %v2023_v34, 0.0 }
 0x3fd   : > { %1242 = vadd.xlane.f32.xlu0 %v1241_v35 }
 0x403   : > { %v2025_v39 = vpop.eup %2024 }
 0x404   : > { %v1358_v40 = vsel %vm959_vm4, %v2025_v39, 0.0 }
 0x406   : > { %827 = vrot.lane.b32.xlu1 %v2744_v51, %s2391_s20 }
 0x413   : > { %784 = vrot.lane.b32.xlu0 %v2744_v51, %s2390_s19  ;;  %s572_s19 = scalar_lea.vmem [#allocation20], %s1707_s5 }
 0x414   : > { %s1535_s20 = sshll.u32 %s572_s19, 4  ;;  %s1536_s20 = int_to_ptr.vmem [resolvable:$true] %s1535_s20 }
 0x415   : > { %s2274_s15 = scalar_lea.vmem %s1536_s20, 128 }
 0x416   : > { %p2275_p9 = scmp.ne.s32.totalorder %s1536_s20, %s2274_s15 }
 0x418   : > { %p2276_p0 = pnand %p2275_p9, %p2908_p2 }
 0x41a   : > { %p2277_p7 = pneg %p2276_p0 }
 0x42a   : > { %1359 = vadd.xlane.f32.xlu1 %v1358_v40 }
 0x43b   : > { %870 = vrot.lane.b32.xlu1 %v2744_v51, %s2389_s18  ;;  %s1740_s18 = sshll.u32 %s2366_s28, 7 }
 0x43c   : > { %s1533_s29 = scalar_lea.hbm %s2907_s23, %s1740_s18 }
 0x476   : > { %v1015_v41 = vpop.xlane.xlu0 %1014 }
 0x477   : > { %2026 = vrcp.f32 %v1015_v41 }
 0x47e   : > { %v1126_v42 = vpop.xlane.xlu1 %1125 }
 0x47f   : > { %2028 = vrcp.f32 %v1126_v42 }
 0x482   : > { %v828_v43 = vpop.permute.xlu1 %827 }
 0x483   : > { %831 = vst.msk [vmem:[#allocation3 + $0x8] sm:$0xf] %vm738_vm2, %v828_v43 }
 0x484   : > { %v2027_v44 = vpop.eup %2026 }
 0x485   : > { %v1017_v45 = vmul.f32 %v2027_v44, %v2019_v29 }
 0x486   : > { %v1243_v46 = vpop.xlane.xlu0 %1242 }
 0x487   : > { %v1018_v47 = vpack.c.bf16 %v1017_v45, %v1017_v45  ;;  %2030 = vrcp.f32 %v1243_v46  ;;  %v1737_v46 = vld [vmem:[%s2905_s16] ss:$0 sm:$0xff] }
 0x489   : > { %1808 = vmatmul.mubr.msk.bf16.vlgmr.msra.gmra.mxu0 %vm959_vm4, %v1018_v47 }
 0x48a   : > { %v785_v48 = vpop.permute.xlu0 %784  ;;  %1819 = vmatprep.mubr.msk.bf16.mxu0 %vm2388_vm0, %v2387_v0  ;;  %v1247_v53 = vld [vmem:[#allocation3 + $0x8] sm:$0xf] }
 0x48b   : > { %788 = vst.msk [vmem:[#allocation3 + $0x4] sm:$0xf] %vm738_vm2, %v785_v48  ;;  %v1252_v56 = vsel %vm963_vm3, %v1247_v53, 0  ;;  %v1738_v48 = vld [vmem:[%s2906_s1] ss:$0 sm:$0xff] }
 0x48c   : > { %v2029_v49 = vpop.eup %2028 }
 0x48d   : > { %v1128_v50 = vmul.f32 %v2029_v49, %v2021_v32 }
 0x48f   : > { %v1129_v54 = vpack.c.bf16 %v1128_v50, %v1128_v50 }
 0x492   : > { %v1130_v51 = vld [vmem:[#allocation3 + $0x4] sm:$0xf] }
 0x493   : > { %v1135_v52 = vsel %vm963_vm3, %v1130_v51, 0 }
 0x494   : > { %1818 = vmatpush3.bf16.msra.mxu0 %v1135_v52  ;;  %v2031_v55 = vpop.eup %2030 }
 0x495   : > { %1829 = vmatprep.subr.bf16.mxu0 %v2387_v0  ;;  %v1245_v57 = vmul.f32 %v2031_v55, %v2023_v34 }
 0x497   : > { %1820 = vmatmul.mubr.msk.bf16.vlgmr.msra.gmra.mxu0 %vm959_vm4, %v1129_v54  ;;  %v1246_v58 = vpack.c.bf16 %v1245_v57, %v1245_v57 }
 0x498   : > { %1830 = vmatpush3.bf16.msra.mxu0 %v1252_v56  ;;  %1831 = vmatprep.mubr.msk.bf16.mxu0 %vm2388_vm0, %v2387_v0 }
 0x499   : > { %1841 = vmatprep.subr.bf16.mxu0 %v2387_v0 }
 0x49f   : > { %1832 = vmatmul.mubr.msk.bf16.vlgmr.msra.gmra.mxu0 %vm959_vm4, %v1246_v58 }
 0x4a0   : > { %1843 = vmatprep.mubr.msk.bf16.mxu0 %vm2388_vm0, %v2387_v0  ;;  %v1733_v0 = vld [vmem:[%s2853_s10] ss:$0 sm:$0xff] }
 0x4b3   : > { %v1360_v59 = vpop.xlane.xlu1 %1359 }
 0x4b4   : > { %2032 = vrcp.f32 %v1360_v59 }
 0x4b7   : > { %v871_v60 = vpop.permute.xlu1 %870 }
 0x4b8   : > { %874 = vst.msk [vmem:[#allocation3 + $0xc] sm:$0xf] %vm738_vm2, %v871_v60 }
 0x4bf   : > { %v1364_v61 = vld [vmem:[#allocation3 + $0xc] sm:$0xf] }
 0x4c0   : > { %v1369_v62 = vsel %vm963_vm3, %v1364_v61, 0 }
 0x4c1   : > { %v2033_v63 = vpop.eup %2032  ;;  %1842 = vmatpush3.bf16.msra.mxu0 %v1369_v62 }
 0x4c2   : > { %v1362_v1 = vmul.f32 %v2033_v63, %v2025_v39 }
 0x4c4   : > { %v1363_v2 = vpack.c.bf16 %v1362_v1, %v1362_v1 }
 0x4c6   : > { %1844 = vmatmul.mubr.msk.bf16.vlgmr.msra.gmra.mxu0 %vm959_vm4, %v1363_v2 }
 0x549   : > { %v1060_v3 = vpop.f32.mrf.mxu0 }
 0x54a   : > { %v1066_v4 = vpack.c.bf16 %v1060_v3, %v1060_v3 }
 0x54b   : > { %v1809_v5 = vpop.f32.mrf.mxu0 }
 0x54c   : > { %1067 = vst.msk [vmem:[#allocation4] sm:$0xf] %vm738_vm2, %v1066_v4 }
 0x54d   : > { %v1063_v7 = vpop.f32.mrf.mxu0 }
 0x54f   : > { %v1810_v8 = vpop.f32.mrf.mxu0 }
 0x557   : > { %v1171_v9 = vpop.f32.mrf.mxu0 }
 0x558   : > { %v1744_v10 = vpack.c.bf16 %v1171_v9, %v1171_v9 }
 0x559   : > { %v1821_v11 = vpop.f32.mrf.mxu0 }
 0x55a   : > { %1181 = vrot.lane.b32.xlu0 %v1744_v10, %s2392_s24 }
 0x55b   : > { %v1174_v12 = vpop.f32.mrf.mxu0 }
 0x55d   : > { %v1822_v13 = vpop.f32.mrf.mxu0 }
 0x55f   : > { %v1288_v14 = vpop.f32.mrf.mxu0 }
 0x560   : > { %v1745_v15 = vpack.c.bf16 %v1288_v14, %v1288_v14 }
 0x561   : > { %v1833_v16 = vpop.f32.mrf.mxu0 }
 0x562   : > { %1298 = vrot.lane.b32.xlu1 %v1745_v15, %s2393_s27 }
 0x563   : > { %v1291_v17 = vpop.f32.mrf.mxu0 }
 0x565   : > { %v1834_v18 = vpop.f32.mrf.mxu0 }
 0x586   : > { %v1405_v21 = vpop.f32.mrf.mxu0 }
 0x587   : > { %v1746_v22 = vpack.c.bf16 %v1405_v21, %v1405_v21 }
 0x588   : > { %v1845_v23 = vpop.f32.mrf.mxu0 }
 0x589   : > { %1415 = vrot.lane.b32.xlu0 %v1746_v22, %s2394_s14  ;;  %s2395_s14 = smov [#allocation20]  }
 0x58a   : > { %v1408_v24 = vpop.f32.mrf.mxu0  ;;  %s2278_s12 = sshll.u32 %s2395_s14, 4  ;;  %s2279_s12 = int_to_ptr.vmem [resolvable:$false] %s2278_s12 }
 0x58b   : > { %s2280_s28 = scalar_lea.vmem %s2279_s12, 256  ;;  %p2281_p6 = scmp.lt.s32.totalorder %s1536_s20, %s2279_s12 }
 0x58c   : > { %v1846_v25 = vpop.f32.mrf.mxu0  ;;  %p2282_p4 = scmp.lt.s32.totalorder %s2280_s28, %s2274_s15 }
 0x58e   : > { %p2283_p8 = por %p2282_p4, %p2281_p6 }
 0x590   : > { %p2284_p12 = pnand %p2283_p8, %p2277_p7 }
 0x5cc   : > { %v1182_v26 = vpop.permute.xlu0 %1181 }
 0x5cd   : > { %1185 = vst.msk [vmem:[#allocation4] sm:$0xf] %vm1184_vm5, %v1182_v26 }
 0x5d4   : > { %v1299_v27 = vpop.permute.xlu1 %1298 }
 0x5d5   : > { %1302 = vst.msk [vmem:[#allocation4] sm:$0xf] %vm1301_vm6, %v1299_v27 }
 0x5fb   : > { %v1416_v28 = vpop.permute.xlu0 %1415 }
 0x5fc   : > { %1419 = vst.msk [vmem:[#allocation4] sm:$0xf] %vm1418_vm7, %v1416_v28 }
 0x603   : > { %v1420_v29 = vld [vmem:[#allocation4] sm:$0xf] }
 0x604   : > { %1852 = vmatmul.mubr.msk.bf16.vlgmr.msra.gmra.mxu1 %vm598_vm1, %v1420_v29 }
 0x6c4   : > { %v1481_v31 = vpop.f32.mrf.mxu1 }
 0x6c5   : > { %v1482_v32 = vadd.f32 %v1733_v0, %v1481_v31 }
 0x6c6   : > { %v1853_v33 = vpop.f32.mrf.mxu1 }
 0x6c7   : > { %v1488_v34 = vadd.f32 %v1487_v30, %v1482_v32 }
 0x6c8   : > { %v1484_v35 = vpop.f32.mrf.mxu1 }
 0x6c9   : > { %v1489_v36 = vsel %vm598_vm1, %v1488_v34, 0.0 }
 0x6ca   : > { %1490 = vadd.xlane.f32.xlu1 %v1489_v36  ;;  %v1854_v37 = vpop.f32.mrf.mxu1 }
 0x753   : > { %v1491_v38 = vpop.xlane.xlu1 %1490 }
 0x754   : > { %v1493_v39 = vmul.f32 0.03125, %v1491_v38 }
 0x756   : > { %v1494_v40 = vsub.f32 %v1488_v34, %v1493_v39 }
 0x758   : > { %v1495_v41 = vmul.f32 %v1494_v40, %v1494_v40 }
 0x75a   : > { %v1496_v42 = vsel %vm598_vm1, %v1495_v41, 0.0 }
 0x75b   : > { %1497 = vadd.xlane.f32.xlu0 %v1496_v42 }
 0x7e4   : > { %v1498_v43 = vpop.xlane.xlu0 %1497 }
 0x7e5   : > { %v1499_v6 = vmul.f32 0.03125, %v1498_v43 }
 0x7e7   : > { %v1500_v44 = vadd.f32 1e-12, %v1499_v6 }
 0x7e9   : > { %2034 = vrsqrt.f32 %v1500_v44 }
 0x7f6   : > { %v2035_v45 = vpop.eup %2034 }
 0x7f7   : > { %v1502_v47 = vmul.f32 %v2035_v45, %v1494_v40 }
 0x7f9   : > { %v1510_v49 = vmul.f32 %v1737_v46, %v1502_v47 }
 0x7fb   : > { %v1518_v50 = vadd.f32 %v1738_v48, %v1510_v49 }
 0x7fd   : > { %1519 = vst.msk [vmem:[%s572_s19] sm:$0xff] %vm598_vm1, %v1518_v50 }
 0x7fe   : > { %2287 = shalt.err (!%p2284_p12)
}
 0x7ff   : > { %s2288_s13 = scalar_lea.hbm %s1533_s29, 128  ;;  %s2292_s11 = scalar_lea.hbm %s2907_s23, 256 }
 0x800   : > { %p2289_p10 = scmp.ne.s32.totalorder %s1533_s29, %s2288_s13  ;;  %p2293_p13 = scmp.lt.s32.totalorder %s1533_s29, %s2907_s23 }
 0x801   : > { %p2294_p3 = scmp.lt.s32.totalorder %s2292_s11, %s2288_s13 }
 0x802   : > { %p2290_p5 = pnand %p2289_p10, %p2908_p2 }
 0x803   : > { %p2295_p1 = por %p2294_p3, %p2293_p13 }
 0x804   : > { %p2291_p11 = pneg %p2290_p5 }
 0x806   : > { %p2296_p9 = pnand %p2295_p1, %p2291_p11 }
 0x808   : > { %2299 = shalt.err (!%p2296_p9)
}
 0x809   : > { %1887 = dma.vmem_to_hbm [thread:$0]  (%p2908_p2), %s1536_s20, 128, %s1533_s29, %s1521_s22  }
 0x80a PF: > { %s2909_s25 = sld [smem:[#allocation31_spill]] }
 0x80b   : > { %s2910_s30 = sld [smem:[#allocation28_spill]] }
 0x80c   : > { %s2911_s1 = sld [smem:[#allocation33_spill]] }
 0x810   : > { %p1935_p0 = scmp.ge.s32.totalorder %s2909_s25, 2 }
 0x811   : > { %s1547_s18 = sand.u32 1, %s2910_s30  }
 0x812   : > { %p2912_p7 = scmp.ne.s32.totalorder %s2911_s1, 0  ;;  %s1548_s19 = scalar_lea.sflag [#allocation7], %s1547_s18 }
 0x814   : > { %p1918_p6 = pnand %p1935_p0, %p2912_p7 }
 0x816   : > { %p1919_p4 = pneg %p1918_p6 }
 0x818   : > { %2349 = dma.done.wait (%p1919_p4), %s1548_s19, 128  }
 0x819   : > { %2351 = vsyncadd (%p1919_p4), %s1548_s19, 4294967168  ;;  %s31_s30 = sadd.s32 1, %s2909_s25   ;;  %s2913_s24 = sld [smem:[#allocation29_spill]] }
 0x81a   : > { %p28_p8 = scmp.ge.s32.totalorder %s31_s30, 4   ;;  %s2914_s27 = sld [smem:[#allocation34_spill]] }
 0x81b   : > { %s2915_s28 = sld [smem:[#allocation30_spill]]  ;;  %s2917_s25 = smov %s2358_s26 }
 0x81c   : > { %s2916_s29 = sld [smem:[#allocation32_spill]]  ;;  %30 = sbr.rel (!%p28_p8) target bundleno = 16 (0x10), region = 151 }
 0x81f   : > { %s2918_s26 = smov %s2913_s24 }
 0x821   :  { %1553 = vsyncpa [#allocation6], 1 }
 0x822   :  { %1555 = vsyncpa [#allocation6 + $0x1], 1 }
 0x823   :  { %1556 = vsyncpa [#allocation9], 1 }
 0x824   :  { %1557 = vsyncpa [#allocation12], 1 }
 0x825   :  { %1558 = vsyncpa [#allocation15], 1 }
 0x826   :  { %1559 = vsyncpa [#allocation18], 1 }
 0x827   :  { %1560 = vsyncpa [#allocation7], 1 }
 0x828   :  { %1562 = vsyncpa [#allocation7 + $0x1], 1 }

// kernel: tpu_custom_call.1
= control target key start
LH: loop header
LB: loop body
LE: loop exit
PB: predicated region body
PF: predicated region fallthrough
CT: control target
= control target key end

     0   :  { %s2887_s0 = inlined_call_operand.hbm [shape: bf16[2,8,32], index: 0, kind: input, shape index: {}]   ;;  %s2888_s1 = inlined_call_operand.hbm [shape: f32[2,1,8], index: 1, kind: input, shape index: {}]   ;;  %s2889_s2 = inlined_call_operand.hbm [shape: f32[8,8], index: 2, kind: input, shape index: {}]   ;;  %s2890_s3 = inlined_call_operand.hbm [shape: bf16[32,32], index: 3, kind: input, shape index: {}]   ;;  %s2891_s4 = inlined_call_operand.hbm [shape: f32[1,32], index: 4, kind: input, shape index: {}]   ;;  %s2892_s5 = inlined_call_operand.hbm [shape: bf16[32,32], index: 5, kind: input, shape index: {}]   ;;  %s2893_s6 = inlined_call_operand.hbm [shape: f32[1,32], index: 6, kind: input, shape index: {}]   ;;  %s2894_s7 = inlined_call_operand.hbm [shape: bf16[32,32], index: 7, kind: input, shape index: {}]   ;;  %s2895_s8 = inlined_call_operand.hbm [shape: f32[1,32], index: 8, kind: input, shape index: {}]   ;;  %s2896_s9 = inlined_call_operand.vmem [shape: bf16[32,32], index: 9, kind: input, shape index: {}]   ;;  %s2897_s10 = inlined_call_operand.vmem [shape: f32[1,32], index: 10, kind: input, shape index: {}]   ;;  %s2898_s11 = inlined_call_operand.vmem [shape: f32[1,32], index: 11, kind: input, shape index: {}]   ;;  %s2899_s12 = inlined_call_operand.vmem [shape: f32[1,32], index: 12, kind: input, shape index: {}]   ;;  %s2900_s13 = inlined_call_operand.hbm [shape: f32[2,8,32], index: 13, kind: output, shape index: {}]  }
   0x1   :  { %2906 = sst [smem:[#allocation31_spill]] %s2887_s0 }
   0x2   :  { %2907 = sst [smem:[#allocation32_spill]] %s2889_s2 }
   0x3   :  { %2908 = sst [smem:[#allocation33_spill]] %s2890_s3 }
   0x4   :  { %2909 = sst [smem:[#allocation34_spill]] %s2891_s4 }
   0x5   :  { %2910 = sst [smem:[#allocation35_spill]] %s2892_s5 }
   0x6   :  { %2911 = sst [smem:[#allocation36_spill]] %s2893_s6 }
   0x7   :  { %2912 = sst [smem:[#allocation37_spill]] %s2894_s7 }
   0x8   :  { %2913 = sst [smem:[#allocation38_spill]] %s2895_s8 }
   0x9   :  { %2914 = sst [smem:[#allocation39_spill]] %s2899_s12 }
   0xa   :  { %2915 = sst [smem:[#allocation40_spill]] %s2900_s13 }
   0xb   :  { %18 = vsyncpa [#allocation6], 0 }
   0xc   :  { %20 = vsyncpa [#allocation6 + $0x1], 0 }
   0xd   :  { %21 = vsyncpa [#allocation9], 0 }
   0xe   :  { %23 = vsyncpa [#allocation9 + $0x1], 0 }
   0xf   :  { %24 = vsyncpa [#allocation12], 0 }
  0x10   :  { %25 = vsyncpa [#allocation15], 0 }
  0x11   :  { %26 = vsyncpa [#allocation18], 0 }
  0x12   :  { %27 = vsyncpa [#allocation7], 0 }
  0x13   :  { %29 = vsyncpa [#allocation7 + $0x1], 0  ;;  %s2517_s25 = smov 0   ;;  %s2519_s26 = smov 0  }
  0x14   :  { %s2521_s27 = smov 0   ;;  %s2523_s28 = smov 0  }
  0x15   :  { %s2525_s29 = smov 0   ;;  %s2527_s30 = smov 0  }
  0x16 LB: > { %2916 = sst [smem:[#allocation28_spill]] %s2413_s27  ;;  %s2548_s14 = sadd.s32 4294967295, %s2425_s30   ;;  %s2425_s30 = sphi %s2527_s30, %s35_s30   ;;  %s2421_s29 = sphi %s2525_s29, %s2955_s29   ;;  %s2417_s28 = sphi %s2523_s28, %s2954_s28   ;;  %s2413_s27 = sphi %s2521_s27, %s2953_s27   ;;  %s2409_s26 = sphi %s2519_s26, %s2952_s26   ;;  %s2405_s25 = sphi %s2517_s25, %s2951_s25  }
  0x17   : > { %p1737_p0 = scmp.ge.s32.totalorder %s2425_s30, 1  ;;  %p2901_p1 = scmp.eq.s32.totalorder %s2548_s14, 0 }
  0x18   : > { %p368_p2 = scmp.lt.s32.totalorder %s2425_s30, 3  ;;  %s2427_s16 = smov [#allocation10]  }
  0x19   : > { %s383_s17 = sshll.u32 %s2427_s16, 4  ;;  %s2428_s18 = smov [#allocation11]   ;;  %s384_s17 = int_to_ptr.vmem [resolvable:$true] %s383_s17 }
  0x1a   : > { %p2553_p3 = pnand %p1737_p0, %p368_p2  ;;  %s393_s19 = sshll.u32 %s2428_s18, 4  ;;  %s394_s19 = int_to_ptr.vmem [resolvable:$true] %s393_s19 }
  0x1b   : > { %s2429_s21 = smov [#allocation14]   ;;  %s2098_s24 = scalar_lea.vmem %s384_s17, 128 }
  0x1c   : > { %s2917_s15 = scalar_select %p2553_p3, 1, 0 }
  0x1d   : > { %p1940_p5 = pneg %p2553_p3  ;;  %s417_s22 = sshll.u32 %s2429_s21, 4  ;;  %s418_s22 = int_to_ptr.vmem [resolvable:$true] %s417_s22 }
  0x1e   : > { %p2099_p8 = scmp.ne.s32.totalorder %s384_s17, %s2098_s24  ;;  %p2106_p11 = scmp.lt.s32.totalorder %s384_s17, %s384_s17 }
  0x1f   : > { %p2562_p6 = pnand %p1940_p5, %p2901_p1  ;;  %p2107_p12 = scmp.lt.s32.totalorder %s2098_s24, %s2098_s24 }
  0x21   : > { %p2568_p7 = pneg %p2562_p6  ;;  %p2108_p13 = por %p2107_p12, %p2106_p11 }
  0x23   : > { %p2101_p9 = pnand %p2099_p8, %p2568_p7 }
  0x25   : > { %p2102_p10 = pneg %p2101_p9 }
  0x27   : > { %p2109_p0 = pnand %p2108_p13, %p2102_p10 }
  0x29   : > { %2112 = shalt.err (!%p2109_p0)
}
  0x2a   : > { %s2920_s2 = sld [smem:[#allocation32_spill]]  ;;  %s2124_s21 = scalar_lea.vmem %s394_s19, 256 }
  0x2b   : > { %p2125_p2 = scmp.ne.s32.totalorder %s394_s19, %s2124_s21  ;;  %p2132_p1 = scmp.lt.s32.totalorder %s394_s19, %s394_s19 }
  0x2c   : > { %p2133_p8 = scmp.lt.s32.totalorder %s2124_s21, %s2124_s21 }
  0x2d   : > { %p2127_p5 = pnand %p2125_p2, %p2568_p7 }
  0x2e   : > { %p2134_p9 = por %p2133_p8, %p2132_p1 }
  0x2f   : > { %p2128_p4 = pneg %p2127_p5 }
  0x30   : > { %1943 = dma.hbm_to_vmem [thread:$0]  (!%p2562_p6), %s2920_s2, 128, %s384_s17, [#allocation9]  }
  0x31   : > { %p2135_p3 = pnand %p2134_p9, %p2128_p4 }
  0x33   : > { %2138 = shalt.err (!%p2135_p3)
}
  0x34   : > { %s2430_s24 = smov 64   ;;  %s2431_s13 = smov 4  }
  0x35   : > { %s2921_s3 = sld [smem:[#allocation33_spill]]  ;;  %s2150_s18 = scalar_lea.vmem %s418_s22, 256 }
  0x36   : > { %p2151_p10 = scmp.ne.s32.totalorder %s418_s22, %s2150_s18  ;;  %p2158_p4 = scmp.lt.s32.totalorder %s418_s22, %s418_s22 }
  0x37   : > { %p2159_p3 = scmp.lt.s32.totalorder %s2150_s18, %s2150_s18 }
  0x38   : > { %p2153_p11 = pnand %p2151_p10, %p2568_p7 }
  0x39   : > { %p2160_p12 = por %p2159_p3, %p2158_p4 }
  0x3a   : > { %p2154_p1 = pneg %p2153_p11 }
  0x3b   : > { %1946 = dma.hbm_to_vmem [thread:$0]  (!%p2562_p6), %s2921_s3, 256, %s394_s19, [#allocation12], %s2430_s24, %s2430_s24, %s2431_s13  }
  0x3c   : > { %p2161_p13 = pnand %p2160_p12, %p2154_p1 }
  0x3e   : > { %2164 = shalt.err (!%p2161_p13)
}
  0x3f   : > { %s2922_s5 = sld [smem:[#allocation35_spill]]  ;;  %s2432_s19 = smov [#allocation17]  }
  0x40   : > { %s441_s16 = sshll.u32 %s2432_s19, 4  ;;  %s2433_s17 = smov [#allocation13]   ;;  %s442_s16 = int_to_ptr.vmem [resolvable:$true] %s441_s16 }
  0x41   : > { %s407_s3 = sshll.u32 %s2433_s17, 4  ;;  %s2176_s12 = scalar_lea.vmem %s442_s16, 256  ;;  %s408_s3 = int_to_ptr.vmem [resolvable:$true] %s407_s3 }
  0x42   : > { %p2177_p0 = scmp.ne.s32.totalorder %s442_s16, %s2176_s12  ;;  %p2184_p8 = scmp.lt.s32.totalorder %s442_s16, %s442_s16 }
  0x43   : > { %p2185_p9 = scmp.lt.s32.totalorder %s2176_s12, %s2176_s12 }
  0x44   : > { %p2179_p2 = pnand %p2177_p0, %p2568_p7 }
  0x45   : > { %1952 = dma.hbm_to_vmem [thread:$0]  (!%p2562_p6), %s2922_s5, 256, %s418_s22, [#allocation15], %s2430_s24, %s2430_s24, %s2431_s13  }
  0x46   : > { %p2180_p5 = pneg %p2179_p2  ;;  %p2186_p10 = por %p2185_p9, %p2184_p8 }
  0x48   : > { %p2187_p11 = pnand %p2186_p10, %p2180_p5 }
  0x4a   : > { %2190 = shalt.err (!%p2187_p11)
}
  0x4b   : > { %s2923_s7 = sld [smem:[#allocation37_spill]]  ;;  %s2202_s18 = scalar_lea.vmem %s408_s3, 16 }
  0x4c   : > { %p2203_p1 = scmp.ne.s32.totalorder %s408_s3, %s2202_s18  ;;  %s2209_s12 = scalar_lea.vmem %s408_s3, 32 }
  0x4d   : > { %p2210_p12 = scmp.lt.s32.totalorder %s408_s3, %s408_s3  ;;  %p2211_p13 = scmp.lt.s32.totalorder %s2209_s12, %s2202_s18 }
  0x4e   : > { %p2205_p4 = pnand %p2203_p1, %p2568_p7 }
  0x4f   : > { %p2212_p0 = por %p2211_p13, %p2210_p12 }
  0x50   : > { %p2206_p3 = pneg %p2205_p4 }
  0x51   : > { %1958 = dma.hbm_to_vmem [thread:$0]  (!%p2562_p6), %s2923_s7, 256, %s442_s16, [#allocation18], %s2430_s24, %s2430_s24, %s2431_s13  }
  0x52   : > { %p2213_p2 = pnand %p2212_p0, %p2206_p3 }
  0x54   : > { %2216 = shalt.err (!%p2213_p2)
}
  0x55   : > { %s2924_s4 = sld [smem:[#allocation34_spill]]  ;;  %s2434_s13 = smov [#allocation16]  }
  0x56   : > { %s431_s24 = sshll.u32 %s2434_s13, 4  ;;  %s2435_s16 = smov [#allocation19]   ;;  %s432_s24 = int_to_ptr.vmem [resolvable:$true] %s431_s24 }
  0x57   : > { %s455_s17 = sshll.u32 %s2435_s16, 4  ;;  %s2228_s2 = scalar_lea.vmem %s432_s24, 16  ;;  %s456_s17 = int_to_ptr.vmem [resolvable:$true] %s455_s17 }
  0x58   : > { %p2229_p5 = scmp.ne.s32.totalorder %s432_s24, %s2228_s2  ;;  %s2235_s22 = scalar_lea.vmem %s432_s24, 32 }
  0x59   : > { %p2236_p10 = scmp.lt.s32.totalorder %s432_s24, %s432_s24  ;;  %p2237_p11 = scmp.lt.s32.totalorder %s2235_s22, %s2228_s2 }
  0x5a   : > { %p2231_p8 = pnand %p2229_p5, %p2568_p7 }
  0x5b   : > { %1949 = dma.hbm_to_vmem [thread:$0]  (!%p2562_p6), %s2924_s4, 16, %s408_s3, [#allocation12]  }
  0x5c   : > { %p2232_p9 = pneg %p2231_p8  ;;  %p2238_p1 = por %p2237_p11, %p2236_p10 }
  0x5e   : > { %p2239_p4 = pnand %p2238_p1, %p2232_p9 }
  0x60   : > { %2242 = shalt.err (!%p2239_p4)
}
  0x61   : > { %s2925_s6 = sld [smem:[#allocation36_spill]]  ;;  %s2254_s12 = scalar_lea.vmem %s456_s17, 16 }
  0x62   : > { %p2255_p3 = scmp.ne.s32.totalorder %s456_s17, %s2254_s12  ;;  %s2261_s21 = scalar_lea.vmem %s456_s17, 32 }
  0x63   : > { %p2262_p0 = scmp.lt.s32.totalorder %s456_s17, %s456_s17  ;;  %p2263_p2 = scmp.lt.s32.totalorder %s2261_s21, %s2254_s12 }
  0x64   : > { %p2257_p12 = pnand %p2255_p3, %p2568_p7 }
  0x65   : > { %p2264_p5 = por %p2263_p2, %p2262_p0 }
  0x66   : > { %p2258_p13 = pneg %p2257_p12 }
  0x67   : > { %1955 = dma.hbm_to_vmem [thread:$0]  (!%p2562_p6), %s2925_s6, 16, %s432_s24, [#allocation15]  }
  0x68   : > { %p2265_p8 = pnand %p2264_p5, %p2258_p13 }
  0x6a   : > { %2268 = shalt.err (!%p2265_p8)
}
  0x6b   : > { %s2926_s8 = sld [smem:[#allocation38_spill]]  ;;  %s1736_s23 = sadd.s32 4294967294, %s2425_s30  }
  0x6c   : > { %s47_s24 = sadd.s32 1, %s2421_s29  ;;  %s54_s20 = sadd.s32 1, %s2413_s27 }
  0x6d   : > { %p49_p7 = scmp.ge.s32.totalorder %s47_s24, 2  ;;  %p61_p9 = scmp.ne.s32.totalorder %s2413_s27, %s2409_s26 }
  0x6e   : > { %p62_p10 = scmp.eq.s32.totalorder %s2425_s30, 0  ;;  %p67_p11 = scmp.ne.s32.totalorder %s2409_s26, %s2405_s25 }
  0x6f   : > { %s2957_s24 = smov (%p49_p7, %s47_s24), 0  ;;  %p2929_p4 = scmp.eq.s32.totalorder %s2548_s14, 0 }
  0x70   : > { %2927 = sst [smem:[#allocation29_spill]] %s2957_s24  ;;  %p2640_p1 = por %p62_p10, %p61_p9 }
  0x71   : > { %1961 = dma.hbm_to_vmem [thread:$0]  (!%p2562_p6), %s2926_s8, 16, %s456_s17, [#allocation18]  }
  0x72   : > { %p2646_p6 = por %p2929_p4, %p67_p11  ;;  %s51_s2 = ssub.s32 %s2421_s29, %s2957_s24 }
  0x73   : > { %p355_p3 = scmp.eq.s32.totalorder %s2548_s14, 1  ;;  %p52_p12 = scmp.eq.s32.totalorder %s51_s2, 0 }
  0x74   : > { %p361_p13 = scmp.eq.s32.totalorder %s1736_s23, 1  ;;  %p1980_p2 = scmp.lt.s32.totalorder %s2425_s30, 2 }
  0x75   : > { %p2653_p0 = por %p355_p3, %p61_p9  ;;  %s478_s12 = sand.u32 1, %s2413_s27  }
  0x76   : > { %s2659_s18 = scalar_select %p52_p12, %s2413_s27, %s54_s20  }
  0x77   : > { %p2661_p5 = por %p361_p13, %p67_p11  ;;  %s1746_s21 = sshll.u32 %s478_s12, 2 }
  0x78   : > { %2932 = sst [smem:[#allocation30_spill]] %s2659_s18  ;;  %s1747_s19 = sshll.u32 %s2421_s29, 6 }
  0x79   : > { %s2934_s0 = sld [smem:[#allocation31_spill]]  ;;  %s482_s2 = scalar_lea.vmem [#allocation5], %s1746_s21 }
  0x7a   : > { %s489_s23 = sshll.u32 %s482_s2, 4  ;;  %p2672_p8 = pnand %p1980_p2, %p2640_p1  ;;  %s490_s23 = int_to_ptr.vmem [resolvable:$true] %s489_s23 }
  0x7b   : > { %s496_s20 = sand.u32 1, %s2425_s30   ;;  %s479_s7 = scalar_lea.sflag [#allocation6], %s478_s12 }
  0x7c   : > { %p2271_p7 = pneg %p2672_p8  ;;  %s2282_s8 = scalar_lea.vmem %s490_s23, 64 }
  0x7d   : > { %p2283_p9 = scmp.ne.s32.totalorder %s490_s23, %s2282_s8  ;;  %s2436_s4 = smov [#allocation5]  }
  0x7e   : > { %s2287_s21 = sshll.u32 %s2436_s4, 4  ;;  %s2288_s21 = int_to_ptr.vmem [resolvable:$false] %s2287_s21 }
  0x7f   : > { %s487_s5 = scalar_lea.hbm %s2934_s0, %s1747_s19  ;;  %p2285_p10 = pnand %p2283_p9, %p2271_p7 }
  0x80   : > { %s2289_s16 = scalar_lea.vmem %s2288_s21, 128  ;;  %p2290_p1 = scmp.lt.s32.totalorder %s490_s23, %s2288_s21 }
  0x81   : > { %p2286_p11 = pneg %p2285_p10  ;;  %p2291_p4 = scmp.lt.s32.totalorder %s2289_s16, %s2282_s8 }
  0x83   : > { %p2292_p3 = por %p2291_p4, %p2290_p1 }
  0x85   : > { %p2293_p12 = pnand %p2292_p3, %p2286_p11 }
  0x87   : > { %2296 = shalt.err (!%p2293_p12)
}
  0x88   : > { %1965 = dma.hbm_to_vmem [thread:$0]  (!%p2672_p8), %s487_s5, 64, %s490_s23, %s479_s7  }
  0x89   : > { %s1748_s19 = sshll.u32 %s2421_s29, 4  ;;  %s499_s13 = scalar_lea.vmem [#allocation8], %s478_s12 }
  0x8a   : > { %s506_s2 = sshll.u32 %s499_s13, 4  ;;  %s504_s18 = scalar_lea.hbm %s2888_s1, %s1748_s19  ;;  %s507_s2 = int_to_ptr.vmem [resolvable:$true] %s506_s2 }
  0x8b   : > { %s497_s4 = scalar_lea.sflag [#allocation9], %s496_s20  ;;  %s2310_s27 = scalar_lea.vmem %s507_s2, 16 }
  0x8c   : > { %p2311_p13 = scmp.ne.s32.totalorder %s507_s2, %s2310_s27  ;;  %s2437_s8 = smov [#allocation8]  }
  0x8d   : > { %s2315_s21 = sshll.u32 %s2437_s8, 4  ;;  %s2316_s21 = int_to_ptr.vmem [resolvable:$false] %s2315_s21 }
  0x8e   : > { %p2313_p2 = pnand %p2311_p13, %p2271_p7  ;;  %s2317_s16 = scalar_lea.vmem %s2316_s21, 32 }
  0x8f   : > { %p2318_p10 = scmp.lt.s32.totalorder %s507_s2, %s2316_s21  ;;  %p2319_p11 = scmp.lt.s32.totalorder %s2317_s16, %s2310_s27 }
  0x90   : > { %p2314_p9 = pneg %p2313_p2 }
  0x91   : > { %p2320_p1 = por %p2319_p11, %p2318_p10 }
  0x93   : > { %p2321_p4 = pnand %p2320_p1, %p2314_p9 }
  0x95   : > { %2324 = shalt.err (!%p2321_p4)
}
  0x96   : > { %1968 = dma.hbm_to_vmem [thread:$0]  (!%p2672_p8), %s504_s18, 16, %s507_s2, %s497_s4  }
  0x97   : > { %p2936_p3 = scmp.ne.s32.totalorder %s2917_s15, 0 }
  0x98   : > { %s2696_s0 = sand.u32 (!%p2936_p3), 1, %s2409_s26  }
  0x99   : > { %515 = sbr.rel (%p2936_p3) target bundleno = 2044 (0x7fc), region = 72  ;;  %s1750_s5 = sshll.u32 (!%p2936_p3), %s2696_s0, 2 }
  0x9a   : > { %s518_s7 = scalar_lea.sflag (!%p2936_p3), [#allocation6], %s2696_s0  ;;  %s2700_s24 = scalar_lea.vmem (!%p2936_p3), [#allocation5], %s1750_s5 }
  0x9e   : > { %2376 = dma.done.wait (%p2646_p6), %s518_s7, 64  }
  0x9f   : > { %2378 = vsyncadd (%p2646_p6), %s518_s7, 4294967232  ;;  %s526_s6 = sand.u32 1, %s2548_s14   ;;  %s529_s15 = scalar_lea.vmem [#allocation8], %s2696_s0 }
  0xa0   : > { %s527_s27 = scalar_lea.sflag [#allocation9], %s526_s6 }
  0xa1   : > { %2380 = dma.done.wait (%p2646_p6), %s527_s27, 16  }
  0xa2   : > { %2382 = vsyncadd (%p2646_p6), %s527_s27, 4294967280  ;;  %p2937_p8 = scmp.eq.s32.totalorder %s2548_s14, 0 }
  0xa4   : > { %2384 = dma.done.wait (%p2937_p8), [#allocation9], 128   ;;  %p2938_p7 = pmov %p2937_p8 }
  0xa6   : > { %2386 = vsyncadd (%p2938_p7), [#allocation9], 4294967168  ;;  %p2939_p12 = pmov %p2938_p7 }
  0xa7   : > { %p2940_p13 = pmov %p2938_p7 }
  0xa8   : > { %2388 = dma.done.wait (%p2939_p12), [#allocation12], 272  }
  0xa9   : > { %2390 = vsyncadd (%p2940_p13), [#allocation12], 4294967024  ;;  %p2941_p2 = pmov %p2938_p7 }
  0xab   : > { %2392 = dma.done.wait (%p2941_p2), [#allocation15], 272   ;;  %p2942_p9 = pmov %p2941_p2 }
  0xac   : > { %p2943_p6 = pmov %p2941_p2 }
  0xad   : > { %2394 = vsyncadd (%p2942_p9), [#allocation15], 4294967024 }
  0xae   : > { %2396 = dma.done.wait (%p2943_p6), [#allocation18], 272   ;;  %p2944_p10 = pmov %p2941_p2 }
  0xaf   : > { %v2438_v0 = vmov 0.0   ;;  %vm2439_vm0 = vmmov 0   ;;  %v2061_v1 = vld [vmem:[#allocation14 + $0x8] sm:$0xff]   ;;  %v2062_v2 = vld [vmem:[#allocation14] sm:$0xff]   ;;  %vm629_vm1 = vcmask 261120   ;;  %v2063_v4 = vld [vmem:[#allocation11 + $0x8] sm:$0xff]  }
  0xb0   : > { %2398 = vsyncadd (%p2944_p10), [#allocation18], 4294967024  ;;  %1826 = vmatprep.subr.bf16.mxu0 %v2438_v0  ;;  %1830 = vmatprep.mubr.msk.bf16.mxu0 %vm2439_vm0, %v2438_v0  ;;  %v605_v3 = vld [vmem:[%s2700_s24] sm:$0xf]  ;;  %v2064_v5 = vld [vmem:[#allocation11] sm:$0xff]   ;;  %s2440_s14 = smov 104  }
  0xb1   : > { %1834 = vmatprep.subr.bf16.mxu1 %v2438_v0  ;;  %1838 = vmatprep.mubr.msk.bf16.mxu1 %vm2439_vm0, %v2438_v0  ;;  %v2742_v6 = vld [vmem:[%s2700_s24] sm:$0xf]  ;;  %v1759_v7 = vld [vmem:[#allocation16] ss:$0 sm:$0xff]  ;;  %s2441_s17 = smov 120   ;;  %s2442_s18 = smov 112  }
  0xb2   : > { %1827 = vmatpush3.bf16.msra.mxu0 %v2061_v1  ;;  %v1768_v13 = vld [vmem:[#allocation13] ss:$0 sm:$0xff]  ;;  %v2066_v22 = vld [vmem:[#allocation17] sm:$0xff]   ;;  %vm769_vm2 = vcmask 60416   ;;  %vm994_vm3 = vcmask 1043456   ;;  %vm990_vm4 = vcmask 64512  }
  0xb3   : > { %1828 = vmatprep.subr.bf16.mxu0 %v2438_v0  ;;  %v2065_v16 = vld [vmem:[#allocation17 + $0x8] sm:$0xff]   ;;  %v1763_v47 = vld [vmem:[#allocation19] ss:$0 sm:$0xff]  ;;  %v979_v56 = vld [vmem:[#allocation10] sm:$0xff]  ;;  %s2443_s12 = smov 8   ;;  %s2444_s23 = smov 16  }
  0xb4   : > { %1835 = vmatpush3.bf16.msra.mxu1 %v2065_v16  ;;  %v1772_v57 = vld [vmem:[%s529_s15] ss:$0 sm:$0xff]  ;;  %s2445_s4 = smov 24   ;;  %vm1215_vm5 = vcmask 126016   ;;  %vm1332_vm6 = vcmask 191616   ;;  %vm1449_vm7 = vcmask 257216  }
  0xb5   : > { %1836 = vmatprep.subr.bf16.mxu1 %v2438_v0  ;;  %v987_v58 = vadd.f32 %v1772_v57, %v979_v56  ;;  %s1758_s16 = sshll.u32 %s2696_s0, 3  ;;  %s2945_s27 = sld [smem:[#allocation39_spill]] }
  0xb6   : > { %1829 = vmatpush3.bf16.msra.mxu0 %v2062_v2  ;;  %s1791_s15 = sshll.u32 %s2417_s28, 7  ;;  %s1552_s19 = scalar_lea.sflag [#allocation7], %s2696_s0 }
  0xb7   : > { %1842 = vmatprep.subr.bf16.mxu0 %v2438_v0  ;;  %s2446_s2 = smov [#allocation20]  }
  0xb8   : > { %1837 = vmatpush3.bf16.msra.mxu1 %v2066_v22 }
  0xb9   : > { %1831 = vmatmul.mubr.msk.bf16.vlgmr.msra.gmra.mxu0 %vm629_vm1, %v605_v3  ;;  %1850 = vmatprep.subr.bf16.mxu1 %v2438_v0 }
  0xba   : > { %1843 = vmatpush3.bf16.msra.mxu0 %v2063_v4  ;;  %1846 = vmatprep.mubr.msk.bf16.mxu0 %vm2439_vm0, %v2438_v0 }
  0xbb   : > { %1844 = vmatprep.subr.bf16.mxu0 %v2438_v0  ;;  %1839 = vmatmul.mubr.msk.bf16.vlgmr.msra.gmra.mxu1 %vm629_vm1, %v605_v3 }
  0xbc   : > { %1852 = vmatprep.mubr.msk.bf16.mxu1 %vm2439_vm0, %v2438_v0 }
  0xbe   : > { %1845 = vmatpush3.bf16.msra.mxu0 %v2064_v5 }
  0xbf   : > { %1856 = vmatprep.subr.bf16.mxu0 %v2438_v0 }
  0xc1   : > { %1847 = vmatmul.mubr.msk.bf16.vlgmr.msra.gmra.mxu0 %vm629_vm1, %v2742_v6 }
  0xc2   : > { %1858 = vmatprep.mubr.msk.bf16.mxu0 %vm2439_vm0, %v2438_v0 }
 0x179   : > { %v667_v8 = vpop.f32.mrf.mxu0 }
 0x17a   : > { %v668_v9 = vadd.f32 %v1759_v7, %v667_v8 }
 0x17b   : > { %v1832_v10 = vpop.f32.mrf.mxu0  ;;  %v730_v48 = vpop.f32.mrf.mxu1 }
 0x17c   : > { %863 = vrot.lane.b32.xlu1 %v668_v9, %s2440_s14  ;;  %774 = vrot.lane.b32.xlu0 %v668_v9, %s2441_s17  ;;  %v731_v49 = vadd.f32 %v1763_v47, %v730_v48 }
 0x17d   : > { %v670_v11 = vpop.f32.mrf.mxu0  ;;  %v1840_v50 = vpop.f32.mrf.mxu1 }
 0x17e   : > { %v2784_v51 = vpack.c.bf16 %v731_v49, %v731_v49 }
 0x17f   : > { %v1833_v12 = vpop.f32.mrf.mxu0  ;;  %v733_v52 = vpop.f32.mrf.mxu1 }
 0x180   : > { %820 = vrot.lane.b32.xlu0 %v668_v9, %s2442_s18  ;;  %772 = vst.msk [vmem:[#allocation3] sm:$0xf] %vm769_vm2, %v2784_v51 }
 0x181   : > { %v972_v14 = vpop.f32.mrf.mxu0  ;;  %v1841_v53 = vpop.f32.mrf.mxu1 }
 0x182   : > { %v973_v15 = vadd.f32 %v1768_v13, %v972_v14 }
 0x183   : > { %v1848_v17 = vpop.f32.mrf.mxu0 }
 0x184   : > { %v978_v18 = vmul.f32 0.35355338, %v973_v15 }
 0x185   : > { %v975_v19 = vpop.f32.mrf.mxu0 }
 0x186   : > { %v988_v20 = vpack.c.bf16 %v978_v18, %v978_v18 }
 0x187   : > { %v1849_v21 = vpop.f32.mrf.mxu0  ;;  %v1050_v54 = vld [vmem:[#allocation3] sm:$0xf] }
 0x188   : > { %1101 = vrot.lane.b32.xlu1 %v988_v20, %s2441_s17  ;;  %v1055_v55 = vsel %vm994_vm3, %v1050_v54, 0 }
 0x189   : > { %1857 = vmatpush3.bf16.msra.mxu0 %v1055_v55 }
 0x18a   : > { %1868 = vmatprep.subr.bf16.mxu0 %v2438_v0 }
 0x18c   : > { %1218 = vrot.lane.b32.xlu1 %v988_v20, %s2442_s18 }
 0x190   : > { %1335 = vrot.lane.b32.xlu1 %v988_v20, %s2440_s14 }
 0x1ee   : > { %v775_v23 = vpop.permute.xlu0 %774  ;;  %v864_v26 = vpop.permute.xlu1 %863 }
 0x1ef   : > { %v2054_v24 = vpack.i.bf16 %v775_v23, %v668_v9 }
 0x1f1   : > { %2055 = vxpose.xlu0.b32.start.end [1/1] (short) (narrow) %v2054_v24, 8 }
 0x1f2   : > { %v821_v25 = vpop.permute.xlu0 %820 }
 0x1f3   : > { %823 = vxpose.xlu1.b32.start.end [1/1] (short) (narrow) %v821_v25, 8 }
 0x1f5   : > { %866 = vxpose.xlu0.b32.start.end [1/1] (short) (narrow) %v864_v26, 8 }
 0x1fa   : > { %v1102_v27 = vpop.permute.xlu1 %1101 }
 0x1fe   : > { %v1219_v28 = vpop.permute.xlu1 %1218 }
 0x202   : > { %v1336_v29 = vpop.permute.xlu1 %1335 }
 0x26d   : > { %v2056_v30 = vpop.trf.xlu0 }
 0x26e   : > { %v2060_v31 = vunpack.i.h.bf16 %v2056_v30  ;;  %v2057_v32 = vunpack.i.l.bf16 %v2056_v30 }
 0x26f   : > { %v839_v33 = vpop.trf.xlu1 }
 0x270   : > { %v809_v34 = vpack.c.bf16 %v2060_v31, %v2060_v31  ;;  %v768_v35 = vpack.c.bf16 %v2057_v32, %v2057_v32  ;;  %v855_v36 = vpack.c.bf16 %v839_v33, %v839_v33 }
 0x271   : > { %v882_v37 = vpop.trf.xlu0 }
 0x272   : > { %811 = vst.msk [vmem:[#allocation2 + $0x4] sm:$0xf] %vm769_vm2, %v809_v34  ;;  %770 = vst.msk [vmem:[#allocation2] sm:$0xf] %vm769_vm2, %v768_v35  ;;  %v898_v38 = vpack.c.bf16 %v882_v37, %v882_v37 }
 0x273   : > { %857 = vst.msk [vmem:[#allocation2 + $0x8] sm:$0xf] %vm769_vm2, %v855_v36 }
 0x274   : > { %900 = vst.msk [vmem:[#allocation2 + $0xc] sm:$0xf] %vm769_vm2, %v898_v38 }
 0x279   : > { %v989_v39 = vld [vmem:[#allocation2] sm:$0xf]  ;;  %v1099_v41 = vld [vmem:[#allocation2 + $0x4] sm:$0xf] }
 0x27a   : > { %v996_v40 = vsel %vm994_vm3, %v989_v39, 0  ;;  %v1107_v42 = vsel %vm994_vm3, %v1099_v41, 0  ;;  %v1217_v43 = vld [vmem:[#allocation2 + $0x8] sm:$0xf] }
 0x27b   : > { %1851 = vmatpush3.bf16.msra.mxu1 %v996_v40  ;;  %v1224_v44 = vsel %vm994_vm3, %v1217_v43, 0  ;;  %v1334_v45 = vld [vmem:[#allocation2 + $0xc] sm:$0xf] }
 0x27c   : > { %1862 = vmatprep.subr.bf16.mxu1 %v2438_v0  ;;  %v1341_v46 = vsel %vm994_vm3, %v1334_v45, 0 }
 0x27e   : > { %1853 = vmatmul.mubr.msk.bf16.vlgmr.msra.gmra.mxu1 %vm990_vm4, %v988_v20 }
 0x27f   : > { %1863 = vmatpush3.bf16.msra.mxu1 %v1107_v42  ;;  %1864 = vmatprep.mubr.msk.bf16.mxu1 %vm2439_vm0, %v2438_v0 }
 0x280   : > { %1874 = vmatprep.subr.bf16.mxu1 %v2438_v0 }
 0x286   : > { %1865 = vmatmul.mubr.msk.bf16.vlgmr.msra.gmra.mxu1 %vm990_vm4, %v1102_v27 }
 0x287   : > { %1875 = vmatpush3.bf16.msra.mxu1 %v1224_v44  ;;  %1876 = vmatprep.mubr.msk.bf16.mxu1 %vm2439_vm0, %v2438_v0 }
 0x288   : > { %1886 = vmatprep.subr.bf16.mxu1 %v2438_v0 }
 0x28e   : > { %1877 = vmatmul.mubr.msk.bf16.vlgmr.msra.gmra.mxu1 %vm990_vm4, %v1219_v28 }
 0x28f   : > { %1887 = vmatpush3.bf16.msra.mxu1 %v1341_v46  ;;  %1888 = vmatprep.mubr.msk.bf16.mxu1 %vm2439_vm0, %v2438_v0 }
 0x290   : > { %1898 = vmatprep.subr.bf16.mxu1 %v2438_v0 }
 0x296   : > { %1889 = vmatmul.mubr.msk.bf16.vlgmr.msra.gmra.mxu1 %vm990_vm4, %v1336_v29 }
 0x297   : > { %1902 = vmatprep.mubr.msk.bf16.mxu1 %vm2439_vm0, %v2438_v0 }
 0x33e   : > { %v1032_v59 = vpop.f32.mrf.mxu1 }
 0x33f   : > { %v1033_v60 = vadd.f32 %v1032_v59, %v987_v58 }
 0x340   : > { %v1854_v61 = vpop.f32.mrf.mxu1 }
 0x341   : > { %v1038_v62 = vsel %vm990_vm4, %v1033_v60, -inf }
 0x342   : > { %1039 = vmax.xlane.f32.xlu0 %v1038_v62  ;;  %v1035_v63 = vpop.f32.mrf.mxu1 }
 0x344   : > { %v1855_v1 = vpop.f32.mrf.mxu1 }
 0x346   : > { %v1143_v2 = vpop.f32.mrf.mxu1 }
 0x347   : > { %v1144_v3 = vadd.f32 %v1143_v2, %v987_v58 }
 0x348   : > { %v1866_v4 = vpop.f32.mrf.mxu1 }
 0x349   : > { %v1149_v5 = vsel %vm990_vm4, %v1144_v3, -inf }
 0x34a   : > { %1150 = vmax.xlane.f32.xlu1 %v1149_v5  ;;  %v1146_v7 = vpop.f32.mrf.mxu1 }
 0x34c   : > { %v1867_v8 = vpop.f32.mrf.mxu1 }
 0x34e   : > { %v1260_v9 = vpop.f32.mrf.mxu1 }
 0x34f   : > { %v1261_v10 = vadd.f32 %v1260_v9, %v987_v58 }
 0x350   : > { %v1878_v11 = vpop.f32.mrf.mxu1 }
 0x351   : > { %v1266_v12 = vsel %vm990_vm4, %v1261_v10, -inf }
 0x352   : > { %1267 = vmax.xlane.f32.xlu0 %v1266_v12  ;;  %v1263_v13 = vpop.f32.mrf.mxu1 }
 0x354   : > { %v1879_v14 = vpop.f32.mrf.mxu1 }
 0x356   : > { %v1377_v15 = vpop.f32.mrf.mxu1 }
 0x357   : > { %v1378_v16 = vadd.f32 %v1377_v15, %v987_v58 }
 0x358   : > { %v1890_v17 = vpop.f32.mrf.mxu1 }
 0x359   : > { %v1383_v18 = vsel %vm990_vm4, %v1378_v16, -inf }
 0x35a   : > { %1384 = vmax.xlane.f32.xlu0 %v1383_v18  ;;  %v1380_v19 = vpop.f32.mrf.mxu1 }
 0x35b   : > { %v2067_v19 = vld [vmem:[%s2896_s9 + $0x8] sm:$0xff]  }
 0x35c   : > { %v1891_v20 = vpop.f32.mrf.mxu1  ;;  %1899 = vmatpush3.bf16.msra.mxu1 %v2067_v19 }
 0x35d   : > { %v2068_v20 = vld [vmem:[%s2896_s9] sm:$0xff]   ;;  %1900 = vmatprep.subr.bf16.mxu1 %v2438_v0 }
 0x360   : > { %1901 = vmatpush3.bf16.msra.mxu1 %v2068_v20 }
 0x3cb   : > { %v1040_v21 = vpop.xlane.xlu0 %1039 }
 0x3cc   : > { %v1041_v22 = vsub.f32 %v1033_v60, %v1040_v21 }
 0x3ce   : > { %v1042_v23 = vmul.f32 1.442695, %v1041_v22 }
 0x3d0   : > { %2069 = vpow2.f32 %v1042_v23 }
 0x3d3   : > { %v1151_v24 = vpop.xlane.xlu1 %1150 }
 0x3d4   : > { %v1152_v25 = vsub.f32 %v1144_v3, %v1151_v24 }
 0x3d6   : > { %v1153_v26 = vmul.f32 1.442695, %v1152_v25 }
 0x3d8   : > { %2071 = vpow2.f32 %v1153_v26 }
 0x3db   : > { %v1268_v27 = vpop.xlane.xlu0 %1267 }
 0x3dc   : > { %v1269_v28 = vsub.f32 %v1261_v10, %v1268_v27 }
 0x3dd   : > { %v2070_v29 = vpop.eup %2069 }
 0x3de   : > { %v1270_v30 = vmul.f32 1.442695, %v1269_v28  ;;  %v1044_v31 = vsel %vm990_vm4, %v2070_v29, 0.0 }
 0x3df   : > { %1045 = vadd.xlane.f32.xlu0 %v1044_v31 }
 0x3e0   : > { %2073 = vpow2.f32 %v1270_v30  ;;  %v1518_v30 = vunpack.c.l.bf16 %v2742_v6 }
 0x3e3   : > { %v1385_v36 = vpop.xlane.xlu0 %1384 }
 0x3e4   : > { %v1386_v37 = vsub.f32 %v1378_v16, %v1385_v36 }
 0x3e5   : > { %v2072_v32 = vpop.eup %2071 }
 0x3e6   : > { %v1155_v33 = vsel %vm990_vm4, %v2072_v32, 0.0  ;;  %v1387_v38 = vmul.f32 1.442695, %v1386_v37 }
 0x3e7   : > { %1156 = vadd.xlane.f32.xlu1 %v1155_v33 }
 0x3e8   : > { %2075 = vpow2.f32 %v1387_v38 }
 0x3ed   : > { %v2074_v34 = vpop.eup %2073 }
 0x3ee   : > { %v1272_v35 = vsel %vm990_vm4, %v2074_v34, 0.0 }
 0x3ef   : > { %1273 = vadd.xlane.f32.xlu0 %v1272_v35 }
 0x3f5   : > { %v2076_v39 = vpop.eup %2075 }
 0x3f6   : > { %v1389_v40 = vsel %vm990_vm4, %v2076_v39, 0.0 }
 0x3f8   : > { %858 = vrot.lane.b32.xlu1 %v2784_v51, %s2442_s18 }
 0x405   : > { %815 = vrot.lane.b32.xlu0 %v2784_v51, %s2441_s17 }
 0x41c   : > { %1390 = vadd.xlane.f32.xlu1 %v1389_v40 }
 0x42d   : > { %901 = vrot.lane.b32.xlu1 %v2784_v51, %s2440_s14  ;;  %s603_s14 = scalar_lea.vmem [#allocation20], %s1758_s16 }
 0x42e   : > { %s1566_s17 = sshll.u32 %s603_s14, 4  ;;  %s1567_s17 = int_to_ptr.vmem [resolvable:$true] %s1566_s17 }
 0x42f   : > { %s2325_s13 = scalar_lea.vmem %s1567_s17, 128 }
 0x430   : > { %p2326_p11 = scmp.ne.s32.totalorder %s1567_s17, %s2325_s13 }
 0x432   : > { %p2327_p1 = pnand %p2326_p11, %p2653_p0 }
 0x434   : > { %p2328_p4 = pneg %p2327_p1 }
 0x468   : > { %v1046_v41 = vpop.xlane.xlu0 %1045 }
 0x469   : > { %2077 = vrcp.f32 %v1046_v41 }
 0x470   : > { %v1157_v42 = vpop.xlane.xlu1 %1156 }
 0x471   : > { %2079 = vrcp.f32 %v1157_v42 }
 0x474   : > { %v859_v43 = vpop.permute.xlu1 %858 }
 0x475   : > { %862 = vst.msk [vmem:[#allocation3 + $0x8] sm:$0xf] %vm769_vm2, %v859_v43 }
 0x476   : > { %v2078_v44 = vpop.eup %2077 }
 0x477   : > { %v1048_v45 = vmul.f32 %v2078_v44, %v2070_v29 }
 0x478   : > { %v1274_v46 = vpop.xlane.xlu0 %1273 }
 0x479   : > { %v1049_v47 = vpack.c.bf16 %v1048_v45, %v1048_v45  ;;  %2081 = vrcp.f32 %v1274_v46  ;;  %v1788_v46 = vld [vmem:[%s2898_s11] ss:$0 sm:$0xff] }
 0x47b   : > { %1859 = vmatmul.mubr.msk.bf16.vlgmr.msra.gmra.mxu0 %vm990_vm4, %v1049_v47 }
 0x47c   : > { %v816_v48 = vpop.permute.xlu0 %815  ;;  %1870 = vmatprep.mubr.msk.bf16.mxu0 %vm2439_vm0, %v2438_v0  ;;  %v1278_v53 = vld [vmem:[#allocation3 + $0x8] sm:$0xf] }
 0x47d   : > { %819 = vst.msk [vmem:[#allocation3 + $0x4] sm:$0xf] %vm769_vm2, %v816_v48  ;;  %v1283_v56 = vsel %vm994_vm3, %v1278_v53, 0  ;;  %v1789_v48 = vld [vmem:[%s2945_s27] ss:$0 sm:$0xff] }
 0x47e   : > { %v2080_v49 = vpop.eup %2079 }
 0x47f   : > { %v1159_v50 = vmul.f32 %v2080_v49, %v2072_v32 }
 0x481   : > { %v1160_v54 = vpack.c.bf16 %v1159_v50, %v1159_v50 }
 0x484   : > { %v1161_v51 = vld [vmem:[#allocation3 + $0x4] sm:$0xf] }
 0x485   : > { %v1166_v52 = vsel %vm994_vm3, %v1161_v51, 0 }
 0x486   : > { %1869 = vmatpush3.bf16.msra.mxu0 %v1166_v52  ;;  %v2082_v55 = vpop.eup %2081 }
 0x487   : > { %1880 = vmatprep.subr.bf16.mxu0 %v2438_v0  ;;  %v1276_v57 = vmul.f32 %v2082_v55, %v2074_v34 }
 0x489   : > { %1871 = vmatmul.mubr.msk.bf16.vlgmr.msra.gmra.mxu0 %vm990_vm4, %v1160_v54  ;;  %v1277_v58 = vpack.c.bf16 %v1276_v57, %v1276_v57 }
 0x48a   : > { %1881 = vmatpush3.bf16.msra.mxu0 %v1283_v56  ;;  %1882 = vmatprep.mubr.msk.bf16.mxu0 %vm2439_vm0, %v2438_v0 }
 0x48b   : > { %1892 = vmatprep.subr.bf16.mxu0 %v2438_v0 }
 0x491   : > { %1883 = vmatmul.mubr.msk.bf16.vlgmr.msra.gmra.mxu0 %vm990_vm4, %v1277_v58 }
 0x492   : > { %1894 = vmatprep.mubr.msk.bf16.mxu0 %vm2439_vm0, %v2438_v0  ;;  %v1784_v0 = vld [vmem:[%s2897_s10] ss:$0 sm:$0xff] }
 0x4a5   : > { %v1391_v59 = vpop.xlane.xlu1 %1390 }
 0x4a6   : > { %2083 = vrcp.f32 %v1391_v59 }
 0x4a9   : > { %v902_v60 = vpop.permute.xlu1 %901 }
 0x4aa   : > { %905 = vst.msk [vmem:[#allocation3 + $0xc] sm:$0xf] %vm769_vm2, %v902_v60 }
 0x4b1   : > { %v1395_v61 = vld [vmem:[#allocation3 + $0xc] sm:$0xf] }
 0x4b2   : > { %v1400_v62 = vsel %vm994_vm3, %v1395_v61, 0 }
 0x4b3   : > { %v2084_v63 = vpop.eup %2083  ;;  %1893 = vmatpush3.bf16.msra.mxu0 %v1400_v62 }
 0x4b4   : > { %v1393_v1 = vmul.f32 %v2084_v63, %v2076_v39 }
 0x4b6   : > { %v1394_v2 = vpack.c.bf16 %v1393_v1, %v1393_v1 }
 0x4b8   : > { %1895 = vmatmul.mubr.msk.bf16.vlgmr.msra.gmra.mxu0 %vm990_vm4, %v1394_v2 }
 0x53b   : > { %v1091_v3 = vpop.f32.mrf.mxu0 }
 0x53c   : > { %v1097_v4 = vpack.c.bf16 %v1091_v3, %v1091_v3 }
 0x53d   : > { %v1860_v5 = vpop.f32.mrf.mxu0 }
 0x53e   : > { %1098 = vst.msk [vmem:[#allocation4] sm:$0xf] %vm769_vm2, %v1097_v4 }
 0x53f   : > { %v1094_v7 = vpop.f32.mrf.mxu0 }
 0x541   : > { %v1861_v8 = vpop.f32.mrf.mxu0 }
 0x549   : > { %v1202_v9 = vpop.f32.mrf.mxu0 }
 0x54a   : > { %v1795_v10 = vpack.c.bf16 %v1202_v9, %v1202_v9 }
 0x54b   : > { %v1872_v11 = vpop.f32.mrf.mxu0 }
 0x54c   : > { %1212 = vrot.lane.b32.xlu0 %v1795_v10, %s2443_s12 }
 0x54d   : > { %v1205_v12 = vpop.f32.mrf.mxu0 }
 0x54f   : > { %v1873_v13 = vpop.f32.mrf.mxu0 }
 0x551   : > { %v1319_v14 = vpop.f32.mrf.mxu0 }
 0x552   : > { %v1796_v15 = vpack.c.bf16 %v1319_v14, %v1319_v14 }
 0x553   : > { %v1884_v16 = vpop.f32.mrf.mxu0 }
 0x554   : > { %1329 = vrot.lane.b32.xlu1 %v1796_v15, %s2444_s23  ;;  %s2946_s23 = sld [smem:[#allocation40_spill]] }
 0x555   : > { %v1322_v17 = vpop.f32.mrf.mxu0 }
 0x557   : > { %v1885_v18 = vpop.f32.mrf.mxu0 }
 0x55a   : > { %s1564_s20 = scalar_lea.hbm %s2946_s23, %s1791_s15 }
 0x578   : > { %v1436_v21 = vpop.f32.mrf.mxu0 }
 0x579   : > { %v1797_v22 = vpack.c.bf16 %v1436_v21, %v1436_v21 }
 0x57a   : > { %v1896_v23 = vpop.f32.mrf.mxu0 }
 0x57b   : > { %1446 = vrot.lane.b32.xlu0 %v1797_v22, %s2445_s4  ;;  %s2329_s4 = sshll.u32 %s2446_s2, 4  ;;  %s2330_s4 = int_to_ptr.vmem [resolvable:$false] %s2329_s4 }
 0x57c   : > { %v1439_v24 = vpop.f32.mrf.mxu0  ;;  %s2331_s28 = scalar_lea.vmem %s2330_s4, 256  ;;  %p2332_p3 = scmp.lt.s32.totalorder %s1567_s17, %s2330_s4 }
 0x57d   : > { %p2333_p8 = scmp.lt.s32.totalorder %s2331_s28, %s2325_s13 }
 0x57e   : > { %v1897_v25 = vpop.f32.mrf.mxu0 }
 0x57f   : > { %p2334_p7 = por %p2333_p8, %p2332_p3 }
 0x581   : > { %p2335_p12 = pnand %p2334_p7, %p2328_p4 }
 0x5be   : > { %v1213_v26 = vpop.permute.xlu0 %1212 }
 0x5bf   : > { %1216 = vst.msk [vmem:[#allocation4] sm:$0xf] %vm1215_vm5, %v1213_v26 }
 0x5c6   : > { %v1330_v27 = vpop.permute.xlu1 %1329 }
 0x5c7   : > { %1333 = vst.msk [vmem:[#allocation4] sm:$0xf] %vm1332_vm6, %v1330_v27 }
 0x5ed   : > { %v1447_v28 = vpop.permute.xlu0 %1446 }
 0x5ee   : > { %1450 = vst.msk [vmem:[#allocation4] sm:$0xf] %vm1449_vm7, %v1447_v28 }
 0x5f5   : > { %v1451_v29 = vld [vmem:[#allocation4] sm:$0xf] }
 0x5f6   : > { %1903 = vmatmul.mubr.msk.bf16.vlgmr.msra.gmra.mxu1 %vm629_vm1, %v1451_v29 }
 0x6b6   : > { %v1512_v31 = vpop.f32.mrf.mxu1 }
 0x6b7   : > { %v1513_v32 = vadd.f32 %v1784_v0, %v1512_v31 }
 0x6b8   : > { %v1904_v33 = vpop.f32.mrf.mxu1 }
 0x6b9   : > { %v1519_v34 = vadd.f32 %v1518_v30, %v1513_v32 }
 0x6ba   : > { %v1515_v35 = vpop.f32.mrf.mxu1 }
 0x6bb   : > { %v1520_v36 = vsel %vm629_vm1, %v1519_v34, 0.0 }
 0x6bc   : > { %1521 = vadd.xlane.f32.xlu1 %v1520_v36  ;;  %v1905_v37 = vpop.f32.mrf.mxu1 }
 0x745   : > { %v1522_v38 = vpop.xlane.xlu1 %1521 }
 0x746   : > { %v1524_v39 = vmul.f32 0.03125, %v1522_v38 }
 0x748   : > { %v1525_v40 = vsub.f32 %v1519_v34, %v1524_v39 }
 0x74a   : > { %v1526_v41 = vmul.f32 %v1525_v40, %v1525_v40 }
 0x74c   : > { %v1527_v42 = vsel %vm629_vm1, %v1526_v41, 0.0 }
 0x74d   : > { %1528 = vadd.xlane.f32.xlu0 %v1527_v42 }
 0x7d6   : > { %v1529_v43 = vpop.xlane.xlu0 %1528 }
 0x7d7   : > { %v1530_v6 = vmul.f32 0.03125, %v1529_v43 }
 0x7d9   : > { %v1531_v44 = vadd.f32 1e-12, %v1530_v6 }
 0x7db   : > { %2085 = vrsqrt.f32 %v1531_v44 }
 0x7e8   : > { %v2086_v45 = vpop.eup %2085 }
 0x7e9   : > { %v1533_v47 = vmul.f32 %v2086_v45, %v1525_v40 }
 0x7eb   : > { %v1541_v49 = vmul.f32 %v1788_v46, %v1533_v47 }
 0x7ed   : > { %v1549_v50 = vadd.f32 %v1789_v48, %v1541_v49 }
 0x7ef   : > { %1550 = vst.msk [vmem:[%s603_s14] sm:$0xff] %vm629_vm1, %v1549_v50 }
 0x7f0   : > { %2338 = shalt.err (!%p2335_p12)
}
 0x7f1   : > { %s2339_s8 = scalar_lea.hbm %s1564_s20, 128  ;;  %s2343_s16 = scalar_lea.hbm %s2946_s23, 256 }
 0x7f2   : > { %p2340_p13 = scmp.ne.s32.totalorder %s1564_s20, %s2339_s8  ;;  %p2344_p6 = scmp.lt.s32.totalorder %s1564_s20, %s2946_s23 }
 0x7f3   : > { %p2345_p10 = scmp.lt.s32.totalorder %s2343_s16, %s2339_s8 }
 0x7f4   : > { %p2341_p2 = pnand %p2340_p13, %p2653_p0 }
 0x7f5   : > { %p2346_p11 = por %p2345_p10, %p2344_p6 }
 0x7f6   : > { %p2342_p9 = pneg %p2341_p2 }
 0x7f8   : > { %p2347_p1 = pnand %p2346_p11, %p2342_p9 }
 0x7fa   : > { %2350 = shalt.err (!%p2347_p1)
}
 0x7fb   : > { %1938 = dma.vmem_to_hbm [thread:$0]  (%p2653_p0), %s1567_s17, 128, %s1564_s20, %s1552_s19  }
 0x7fc PF: > { %s1578_s24 = sand.u32 1, %s2405_s25   ;;  %p2947_p4 = scmp.ge.s32.totalorder %s2425_s30, 2 }
 0x7fd   : > { %s1579_s6 = scalar_lea.sflag [#allocation7], %s1578_s24 }
 0x7fe   : > { %p1970_p3 = pnand %p2947_p4, %p2661_p5 }
 0x800   : > { %p1971_p8 = pneg %p1970_p3 }
 0x802   : > { %2400 = dma.done.wait (%p1971_p8), %s1579_s6, 128  }
 0x803   : > { %2402 = vsyncadd (%p1971_p8), %s1579_s6, 4294967168  ;;  %s35_s30 = sadd.s32 1, %s2425_s30   ;;  %s2948_s27 = sld [smem:[#allocation28_spill]] }
 0x804   : > { %p32_p7 = scmp.ge.s32.totalorder %s35_s30, 4   ;;  %s2949_s15 = sld [smem:[#allocation30_spill]] }
 0x805   : > { %s2950_s22 = sld [smem:[#allocation29_spill]]  ;;  %s2951_s25 = smov %s2409_s26 }
 0x806   : > { %s2954_s28 = smov %s2421_s29 }
 0x807   :  { %34 = sbr.rel (!%p32_p7) target bundleno = 22 (0x16), region = 166 }
 0x809   : > { %s2952_s26 = smov %s2948_s27 }
 0x80a   : > { %s2953_s27 = smov %s2949_s15 }
 0x80b   : > { %s2955_s29 = smov %s2950_s22 }
 0x80c   :  { %1584 = vsyncpa [#allocation6], 1 }
 0x80d   :  { %1586 = vsyncpa [#allocation6 + $0x1], 1 }
 0x80e   :  { %1587 = vsyncpa [#allocation9], 1 }
 0x80f   :  { %1589 = vsyncpa [#allocation9 + $0x1], 1 }
 0x810   :  { %1590 = vsyncpa [#allocation12], 1 }
 0x811   :  { %1591 = vsyncpa [#allocation15], 1 }
 0x812   :  { %1592 = vsyncpa [#allocation18], 1 }
 0x813   :  { %1593 = vsyncpa [#allocation7], 1 }
 0x814   :  { %1595 = vsyncpa [#allocation7 + $0x1], 1 }

</bundles_post_ra>
